<compile_context>
chip_gen: v7x
topology: tpu7x:2x2x1
jax: 0.10.0
libtpu: 0.0.40
codegen_flags: <defaults>
</compile_context>

<pallas_src>
import functools

import jax
import jax.numpy as jnp
from jax.experimental import pallas as pl
from jax.experimental.pallas import tpu as pltpu

# ---- static dims ------------------------------------------------------------
D_IN = 784            # 28 * 28 (unpadded: full-dim block, K handled by MXU)
H1 = 512
H2 = 256
D_OUT = 784
D_OUT_PAD = 896       # 7 * 128, lane-aligned decoder output slab
HEAD_PAD = 128        # fused (mu | logvar) head padded to one lane-dense slab


def _round_up(n, m):
    return ((n + m - 1) // m) * m


# ---- kernel -----------------------------------------------------------------
def vae_forward_kernel(
    x_ref, eps_ref,                 # [TB, 784] bf16, [TB, L] f32
    w_e1_ref, b_e1_ref,             # [784, 512] bf16, [1, 512] f32
    w_e2_ref, b_e2_ref,             # [512, 256] bf16, [1, 256] f32
    w_head_ref, b_head_ref,         # [256, 128] bf16, [1, 128] f32 (mu|logvar)
    w_f4_ref, b_f4_ref,             # [L, 256]   bf16, [1, 256] f32
    w_d1_ref, b_d1_ref,             # [256, 512] bf16, [1, 512] f32
    w_d2_ref, b_d2_ref,             # [512, 896] bf16, [1, 896] f32
    dec_ref, mulv_ref,              # outputs: [TB, 896] bf16, [TB, 128] f32
    *, latent_dim,
):
    bf16 = jnp.bfloat16
    f32 = jnp.float32

    x = x_ref[...]                                                   # bf16

    # ---- encoder: Linear(784,512)+ReLU, Linear(512,256)+ReLU ----
    h = jnp.dot(x, w_e1_ref[...], preferred_element_type=f32) + b_e1_ref[...]
    h = jnp.maximum(h, 0.0)
    h = jnp.dot(h.astype(bf16), w_e2_ref[...], preferred_element_type=f32) + b_e2_ref[...]
    h = jnp.maximum(h, 0.0)

    # ---- fused (mu | logvar) head -> lane-dense [TB, 128] slab ----
    mulv = (jnp.dot(h.astype(bf16), w_head_ref[...], preferred_element_type=f32)
            + b_head_ref[...])
    mu = mulv[:, :latent_dim]
    lv = mulv[:, latent_dim:2 * latent_dim]

    # ---- reparameterize: z = eps * exp(0.5 * logvar) + mu (f32 elementwise) ----
    z = eps_ref[...] * jnp.exp(0.5 * lv) + mu

    # ---- decode: ReLU(fc4(z)) -> Linear(256,512)+ReLU -> Linear(512,784)+Sigmoid ----
    h3 = jnp.dot(z.astype(bf16), w_f4_ref[...], preferred_element_type=f32) + b_f4_ref[...]
    h3 = jnp.maximum(h3, 0.0)
    h4 = jnp.dot(h3.astype(bf16), w_d1_ref[...], preferred_element_type=f32) + b_d1_ref[...]
    h4 = jnp.maximum(h4, 0.0)
    logits = (jnp.dot(h4.astype(bf16), w_d2_ref[...], preferred_element_type=f32)
              + b_d2_ref[...])

    # sigmoid(x) == 0.5 * (tanh(0.5 * x) + 1): single EUP transcendental.
    # Store bf16 to halve the decoder-output HBM writeback.
    dec_ref[...] = (0.5 * (jnp.tanh(0.5 * logits) + 1.0)).astype(dec_ref.dtype)
    mulv_ref[...] = mulv


# ---- parameter construction / packing ---------------------------------------
def init_linear(key, fan_in, fan_out):
    """PyTorch nn.Linear default init: U(-1/sqrt(fan_in), 1/sqrt(fan_in))."""
    kw, kb = jax.random.split(key)
    bound = 1.0 / jnp.sqrt(fan_in)
    w = jax.random.uniform(kw, (fan_in, fan_out), jnp.float32, -bound, bound)
    b = jax.random.uniform(kb, (1, fan_out), jnp.float32, -bound, bound)
    return w, b


def make_params(key, latent_dim):
    keys = jax.random.split(key, 7)
    w_e1, b_e1 = init_linear(keys[0], D_IN, H1)
    w_e2, b_e2 = init_linear(keys[1], H1, H2)
    w_mu, b_mu = init_linear(keys[2], H2, latent_dim)
    w_lv, b_lv = init_linear(keys[3], H2, latent_dim)
    w_f4, b_f4 = init_linear(keys[4], latent_dim, H2)
    w_d1, b_d1 = init_linear(keys[5], H2, H1)
    w_d2, b_d2 = init_linear(keys[6], H1, D_OUT)
    return (w_e1, b_e1, w_e2, b_e2, w_mu, b_mu, w_lv, b_lv,
            w_f4, b_f4, w_d1, b_d1, w_d2, b_d2)


def pack_params(params, latent_dim):
    """One-time layout packing: bf16 weights, fused lane-padded (mu|logvar)
    head, lane-aligned decoder output. Biases stay f32 (added after the f32
    matmul accumulation)."""
    (w_e1, b_e1, w_e2, b_e2, w_mu, b_mu, w_lv, b_lv,
     w_f4, b_f4, w_d1, b_d1, w_d2, b_d2) = params
    bf = lambda a: a.astype(jnp.bfloat16)

    # fused + lane-padded mu/logvar head: [256, 128]
    w_head = jnp.zeros((H2, HEAD_PAD), jnp.bfloat16)
    w_head = w_head.at[:, :latent_dim].set(bf(w_mu))
    w_head = w_head.at[:, latent_dim:2 * latent_dim].set(bf(w_lv))
    b_head = jnp.zeros((1, HEAD_PAD), jnp.float32)
    b_head = b_head.at[:, :latent_dim].set(b_mu)
    b_head = b_head.at[:, latent_dim:2 * latent_dim].set(b_lv)

    # pad decoder output dim: [512, 784] -> [512, 896] (zero cols); bias too
    w_d2p = jnp.zeros((H1, D_OUT_PAD), jnp.bfloat16).at[:, :D_OUT].set(bf(w_d2))
    b_d2p = jnp.zeros((1, D_OUT_PAD), jnp.float32).at[:, :D_OUT].set(b_d2)

    return (bf(w_e1), b_e1, bf(w_e2), b_e2, w_head, b_head,
            bf(w_f4), b_f4, bf(w_d1), b_d1, w_d2p, b_d2p)


# ---- wrapper ----------------------------------------------------------------
@jax.jit
def vae_forward(x, packed, eps):
    B = x.shape[0]
    latent_dim = eps.shape[1]
    x2 = x.reshape(B, D_IN).astype(jnp.bfloat16)

    # Batch tiling: weights stay VMEM-resident across grid steps (constant
    # index_map); x/eps/dec/mulv tiles are pipelined over the batch.
    # TB chosen so mid/large batches get >= 2-4 steps (pipelining + v7x dual-TC)
    # while tiny batches pad to at most the next multiple of 16 rows.
    if B >= 1024:
        TB = 256
    elif B > 128:
        TB = 128
    else:
        TB = _round_up(B, 16)       # 16-row multiple for the bf16 x tile
    B_pad = _round_up(B, TB)
    num_tiles = B_pad // TB

    x_pad = jnp.zeros((B_pad, D_IN), jnp.bfloat16).at[:B, :].set(x2)
    eps_pad = jnp.zeros((B_pad, latent_dim), jnp.float32).at[:B, :].set(
        eps.astype(jnp.float32))

    grid = (num_tiles,)

    def act_spec(n):
        return pl.BlockSpec((TB, n), lambda i: (i, 0))

    def w_spec(a):
        return pl.BlockSpec(a.shape, lambda i: (0, 0))

    in_specs = [act_spec(D_IN), act_spec(latent_dim)] + [w_spec(p) for p in packed]
    out_specs = (act_spec(D_OUT_PAD), act_spec(HEAD_PAD))

    weight_bytes = sum(int(p.size) * p.dtype.itemsize for p in packed)
    flops = 2 * B_pad * (D_IN * H1 + H1 * H2 + H2 * HEAD_PAD
                         + latent_dim * H2 + H2 * H1 + H1 * D_OUT_PAD)
    bytes_accessed = (weight_bytes
                      + B_pad * (D_IN * 2 + latent_dim * 4
                                 + D_OUT_PAD * 2 + HEAD_PAD * 4))

    # With < 4 tiles, "parallel" on v7x would duplicate the full weight DMA on
    # both TensorCores for almost no compute overlap -> run single-core.
    dims = ("parallel",) if num_tiles >= 4 else ("arbitrary",)

    dec_p, mulv_p = pl.pallas_call(
        functools.partial(vae_forward_kernel, latent_dim=latent_dim),
        out_shape=(
            jax.ShapeDtypeStruct((B_pad, D_OUT_PAD), jnp.bfloat16),
            jax.ShapeDtypeStruct((B_pad, HEAD_PAD), jnp.float32),
        ),
        grid=grid,
        in_specs=in_specs,
        out_specs=out_specs,
        compiler_params=pltpu.CompilerParams(
            dimension_semantics=dims,
            vmem_limit_bytes=32 * 1024 * 1024,
        ),
        cost_estimate=pl.CostEstimate(
            flops=flops,
            transcendentals=B_pad * (latent_dim + D_OUT_PAD),
            bytes_accessed=bytes_accessed,
        ),
    )(x_pad, eps_pad, *packed)

    dec = dec_p[:B, :D_OUT].astype(jnp.float32)
    mu = mulv_p[:B, :latent_dim]
    lv = mulv_p[:B, latent_dim:2 * latent_dim]
    return dec, mu, lv


if __name__ == "__main__":
    latent_dim = 32
    B = 8

    key = jax.random.PRNGKey(0)
    k_params, k_x, k_eps = jax.random.split(key, 3)

    params = make_params(k_params, latent_dim)
    packed = pack_params(params, latent_dim)

    # MNIST-like input, NCHW [B, 1, 28, 28], values in [0, 1]
    x = jax.random.uniform(k_x, (B, 1, 28, 28), jnp.float32)
    # reparameterization noise (deterministic stand-in for torch .normal_())
    eps = jax.random.normal(k_eps, (B, latent_dim), jnp.float32)

    dec, mu, lv = vae_forward(x, packed, eps)
    jax.block_until_ready((dec, mu, lv))

    assert dec.shape == (B, D_OUT)
    assert mu.shape == (B, latent_dim) and lv.shape == (B, latent_dim)

    # plain-JAX reference mirroring the kernel's bf16-operand / f32-accumulate matmuls
    (w_e1, b_e1, w_e2, b_e2, w_mu, b_mu, w_lv, b_lv,
     w_f4, b_f4, w_d1, b_d1, w_d2, b_d2) = params
    bf = lambda a: a.astype(jnp.bfloat16)
    dotf = lambda a, w: jnp.dot(bf(a), bf(w), preferred_element_type=jnp.float32)
    xf = x.reshape(B, D_IN)
    h = jnp.maximum(dotf(xf, w_e1) + b_e1, 0.0)
    h = jnp.maximum(dotf(h, w_e2) + b_e2, 0.0)
    mu_r = dotf(h, w_mu) + b_mu
    lv_r = dotf(h, w_lv) + b_lv
    z_r = eps * jnp.exp(0.5 * lv_r) + mu_r
    h3 = jnp.maximum(dotf(z_r, w_f4) + b_f4, 0.0)
    h4 = jnp.maximum(dotf(h3, w_d1) + b_d1, 0.0)
    dec_r = jax.nn.sigmoid(dotf(h4, w_d2) + b_d2)

    assert jnp.allclose(mu, mu_r, atol=5e-2, rtol=5e-2)
    assert jnp.allclose(lv, lv_r, atol=5e-2, rtol=5e-2)
    assert jnp.allclose(dec, dec_r, atol=5e-2, rtol=5e-2)

    print("KERNEL_OK")
</pallas_src>

<mosaic_0001>
module attributes {stable_mosaic.version = 11 : i64} {
  func.func @vae_forward_kernel(%arg0: i32, %arg1: memref<16x784xbf16, #tpu.memory_space<vmem>>, %arg2: memref<16x32xf32, #tpu.memory_space<vmem>>, %arg3: memref<784x512xbf16, #tpu.memory_space<vmem>>, %arg4: memref<1x512xf32, #tpu.memory_space<vmem>>, %arg5: memref<512x256xbf16, #tpu.memory_space<vmem>>, %arg6: memref<1x256xf32, #tpu.memory_space<vmem>>, %arg7: memref<256x128xbf16, #tpu.memory_space<vmem>>, %arg8: memref<1x128xf32, #tpu.memory_space<vmem>>, %arg9: memref<32x256xbf16, #tpu.memory_space<vmem>>, %arg10: memref<1x256xf32, #tpu.memory_space<vmem>>, %arg11: memref<256x512xbf16, #tpu.memory_space<vmem>>, %arg12: memref<1x512xf32, #tpu.memory_space<vmem>>, %arg13: memref<512x896xbf16, #tpu.memory_space<vmem>>, %arg14: memref<1x896xf32, #tpu.memory_space<vmem>>, %arg15: memref<16x896xbf16, #tpu.memory_space<vmem>>, %arg16: memref<16x128xf32, #tpu.memory_space<vmem>>) attributes {dimension_semantics = [#tpu.dimension_semantics<arbitrary>], iteration_bounds = array<i64: 1>, scalar_prefetch = 0 : i64, scratch_operands = 0 : i64, tpu.core_type = #tpu.core_type<tc>, window_params = [{transform_indices = @transform_0, window_bounds = array<i64: 16, 784>}, {transform_indices = @transform_1, window_bounds = array<i64: 16, 32>}, {pipeline_mode = #tpu.pipeline_mode<synchronous>, transform_indices = @transform_2, window_bounds = array<i64: 784, 512>}, {pipeline_mode = #tpu.pipeline_mode<synchronous>, transform_indices = @transform_3, window_bounds = array<i64: 1, 512>}, {pipeline_mode = #tpu.pipeline_mode<synchronous>, transform_indices = @transform_4, window_bounds = array<i64: 512, 256>}, {pipeline_mode = #tpu.pipeline_mode<synchronous>, transform_indices = @transform_5, window_bounds = array<i64: 1, 256>}, {pipeline_mode = #tpu.pipeline_mode<synchronous>, transform_indices = @transform_6, window_bounds = array<i64: 256, 128>}, {pipeline_mode = #tpu.pipeline_mode<synchronous>, transform_indices = @transform_7, window_bounds = array<i64: 1, 128>}, {pipeline_mode = #tpu.pipeline_mode<synchronous>, transform_indices = @transform_8, window_bounds = array<i64: 32, 256>}, {pipeline_mode = #tpu.pipeline_mode<synchronous>, transform_indices = @transform_9, window_bounds = array<i64: 1, 256>}, {pipeline_mode = #tpu.pipeline_mode<synchronous>, transform_indices = @transform_10, window_bounds = array<i64: 256, 512>}, {pipeline_mode = #tpu.pipeline_mode<synchronous>, transform_indices = @transform_11, window_bounds = array<i64: 1, 512>}, {pipeline_mode = #tpu.pipeline_mode<synchronous>, transform_indices = @transform_12, window_bounds = array<i64: 512, 896>}, {pipeline_mode = #tpu.pipeline_mode<synchronous>, transform_indices = @transform_13, window_bounds = array<i64: 1, 896>}, {transform_indices = @transform_14, window_bounds = array<i64: 16, 896>}, {transform_indices = @transform_15, window_bounds = array<i64: 16, 128>}]} {
    %c0 = arith.constant 0 : index
    %c0_0 = arith.constant 0 : index
    %0 = vector.load %arg1[%c0, %c0_0] : memref<16x784xbf16, #tpu.memory_space<vmem>>, vector<16x784xbf16>
    %c0_1 = arith.constant 0 : index
    %c0_2 = arith.constant 0 : index
    %1 = vector.load %arg3[%c0_1, %c0_2] : memref<784x512xbf16, #tpu.memory_space<vmem>>, vector<784x512xbf16>
    %cst = arith.constant dense<0.000000e+00> : vector<16x512xf32>
    %2 = tpu.matmul %0, %1, %cst {dimension_numbers = #tpu.dot_dimension_numbers<[1], [0], [0], [1], [0, 0, 1, 1], [], []>} : vector<16x784xbf16>, vector<784x512xbf16>, vector<16x512xf32> -> vector<16x512xf32>
    %c0_3 = arith.constant 0 : index
    %c0_4 = arith.constant 0 : index
    %3 = vector.load %arg4[%c0_3, %c0_4] : memref<1x512xf32, #tpu.memory_space<vmem>>, vector<1x512xf32>
    %4 = vector.broadcast %3 : vector<1x512xf32> to vector<16x512xf32>
    %5 = arith.addf %2, %4 : vector<16x512xf32>
    %cst_5 = arith.constant 0.000000e+00 : f32
    %6 = vector.broadcast %cst_5 : f32 to vector<16x512xf32>
    %7 = arith.maximumf %5, %6 : vector<16x512xf32>
    %8 = arith.truncf %7 : vector<16x512xf32> to vector<16x512xbf16>
    %c0_6 = arith.constant 0 : index
    %c0_7 = arith.constant 0 : index
    %9 = vector.load %arg5[%c0_6, %c0_7] : memref<512x256xbf16, #tpu.memory_space<vmem>>, vector<512x256xbf16>
    %cst_8 = arith.constant dense<0.000000e+00> : vector<16x256xf32>
    %10 = tpu.matmul %8, %9, %cst_8 {dimension_numbers = #tpu.dot_dimension_numbers<[1], [0], [0], [1], [0, 0, 1, 1], [], []>} : vector<16x512xbf16>, vector<512x256xbf16>, vector<16x256xf32> -> vector<16x256xf32>
    %c0_9 = arith.constant 0 : index
    %c0_10 = arith.constant 0 : index
    %11 = vector.load %arg6[%c0_9, %c0_10] : memref<1x256xf32, #tpu.memory_space<vmem>>, vector<1x256xf32>
    %12 = vector.broadcast %11 : vector<1x256xf32> to vector<16x256xf32>
    %13 = arith.addf %10, %12 : vector<16x256xf32>
    %cst_11 = arith.constant 0.000000e+00 : f32
    %14 = vector.broadcast %cst_11 : f32 to vector<16x256xf32>
    %15 = arith.maximumf %13, %14 : vector<16x256xf32>
    %16 = arith.truncf %15 : vector<16x256xf32> to vector<16x256xbf16>
    %c0_12 = arith.constant 0 : index
    %c0_13 = arith.constant 0 : index
    %17 = vector.load %arg7[%c0_12, %c0_13] : memref<256x128xbf16, #tpu.memory_space<vmem>>, vector<256x128xbf16>
    %cst_14 = arith.constant dense<0.000000e+00> : vector<16x128xf32>
    %18 = tpu.matmul %16, %17, %cst_14 {dimension_numbers = #tpu.dot_dimension_numbers<[1], [0], [0], [1], [0, 0, 1, 1], [], []>} : vector<16x256xbf16>, vector<256x128xbf16>, vector<16x128xf32> -> vector<16x128xf32>
    %c0_15 = arith.constant 0 : index
    %c0_16 = arith.constant 0 : index
    %19 = vector.load %arg8[%c0_15, %c0_16] : memref<1x128xf32, #tpu.memory_space<vmem>>, vector<1x128xf32>
    %20 = vector.broadcast %19 : vector<1x128xf32> to vector<16x128xf32>
    %21 = arith.addf %18, %20 : vector<16x128xf32>
    %22 = vector.extract_strided_slice %21 {offsets = [0, 0], sizes = [16, 32], strides = [1, 1]} : vector<16x128xf32> to vector<16x32xf32>
    %23 = vector.extract_strided_slice %21 {offsets = [0, 32], sizes = [16, 32], strides = [1, 1]} : vector<16x128xf32> to vector<16x32xf32>
    %c0_17 = arith.constant 0 : index
    %c0_18 = arith.constant 0 : index
    %24 = vector.load %arg2[%c0_17, %c0_18] : memref<16x32xf32, #tpu.memory_space<vmem>>, vector<16x32xf32>
    %cst_19 = arith.constant 5.000000e-01 : f32
    %25 = vector.broadcast %cst_19 : f32 to vector<16x32xf32>
    %26 = arith.mulf %25, %23 : vector<16x32xf32>
    %27 = math.exp %26 : vector<16x32xf32>
    %28 = arith.mulf %24, %27 : vector<16x32xf32>
    %29 = arith.addf %28, %22 : vector<16x32xf32>
    %30 = arith.truncf %29 : vector<16x32xf32> to vector<16x32xbf16>
    %c0_20 = arith.constant 0 : index
    %c0_21 = arith.constant 0 : index
    %31 = vector.load %arg9[%c0_20, %c0_21] : memref<32x256xbf16, #tpu.memory_space<vmem>>, vector<32x256xbf16>
    %cst_22 = arith.constant dense<0.000000e+00> : vector<16x256xf32>
    %32 = tpu.matmul %30, %31, %cst_22 {dimension_numbers = #tpu.dot_dimension_numbers<[1], [0], [0], [1], [0, 0, 1, 1], [], []>} : vector<16x32xbf16>, vector<32x256xbf16>, vector<16x256xf32> -> vector<16x256xf32>
    %c0_23 = arith.constant 0 : index
    %c0_24 = arith.constant 0 : index
    %33 = vector.load %arg10[%c0_23, %c0_24] : memref<1x256xf32, #tpu.memory_space<vmem>>, vector<1x256xf32>
    %34 = vector.broadcast %33 : vector<1x256xf32> to vector<16x256xf32>
    %35 = arith.addf %32, %34 : vector<16x256xf32>
    %cst_25 = arith.constant 0.000000e+00 : f32
    %36 = vector.broadcast %cst_25 : f32 to vector<16x256xf32>
    %37 = arith.maximumf %35, %36 : vector<16x256xf32>
    %38 = arith.truncf %37 : vector<16x256xf32> to vector<16x256xbf16>
    %c0_26 = arith.constant 0 : index
    %c0_27 = arith.constant 0 : index
    %39 = vector.load %arg11[%c0_26, %c0_27] : memref<256x512xbf16, #tpu.memory_space<vmem>>, vector<256x512xbf16>
    %cst_28 = arith.constant dense<0.000000e+00> : vector<16x512xf32>
    %40 = tpu.matmul %38, %39, %cst_28 {dimension_numbers = #tpu.dot_dimension_numbers<[1], [0], [0], [1], [0, 0, 1, 1], [], []>} : vector<16x256xbf16>, vector<256x512xbf16>, vector<16x512xf32> -> vector<16x512xf32>
    %c0_29 = arith.constant 0 : index
    %c0_30 = arith.constant 0 : index
    %41 = vector.load %arg12[%c0_29, %c0_30] : memref<1x512xf32, #tpu.memory_space<vmem>>, vector<1x512xf32>
    %42 = vector.broadcast %41 : vector<1x512xf32> to vector<16x512xf32>
    %43 = arith.addf %40, %42 : vector<16x512xf32>
    %cst_31 = arith.constant 0.000000e+00 : f32
    %44 = vector.broadcast %cst_31 : f32 to vector<16x512xf32>
    %45 = arith.maximumf %43, %44 : vector<16x512xf32>
    %46 = arith.truncf %45 : vector<16x512xf32> to vector<16x512xbf16>
    %c0_32 = arith.constant 0 : index
    %c0_33 = arith.constant 0 : index
    %47 = vector.load %arg13[%c0_32, %c0_33] : memref<512x896xbf16, #tpu.memory_space<vmem>>, vector<512x896xbf16>
    %cst_34 = arith.constant dense<0.000000e+00> : vector<16x896xf32>
    %48 = tpu.matmul %46, %47, %cst_34 {dimension_numbers = #tpu.dot_dimension_numbers<[1], [0], [0], [1], [0, 0, 1, 1], [], []>} : vector<16x512xbf16>, vector<512x896xbf16>, vector<16x896xf32> -> vector<16x896xf32>
    %c0_35 = arith.constant 0 : index
    %c0_36 = arith.constant 0 : index
    %49 = vector.load %arg14[%c0_35, %c0_36] : memref<1x896xf32, #tpu.memory_space<vmem>>, vector<1x896xf32>
    %50 = vector.broadcast %49 : vector<1x896xf32> to vector<16x896xf32>
    %51 = arith.addf %48, %50 : vector<16x896xf32>
    %cst_37 = arith.constant 5.000000e-01 : f32
    %52 = vector.broadcast %cst_37 : f32 to vector<16x896xf32>
    %53 = arith.mulf %52, %51 : vector<16x896xf32>
    %54 = math.tanh %53 : vector<16x896xf32>
    %cst_38 = arith.constant 1.000000e+00 : f32
    %55 = vector.broadcast %cst_38 : f32 to vector<16x896xf32>
    %56 = arith.addf %54, %55 : vector<16x896xf32>
    %cst_39 = arith.constant 5.000000e-01 : f32
    %57 = vector.broadcast %cst_39 : f32 to vector<16x896xf32>
    %58 = arith.mulf %57, %56 : vector<16x896xf32>
    %59 = arith.truncf %58 : vector<16x896xf32> to vector<16x896xbf16>
    %c0_40 = arith.constant 0 : index
    %c0_41 = arith.constant 0 : index
    %60 = vector.load %arg15[%c0_40, %c0_41] : memref<16x896xbf16, #tpu.memory_space<vmem>>, vector<16x896xbf16>
    tpu.vector_store %arg15[%c0_40, %c0_41], %59 {strides = array<i32>} : memref<16x896xbf16, #tpu.memory_space<vmem>>, vector<16x896xbf16>,
    %c0_42 = arith.constant 0 : index
    %c0_43 = arith.constant 0 : index
    %61 = vector.load %arg16[%c0_42, %c0_43] : memref<16x128xf32, #tpu.memory_space<vmem>>, vector<16x128xf32>
    tpu.vector_store %arg16[%c0_42, %c0_43], %21 {strides = array<i32>} : memref<16x128xf32, #tpu.memory_space<vmem>>, vector<16x128xf32>,
    return
  }
  func.func @transform_0(%arg0: i32) -> (i32, i32) {
    %c0_i32 = arith.constant 0 : i32
    %c0_i32_0 = arith.constant 0 : i32
    return %arg0, %c0_i32 : i32, i32
  }
  func.func @transform_1(%arg0: i32) -> (i32, i32) {
    %c0_i32 = arith.constant 0 : i32
    %c0_i32_0 = arith.constant 0 : i32
    return %arg0, %c0_i32 : i32, i32
  }
  func.func @transform_2(%arg0: i32) -> (i32, i32) {
    %c0_i32 = arith.constant 0 : i32
    %c0_i32_0 = arith.constant 0 : i32
    %c0_i32_1 = arith.constant 0 : i32
    return %c0_i32, %c0_i32_0 : i32, i32
  }
  func.func @transform_3(%arg0: i32) -> (i32, i32) {
    %c0_i32 = arith.constant 0 : i32
    %c0_i32_0 = arith.constant 0 : i32
    %c0_i32_1 = arith.constant 0 : i32
    return %c0_i32, %c0_i32_0 : i32, i32
  }
  func.func @transform_4(%arg0: i32) -> (i32, i32) {
    %c0_i32 = arith.constant 0 : i32
    %c0_i32_0 = arith.constant 0 : i32
    %c0_i32_1 = arith.constant 0 : i32
    return %c0_i32, %c0_i32_0 : i32, i32
  }
  func.func @transform_5(%arg0: i32) -> (i32, i32) {
    %c0_i32 = arith.constant 0 : i32
    %c0_i32_0 = arith.constant 0 : i32
    %c0_i32_1 = arith.constant 0 : i32
    return %c0_i32, %c0_i32_0 : i32, i32
  }
  func.func @transform_6(%arg0: i32) -> (i32, i32) {
    %c0_i32 = arith.constant 0 : i32
    %c0_i32_0 = arith.constant 0 : i32
    %c0_i32_1 = arith.constant 0 : i32
    return %c0_i32, %c0_i32_0 : i32, i32
  }
  func.func @transform_7(%arg0: i32) -> (i32, i32) {
    %c0_i32 = arith.constant 0 : i32
    %c0_i32_0 = arith.constant 0 : i32
    %c0_i32_1 = arith.constant 0 : i32
    return %c0_i32, %c0_i32_0 : i32, i32
  }
  func.func @transform_8(%arg0: i32) -> (i32, i32) {
    %c0_i32 = arith.constant 0 : i32
    %c0_i32_0 = arith.constant 0 : i32
    %c0_i32_1 = arith.constant 0 : i32
    return %c0_i32, %c0_i32_0 : i32, i32
  }
  func.func @transform_9(%arg0: i32) -> (i32, i32) {
    %c0_i32 = arith.constant 0 : i32
    %c0_i32_0 = arith.constant 0 : i32
    %c0_i32_1 = arith.constant 0 : i32
    return %c0_i32, %c0_i32_0 : i32, i32
  }
  func.func @transform_10(%arg0: i32) -> (i32, i32) {
    %c0_i32 = arith.constant 0 : i32
    %c0_i32_0 = arith.constant 0 : i32
    %c0_i32_1 = arith.constant 0 : i32
    return %c0_i32, %c0_i32_0 : i32, i32
  }
  func.func @transform_11(%arg0: i32) -> (i32, i32) {
    %c0_i32 = arith.constant 0 : i32
    %c0_i32_0 = arith.constant 0 : i32
    %c0_i32_1 = arith.constant 0 : i32
    return %c0_i32, %c0_i32_0 : i32, i32
  }
  func.func @transform_12(%arg0: i32) -> (i32, i32) {
    %c0_i32 = arith.constant 0 : i32
    %c0_i32_0 = arith.constant 0 : i32
    %c0_i32_1 = arith.constant 0 : i32
    return %c0_i32, %c0_i32_0 : i32, i32
  }
  func.func @transform_13(%arg0: i32) -> (i32, i32) {
    %c0_i32 = arith.constant 0 : i32
    %c0_i32_0 = arith.constant 0 : i32
    %c0_i32_1 = arith.constant 0 : i32
    return %c0_i32, %c0_i32_0 : i32, i32
  }
  func.func @transform_14(%arg0: i32) -> (i32, i32) {
    %c0_i32 = arith.constant 0 : i32
    %c0_i32_0 = arith.constant 0 : i32
    return %arg0, %c0_i32 : i32, i32
  }
  func.func @transform_15(%arg0: i32) -> (i32, i32) {
    %c0_i32 = arith.constant 0 : i32
    %c0_i32_0 = arith.constant 0 : i32
    return %arg0, %c0_i32 : i32, i32
  }
}

</mosaic_0001>

<bundles_post_ra>
// kernel: vae_forward.1
= control target key start
LH: loop header
LB: loop body
LE: loop exit
PB: predicated region body
PF: predicated region fallthrough
CT: control target
= control target key end

     0   :  { %21 = vsyncpa [#allocation3], 0  ;;  %s7425_s0 = inlined_call_operand.vmem [shape: bf16[16,784], index: 0, kind: input, shape index: {}]   ;;  %s7426_s1 = inlined_call_operand.vmem [shape: f32[16,32], index: 1, kind: input, shape index: {}]   ;;  %s7427_s2 = inlined_call_operand.hbm [shape: bf16[784,512], index: 2, kind: input, shape index: {}]   ;;  %s7428_s3 = inlined_call_operand.hbm [shape: f32[1,512], index: 3, kind: input, shape index: {}]   ;;  %s7429_s4 = inlined_call_operand.vmem [shape: bf16[512,256], index: 4, kind: input, shape index: {}]   ;;  %s7430_s5 = inlined_call_operand.hbm [shape: f32[1,256], index: 5, kind: input, shape index: {}]   ;;  %s7431_s6 = inlined_call_operand.vmem [shape: bf16[256,128], index: 6, kind: input, shape index: {}]   ;;  %s7432_s7 = inlined_call_operand.hbm [shape: f32[1,128], index: 7, kind: input, shape index: {}]   ;;  %s7433_s8 = inlined_call_operand.hbm [shape: bf16[32,256], index: 8, kind: input, shape index: {}]   ;;  %s7434_s9 = inlined_call_operand.hbm [shape: f32[1,256], index: 9, kind: input, shape index: {}]   ;;  %s7435_s10 = inlined_call_operand.hbm [shape: bf16[256,512], index: 10, kind: input, shape index: {}]   ;;  %s7436_s11 = inlined_call_operand.hbm [shape: f32[1,512], index: 11, kind: input, shape index: {}]   ;;  %s7437_s12 = inlined_call_operand.hbm [shape: bf16[512,896], index: 12, kind: input, shape index: {}]   ;;  %s7438_s13 = inlined_call_operand.hbm [shape: f32[1,896], index: 13, kind: input, shape index: {}]   ;;  %s7439_s14 = inlined_call_operand.vmem [shape: bf16[16,896], index: 14, kind: output, shape index: {0}]   ;;  %s7440_s15 = inlined_call_operand.vmem [shape: f32[16,128], index: 15, kind: output, shape index: {1}]  }
   0x1   :  { %22 = vsyncpa [#allocation5], 0 }
   0x2   :  { %23 = vsyncpa [#allocation8], 0 }
   0x3   :  { %24 = vsyncpa [#allocation11], 0 }
   0x4   :  { %25 = vsyncpa [#allocation14], 0 }
   0x5   :  { %26 = vsyncpa [#allocation17], 0  ;;  %s6808_s18 = smov [#allocation4]   ;;  %s6809_s20 = smov [#allocation7]  }
   0x6   :  { %s49_s19 = sshll.u32 %s6808_s18, 4  ;;  %s73_s21 = sshll.u32 %s6809_s20, 4  ;;  %s50_s19 = int_to_ptr.vmem [resolvable:$true] %s49_s19  ;;  %s74_s21 = int_to_ptr.vmem [resolvable:$true] %s73_s21 }
   0x7   :  { %s6576_s24 = scalar_lea.hbm %s7428_s3, 64 }
   0x8   :  { %p6577_p0 = scmp.ne.s32.totalorder %s7428_s3, %s6576_s24  ;;  %p6580_p1 = scmp.lt.u32.totalorder %s6576_s24, %s7428_s3 }
   0xa   :  { %p6582_p2 = pnand %p6580_p1, %p6577_p0 }
   0xc   :  { %6585 = shalt.err (!%p6582_p2)
}
   0xd   :  { %s6586_s29 = scalar_lea.vmem %s50_s19, 64  ;;  %p6591_p4 = scmp.lt.s32.totalorder %s50_s19, %s50_s19 }
   0xe   :  { %p6587_p3 = scmp.ne.s32.totalorder %s50_s19, %s6586_s29  ;;  %p6592_p5 = scmp.lt.s32.totalorder %s6586_s29, %s6586_s29 }
  0x10   :  { %p6593_p6 = por %p6592_p5, %p6591_p4 }
  0x12   :  { %p6594_p7 = pnand %p6593_p6, %p6587_p3 }
  0x14   :  { %6597 = shalt.err (!%p6594_p7)
}
  0x15   :  { %52 = dma.hbm_to_vmem [thread:$0]  %s7428_s3, 64, %s50_s19, [#allocation5]  }
  0x16   :  { %s6598_s20 = scalar_lea.hbm %s7432_s7, 16 }
  0x17   :  { %p6599_p8 = scmp.ne.s32.totalorder %s7432_s7, %s6598_s20  ;;  %p6602_p9 = scmp.lt.u32.totalorder %s6598_s20, %s7432_s7 }
  0x19   :  { %p6604_p10 = pnand %p6602_p9, %p6599_p8 }
  0x1b   :  { %6607 = shalt.err (!%p6604_p10)
}
  0x1c   :  { %s6608_s26 = scalar_lea.vmem %s74_s21, 16  ;;  %s6612_s27 = scalar_lea.vmem %s74_s21, 32 }
  0x1d   :  { %p6609_p11 = scmp.ne.s32.totalorder %s74_s21, %s6608_s26  ;;  %p6613_p12 = scmp.lt.s32.totalorder %s74_s21, %s74_s21 }
  0x1e   :  { %p6614_p13 = scmp.lt.s32.totalorder %s6612_s27, %s6608_s26 }
  0x20   :  { %p6615_p0 = por %p6614_p13, %p6613_p12 }
  0x22   :  { %p6616_p1 = pnand %p6615_p0, %p6609_p11 }
  0x24   :  { %6619 = shalt.err (!%p6616_p1)
}
  0x25   :  { %76 = dma.hbm_to_vmem [thread:$0]  %s7432_s7, 16, %s74_s21, [#allocation8]  }
  0x26   :  { %s6810_s28 = smov [#allocation10]   ;;  %s6811_s30 = smov [#allocation13]  }
  0x27   :  { %s95_s29 = sshll.u32 %s6810_s28, 4  ;;  %s117_s16 = sshll.u32 %s6811_s30, 4  ;;  %s96_s29 = int_to_ptr.vmem [resolvable:$true] %s95_s29  ;;  %s118_s16 = int_to_ptr.vmem [resolvable:$true] %s117_s16 }
  0x28   :  { %s6620_s20 = scalar_lea.hbm %s7434_s9, 32 }
  0x29   :  { %p6621_p2 = scmp.ne.s32.totalorder %s7434_s9, %s6620_s20  ;;  %p6624_p3 = scmp.lt.u32.totalorder %s6620_s20, %s7434_s9 }
  0x2b   :  { %p6626_p4 = pnand %p6624_p3, %p6621_p2 }
  0x2d   :  { %6629 = shalt.err (!%p6626_p4)
}
  0x2e   :  { %s6630_s7 = scalar_lea.vmem %s96_s29, 32  ;;  %p6635_p6 = scmp.lt.s32.totalorder %s96_s29, %s96_s29 }
  0x2f   :  { %p6631_p5 = scmp.ne.s32.totalorder %s96_s29, %s6630_s7  ;;  %p6636_p7 = scmp.lt.s32.totalorder %s6630_s7, %s6630_s7 }
  0x31   :  { %p6637_p8 = por %p6636_p7, %p6635_p6 }
  0x33   :  { %p6638_p9 = pnand %p6637_p8, %p6631_p5 }
  0x35   :  { %6641 = shalt.err (!%p6638_p9)
}
  0x36   :  { %98 = dma.hbm_to_vmem [thread:$0]  %s7434_s9, 32, %s96_s29, [#allocation11]  }
  0x37   :  { %s6642_s19 = scalar_lea.hbm %s7436_s11, 64 }
  0x38   :  { %p6643_p10 = scmp.ne.s32.totalorder %s7436_s11, %s6642_s19  ;;  %p6646_p11 = scmp.lt.u32.totalorder %s6642_s19, %s7436_s11 }
  0x3a   :  { %p6648_p12 = pnand %p6646_p11, %p6643_p10 }
  0x3c   :  { %6651 = shalt.err (!%p6648_p12)
}
  0x3d   :  { %s6652_s20 = scalar_lea.vmem %s118_s16, 64  ;;  %p6657_p0 = scmp.lt.s32.totalorder %s118_s16, %s118_s16 }
  0x3e   :  { %p6653_p13 = scmp.ne.s32.totalorder %s118_s16, %s6652_s20  ;;  %p6658_p1 = scmp.lt.s32.totalorder %s6652_s20, %s6652_s20 }
  0x40   :  { %p6659_p2 = por %p6658_p1, %p6657_p0 }
  0x42   :  { %p6660_p3 = pnand %p6659_p2, %p6653_p13 }
  0x44   :  { %6663 = shalt.err (!%p6660_p3)
}
  0x45   :  { %120 = dma.hbm_to_vmem [thread:$0]  %s7436_s11, 64, %s118_s16, [#allocation14]  }
  0x46   :  { %s6812_s22 = smov [#allocation2]   ;;  %s6664_s7 = scalar_lea.hbm %s7427_s2, 25088 }
  0x47   :  { %s36_s23 = sshll.u32 %s6812_s22, 4  ;;  %p6665_p4 = scmp.ne.s32.totalorder %s7427_s2, %s6664_s7  ;;  %s37_s23 = int_to_ptr.vmem [resolvable:$true] %s36_s23 }
  0x48   :  { %p6668_p5 = scmp.lt.u32.totalorder %s6664_s7, %s7427_s2 }
  0x4a   :  { %p6670_p6 = pnand %p6668_p5, %p6665_p4 }
  0x4c   :  { %6673 = shalt.err (!%p6670_p6)
}
  0x4d   :  { %s6674_s19 = scalar_lea.vmem %s37_s23, 25088  ;;  %p6679_p8 = scmp.lt.s32.totalorder %s37_s23, %s37_s23 }
  0x4e   :  { %p6675_p7 = scmp.ne.s32.totalorder %s37_s23, %s6674_s19  ;;  %p6680_p9 = scmp.lt.s32.totalorder %s6674_s19, %s6674_s19 }
  0x50   :  { %p6681_p10 = por %p6680_p9, %p6679_p8 }
  0x52   :  { %p6682_p11 = pnand %p6681_p10, %p6675_p7 }
  0x54   :  { %6685 = shalt.err (!%p6682_p11)
}
  0x55   :  { %s6813_s11 = smov 256   ;;  %s6814_s16 = smov 16  }
  0x56   :  { %42 = dma.hbm_to_vmem [thread:$0]  %s7427_s2, 25088, %s37_s23, [#allocation3], %s6813_s11, %s6813_s11, %s6814_s16  }
  0x57   :  { %s6815_s17 = smov [#allocation6]   ;;  %s6816_s20 = smov [#allocation9]  }
  0x58   :  { %s61_s18 = sshll.u32 %s6815_s17, 4  ;;  %s82_s9 = sshll.u32 %s6816_s20, 4  ;;  %s62_s18 = int_to_ptr.vmem [resolvable:$true] %s61_s18  ;;  %s83_s9 = int_to_ptr.vmem [resolvable:$true] %s82_s9 }
  0x59   :  { %s6686_s24 = scalar_lea.hbm %s7430_s5, 32 }
  0x5a   :  { %p6687_p12 = scmp.ne.s32.totalorder %s7430_s5, %s6686_s24  ;;  %p6690_p13 = scmp.lt.u32.totalorder %s6686_s24, %s7430_s5 }
  0x5c   :  { %p6692_p0 = pnand %p6690_p13, %p6687_p12 }
  0x5e   :  { %6695 = shalt.err (!%p6692_p0)
}
  0x5f   :  { %s6696_s2 = scalar_lea.vmem %s62_s18, 32  ;;  %p6701_p2 = scmp.lt.s32.totalorder %s62_s18, %s62_s18 }
  0x60   :  { %p6697_p1 = scmp.ne.s32.totalorder %s62_s18, %s6696_s2  ;;  %p6702_p3 = scmp.lt.s32.totalorder %s6696_s2, %s6696_s2 }
  0x62   :  { %p6703_p4 = por %p6702_p3, %p6701_p2 }
  0x64   :  { %p6704_p5 = pnand %p6703_p4, %p6697_p1 }
  0x66   :  { %6707 = shalt.err (!%p6704_p5)
}
  0x67   :  { %64 = dma.hbm_to_vmem [thread:$0]  %s7430_s5, 32, %s62_s18, [#allocation5]  }
  0x68   :  { %s6708_s28 = scalar_lea.hbm %s7433_s8, 512 }
  0x69   :  { %p6709_p6 = scmp.ne.s32.totalorder %s7433_s8, %s6708_s28  ;;  %p6712_p7 = scmp.lt.u32.totalorder %s6708_s28, %s7433_s8 }
  0x6b   :  { %p6714_p8 = pnand %p6712_p7, %p6709_p6 }
  0x6d   :  { %6717 = shalt.err (!%p6714_p8)
}
  0x6e   :  { %s6718_s22 = scalar_lea.vmem %s83_s9, 512  ;;  %p6723_p10 = scmp.lt.s32.totalorder %s83_s9, %s83_s9 }
  0x6f   :  { %p6719_p9 = scmp.ne.s32.totalorder %s83_s9, %s6718_s22  ;;  %p6724_p11 = scmp.lt.s32.totalorder %s6718_s22, %s6718_s22 }
  0x71   :  { %p6725_p12 = por %p6724_p11, %p6723_p10 }
  0x73   :  { %p6726_p13 = pnand %p6725_p12, %p6719_p9 }
  0x75   :  { %6729 = shalt.err (!%p6726_p13)
}
  0x76   :  { %s6817_s5 = smov 128   ;;  %s6818_s18 = smov 8  }
  0x77   :  { %88 = dma.hbm_to_vmem [thread:$0]  %s7433_s8, 512, %s83_s9, [#allocation8], %s6817_s5, %s6817_s5, %s6818_s18  }
  0x78   :  { %s6819_s7 = smov [#allocation12]   ;;  %s6820_s26 = smov [#allocation15]  }
  0x79   :  { %s104_s21 = sshll.u32 %s6819_s7, 4  ;;  %s126_s2 = sshll.u32 %s6820_s26, 4  ;;  %s105_s21 = int_to_ptr.vmem [resolvable:$true] %s104_s21  ;;  %s127_s2 = int_to_ptr.vmem [resolvable:$true] %s126_s2 }
  0x7a   :  { %s6730_s3 = scalar_lea.hbm %s7435_s10, 8192 }
  0x7b   :  { %p6731_p0 = scmp.ne.s32.totalorder %s7435_s10, %s6730_s3  ;;  %p6734_p1 = scmp.lt.u32.totalorder %s6730_s3, %s7435_s10 }
  0x7d   :  { %p6736_p2 = pnand %p6734_p1, %p6731_p0 }
  0x7f   :  { %6739 = shalt.err (!%p6736_p2)
}
  0x80   :  { %s6740_s8 = scalar_lea.vmem %s105_s21, 8192  ;;  %p6745_p4 = scmp.lt.s32.totalorder %s105_s21, %s105_s21 }
  0x81   :  { %p6741_p3 = scmp.ne.s32.totalorder %s105_s21, %s6740_s8  ;;  %p6746_p5 = scmp.lt.s32.totalorder %s6740_s8, %s6740_s8 }
  0x83   :  { %p6747_p6 = por %p6746_p5, %p6745_p4 }
  0x85   :  { %p6748_p7 = pnand %p6747_p6, %p6741_p3 }
  0x87   :  { %6751 = shalt.err (!%p6748_p7)
}
  0x88   :  { %110 = dma.hbm_to_vmem [thread:$0]  %s7435_s10, 8192, %s105_s21, [#allocation11], %s6813_s11, %s6813_s11, %s6814_s16  }
  0x89   :  { %s6752_s5 = scalar_lea.hbm %s7437_s12, 28672 }
  0x8a   :  { %p6753_p8 = scmp.ne.s32.totalorder %s7437_s12, %s6752_s5  ;;  %p6756_p9 = scmp.lt.u32.totalorder %s6752_s5, %s7437_s12 }
  0x8c   :  { %p6758_p10 = pnand %p6756_p9, %p6753_p8 }
  0x8e   :  { %6761 = shalt.err (!%p6758_p10)
}
  0x8f   :  { %s6762_s26 = scalar_lea.vmem %s127_s2, 28672  ;;  %p6767_p12 = scmp.lt.s32.totalorder %s127_s2, %s127_s2 }
  0x90   :  { %p6763_p11 = scmp.ne.s32.totalorder %s127_s2, %s6762_s26  ;;  %p6768_p13 = scmp.lt.s32.totalorder %s6762_s26, %s6762_s26 }
  0x92   :  { %p6769_p0 = por %p6768_p13, %p6767_p12 }
  0x94   :  { %p6770_p1 = pnand %p6769_p0, %p6763_p11 }
  0x96   :  { %6773 = shalt.err (!%p6770_p1)
}
  0x97   :  { %s6821_s10 = smov 448   ;;  %s6822_s11 = smov 28  }
  0x98   :  { %132 = dma.hbm_to_vmem [thread:$0]  %s7437_s12, 28672, %s127_s2, [#allocation14], %s6821_s10, %s6821_s10, %s6822_s11  }
  0x99   :  { %s6823_s23 = smov [#allocation16]   ;;  %s6774_s28 = scalar_lea.hbm %s7438_s13, 112 }
  0x9a   :  { %s139_s27 = sshll.u32 %s6823_s23, 4  ;;  %p6775_p2 = scmp.ne.s32.totalorder %s7438_s13, %s6774_s28  ;;  %s140_s27 = int_to_ptr.vmem [resolvable:$true] %s139_s27 }
  0x9b   :  { %p6778_p3 = scmp.lt.u32.totalorder %s6774_s28, %s7438_s13 }
  0x9d   :  { %p6780_p4 = pnand %p6778_p3, %p6775_p2 }
  0x9f   :  { %6783 = shalt.err (!%p6780_p4)
}
  0xa0   :  { %s6784_s20 = scalar_lea.vmem %s140_s27, 112  ;;  %s6788_s12 = scalar_lea.vmem %s140_s27, 128 }
  0xa1   :  { %p6785_p5 = scmp.ne.s32.totalorder %s140_s27, %s6784_s20  ;;  %p6789_p6 = scmp.lt.s32.totalorder %s140_s27, %s140_s27 }
  0xa2   :  { %p6790_p7 = scmp.lt.s32.totalorder %s6788_s12, %s6784_s20 }
  0xa4   :  { %p6791_p8 = por %p6790_p7, %p6789_p6 }
  0xa6   :  { %p6792_p9 = pnand %p6791_p8, %p6785_p5 }
  0xa8   :  { %6795 = shalt.err (!%p6792_p9)
}
  0xa9   :  { %142 = dma.hbm_to_vmem [thread:$0]  %s7438_s13, 112, %s140_s27, [#allocation17]  }
  0xaa   :  { %6796 = dma.done.wait [#allocation3], 25088  }
  0xab   :  { %6797 = vsyncadd [#allocation3], 4294942208 }
  0xac   :  { %6798 = dma.done.wait [#allocation5], 96  }
  0xad   :  { %6799 = vsyncadd [#allocation5], 4294967200 }
  0xae   :  { %6800 = dma.done.wait [#allocation8], 528  }
  0xaf   :  { %6801 = vsyncadd [#allocation8], 4294966768 }
  0xb0   :  { %6802 = dma.done.wait [#allocation11], 8224  }
  0xb1   :  { %6803 = vsyncadd [#allocation11], 4294959072 }
  0xb2   :  { %6804 = dma.done.wait [#allocation14], 28736  }
  0xb3   :  { %6805 = vsyncadd [#allocation14], 4294938560 }
  0xb4   :  { %6806 = dma.done.wait [#allocation17], 112  }
  0xb5   :  { %6807 = vsyncadd [#allocation17], 4294967184  ;;  %v6824_v0 = vmov 0   ;;  %v5705_v1 = vld [vmem:[#allocation2 + $0x4] ss:$16 sps:$4 sm:$0xff]   ;;  %vm1415_vm0 = vcmask 130048  }
  0xb6   :  { %1580 = vmatprep.mubr.bf16.mxu1 %v6824_v0  ;;  %v5707_v2 = vld [vmem:[#allocation2 + $0x604] ss:$16 sps:$4 sm:$0xff]   ;;  %1419 = vmatprep.subr.bf16.mxu0 %v5705_v1  ;;  %v5709_v3 = vld [vmem:[#allocation2] ss:$16 sps:$4 sm:$0xff]   ;;  %v5713_v6 = vld [vmem:[#allocation2 + $0x8] ss:$16 sps:$4 sm:$0xff]  }
  0xb7   :  { %v5710_v4 = vld [vmem:[#allocation2 + $0x600] ss:$16 sps:$4 sm:$0xff]   ;;  %1548 = vmatprep.subr.bf16.mxu1 %v5707_v2  ;;  %v5711_v5 = vld [vmem:[#allocation2 + $0x24] ss:$16 sps:$4 sm:$0xff]   ;;  %1420 = vmatpush1.bf16.msra.mxu0 %v5709_v3  ;;  %v5715_v7 = vld [vmem:[#allocation2 + $0xc] ss:$16 sps:$4 sm:$0xff]  }
  0xb8   :  { %1549 = vmatpush1.bf16.msra.mxu1 %v5710_v4  ;;  %1421 = vmatprep.subr.bf16.mxu0 %v5711_v5  ;;  %v5716_v8 = vld [vmem:[#allocation2 + $0x20] ss:$16 sps:$4 sm:$0xff]   ;;  %v5717_v9 = vld [vmem:[%s7425_s0 + $0x18] ss:$28 sps:$4 sm:$0xff]   ;;  %v5722_v12 = vld [vmem:[#allocation2 + $0x2c] ss:$16 sps:$4 sm:$0xff]  }
  0xb9   :  { %1591 = vmatprep.subr.bf16.mxu1 %v5715_v7  ;;  %v5718_v10 = vld [vmem:[#allocation2 + $0x44] ss:$16 sps:$4 sm:$0xff]   ;;  %v5720_v11 = vld [vmem:[#allocation2 + $0x28] ss:$16 sps:$4 sm:$0xff]   ;;  %v5723_v13 = vld [vmem:[#allocation2 + $0x40] ss:$16 sps:$4 sm:$0xff]  }
  0xba   :  { %v5724_v14 = vld [vmem:[#allocation2 + $0x64] ss:$16 sps:$4 sm:$0xff]   ;;  %v5728_v15 = vld [vmem:[#allocation2 + $0x4c] ss:$16 sps:$4 sm:$0xff]   ;;  %v5729_v16 = vld [vmem:[#allocation2 + $0x60] ss:$16 sps:$4 sm:$0xff]  }
  0xbb   :  { %1422 = vmatpush1.bf16.msra.mxu0 %v5716_v8  ;;  %5165 = vmatmul.mubr.msk.bf16.vlgmr.msra.gmra.mrb[0].mxu1 %vm1415_vm0, %v5717_v9  ;;  %v5726_v17 = vld [vmem:[#allocation2 + $0x48] ss:$16 sps:$4 sm:$0xff]   ;;  %v5730_v18 = vld [vmem:[#allocation2 + $0x84] ss:$16 sps:$4 sm:$0xff]   ;;  %v5734_v19 = vld [vmem:[#allocation2 + $0x6c] ss:$16 sps:$4 sm:$0xff]  }
  0xbc   :  { %1592 = vmatpush1.bf16.msra.mxu1 %v5713_v6  ;;  %1423 = vmatprep.subr.bf16.mxu0 %v5718_v10  ;;  %v5732_v20 = vld [vmem:[#allocation2 + $0x68] ss:$16 sps:$4 sm:$0xff]   ;;  %v5735_v21 = vld [vmem:[#allocation2 + $0x80] ss:$16 sps:$4 sm:$0xff]   ;;  %v5736_v22 = vld [vmem:[#allocation2 + $0xa4] ss:$16 sps:$4 sm:$0xff]  }
  0xbd   :  { %1593 = vmatprep.subr.bf16.mxu1 %v5722_v12  ;;  %v5740_v23 = vld [vmem:[#allocation2 + $0x8c] ss:$16 sps:$4 sm:$0xff]   ;;  %v5741_v24 = vld [vmem:[#allocation2 + $0xa0] ss:$16 sps:$4 sm:$0xff]   ;;  %v5738_v25 = vld [vmem:[#allocation2 + $0x88] ss:$16 sps:$4 sm:$0xff]  }
  0xbe   :  { %v5742_v26 = vld [vmem:[#allocation2 + $0xc4] ss:$16 sps:$4 sm:$0xff]   ;;  %v5746_v27 = vld [vmem:[#allocation2 + $0xac] ss:$16 sps:$4 sm:$0xff]   ;;  %v5744_v28 = vld [vmem:[#allocation2 + $0xa8] ss:$16 sps:$4 sm:$0xff]  }
  0xbf   :  { %1424 = vmatpush1.bf16.msra.mxu0 %v5723_v13  ;;  %v5747_v29 = vld [vmem:[#allocation2 + $0xc0] ss:$16 sps:$4 sm:$0xff]   ;;  %v5748_v30 = vld [vmem:[#allocation2 + $0xe4] ss:$16 sps:$4 sm:$0xff]   ;;  %v5752_v31 = vld [vmem:[#allocation2 + $0xcc] ss:$16 sps:$4 sm:$0xff]  }
  0xc0   :  { %1594 = vmatpush1.bf16.msra.mxu1 %v5720_v11  ;;  %1425 = vmatprep.subr.bf16.mxu0 %v5724_v14  ;;  %v5753_v32 = vld [vmem:[#allocation2 + $0xe0] ss:$16 sps:$4 sm:$0xff]   ;;  %v5750_v33 = vld [vmem:[#allocation2 + $0xc8] ss:$16 sps:$4 sm:$0xff]   ;;  %v5754_v34 = vld [vmem:[#allocation2 + $0x104] ss:$16 sps:$4 sm:$0xff]  }
  0xc1   :  { %1595 = vmatprep.subr.bf16.mxu1 %v5728_v15  ;;  %v5758_v35 = vld [vmem:[#allocation2 + $0xec] ss:$16 sps:$4 sm:$0xff]   ;;  %v5756_v36 = vld [vmem:[#allocation2 + $0xe8] ss:$16 sps:$4 sm:$0xff]   ;;  %v5759_v37 = vld [vmem:[#allocation2 + $0x100] ss:$16 sps:$4 sm:$0xff]  }
  0xc2   :  { %v5760_v38 = vld [vmem:[#allocation2 + $0x124] ss:$16 sps:$4 sm:$0xff]   ;;  %v5764_v39 = vld [vmem:[#allocation2 + $0x10c] ss:$16 sps:$4 sm:$0xff]   ;;  %v5765_v40 = vld [vmem:[#allocation2 + $0x120] ss:$16 sps:$4 sm:$0xff]  }
  0xc3   :  { %1426 = vmatpush1.bf16.msra.mxu0 %v5729_v16  ;;  %v5762_v41 = vld [vmem:[#allocation2 + $0x108] ss:$16 sps:$4 sm:$0xff]   ;;  %v5766_v42 = vld [vmem:[#allocation2 + $0x144] ss:$16 sps:$4 sm:$0xff]   ;;  %v5770_v43 = vld [vmem:[#allocation2 + $0x12c] ss:$16 sps:$4 sm:$0xff]  }
  0xc4   :  { %1596 = vmatpush1.bf16.msra.mxu1 %v5726_v17  ;;  %1427 = vmatprep.subr.bf16.mxu0 %v5730_v18  ;;  %v5768_v44 = vld [vmem:[#allocation2 + $0x128] ss:$16 sps:$4 sm:$0xff]   ;;  %v5771_v45 = vld [vmem:[#allocation2 + $0x140] ss:$16 sps:$4 sm:$0xff]   ;;  %v5772_v46 = vld [vmem:[#allocation2 + $0x164] ss:$16 sps:$4 sm:$0xff]  }
  0xc5   :  { %1597 = vmatprep.subr.bf16.mxu1 %v5734_v19  ;;  %v5776_v47 = vld [vmem:[#allocation2 + $0x14c] ss:$16 sps:$4 sm:$0xff]   ;;  %v5774_v48 = vld [vmem:[#allocation2 + $0x148] ss:$16 sps:$4 sm:$0xff]   ;;  %v5777_v49 = vld [vmem:[#allocation2 + $0x160] ss:$16 sps:$4 sm:$0xff]  }
  0xc6   :  { %v5804_v50 = vld [vmem:[%s7425_s0 + $0x4] ss:$28 sps:$4 sm:$0xff]   ;;  %v5782_v52 = vld [vmem:[#allocation2 + $0x16c] ss:$16 sps:$4 sm:$0xff]   ;;  %v5780_v53 = vld [vmem:[#allocation2 + $0x168] ss:$16 sps:$4 sm:$0xff]  }
  0xc7   :  { %1428 = vmatpush1.bf16.msra.mxu0 %v5735_v21  ;;  %v5778_v51 = vld [vmem:[#allocation2 + $0x184] ss:$16 sps:$4 sm:$0xff]   ;;  %1451 = vmatprep.mubr.bf16.mxu0 %v5804_v50  ;;  %v5783_v54 = vld [vmem:[#allocation2 + $0x180] ss:$16 sps:$4 sm:$0xff]   ;;  %v5788_v56 = vld [vmem:[#allocation2 + $0x18c] ss:$16 sps:$4 sm:$0xff]  }
  0xc8   :  { %1598 = vmatpush1.bf16.msra.mxu1 %v5732_v20  ;;  %1429 = vmatprep.subr.bf16.mxu0 %v5736_v22  ;;  %v5784_v55 = vld [vmem:[#allocation2 + $0x1a4] ss:$16 sps:$4 sm:$0xff]   ;;  %v5786_v57 = vld [vmem:[#allocation2 + $0x188] ss:$16 sps:$4 sm:$0xff]   ;;  %v5789_v58 = vld [vmem:[#allocation2 + $0x1a0] ss:$16 sps:$4 sm:$0xff]  }
  0xc9   :  { %1599 = vmatprep.subr.bf16.mxu1 %v5740_v23  ;;  %1623 = vmatprep.mubr.bf16.mxu1 %v5804_v50  ;;  %v5790_v59 = vld [vmem:[#allocation2 + $0x1c4] ss:$16 sps:$4 sm:$0xff]   ;;  %v5794_v60 = vld [vmem:[#allocation2 + $0x1ac] ss:$16 sps:$4 sm:$0xff]   ;;  %v5792_v61 = vld [vmem:[#allocation2 + $0x1a8] ss:$16 sps:$4 sm:$0xff]  }
  0xca   :  { %v5795_v62 = vld [vmem:[#allocation2 + $0x1c0] ss:$16 sps:$4 sm:$0xff]   ;;  %v5796_v63 = vld [vmem:[#allocation2 + $0x1e4] ss:$16 sps:$4 sm:$0xff]   ;;  %v5800_v1 = vld [vmem:[#allocation2 + $0x1cc] ss:$16 sps:$4 sm:$0xff]  }
  0xcb   :  { %1430 = vmatpush1.bf16.msra.mxu0 %v5741_v24  ;;  %v5798_v2 = vld [vmem:[#allocation2 + $0x1c8] ss:$16 sps:$4 sm:$0xff]   ;;  %v5801_v3 = vld [vmem:[#allocation2 + $0x1e0] ss:$16 sps:$4 sm:$0xff]   ;;  %v5807_v4 = vld [vmem:[#allocation2 + $0x204] ss:$16 sps:$4 sm:$0xff]  }
  0xcc   :  { %1600 = vmatpush1.bf16.msra.mxu1 %v5738_v25  ;;  %1431 = vmatprep.subr.bf16.mxu0 %v5742_v26  ;;  %v5810_v5 = vld [vmem:[#allocation2 + $0x1ec] ss:$16 sps:$4 sm:$0xff]   ;;  %v5805_v7 = vld [vmem:[#allocation2 + $0x200] ss:$16 sps:$4 sm:$0xff]   ;;  %v5808_v8 = vld [vmem:[#allocation2 + $0x1e8] ss:$16 sps:$4 sm:$0xff]  }
  0xcd   :  { %1601 = vmatprep.subr.bf16.mxu1 %v5746_v27  ;;  %v5802_v6 = vld [vmem:[%s7425_s0] ss:$28 sps:$4 sm:$0xff]   ;;  %v5813_v9 = vld [vmem:[#allocation2 + $0x224] ss:$16 sps:$4 sm:$0xff]   ;;  %v5814_v12 = vld [vmem:[#allocation2 + $0x208] ss:$16 sps:$4 sm:$0xff]  }
  0xce   :  { %v5816_v10 = vld [vmem:[#allocation2 + $0x20c] ss:$16 sps:$4 sm:$0xff]   ;;  %v5811_v11 = vld [vmem:[#allocation2 + $0x220] ss:$16 sps:$4 sm:$0xff]   ;;  %v5819_v13 = vld [vmem:[#allocation2 + $0x244] ss:$16 sps:$4 sm:$0xff]  }
  0xcf   :  { %1432 = vmatpush1.bf16.msra.mxu0 %v5747_v29  ;;  %v5822_v14 = vld [vmem:[#allocation2 + $0x22c] ss:$16 sps:$4 sm:$0xff]   ;;  %v5817_v15 = vld [vmem:[#allocation2 + $0x240] ss:$16 sps:$4 sm:$0xff]   ;;  %v5820_v16 = vld [vmem:[#allocation2 + $0x228] ss:$16 sps:$4 sm:$0xff]  }
  0xd0   :  { %1602 = vmatpush1.bf16.msra.mxu1 %v5744_v28  ;;  %1433 = vmatprep.subr.bf16.mxu0 %v5748_v30  ;;  %v5825_v17 = vld [vmem:[#allocation2 + $0x264] ss:$16 sps:$4 sm:$0xff]   ;;  %v5828_v18 = vld [vmem:[#allocation2 + $0x24c] ss:$16 sps:$4 sm:$0xff]   ;;  %v5823_v19 = vld [vmem:[#allocation2 + $0x260] ss:$16 sps:$4 sm:$0xff]  }
  0xd1   :  { %1603 = vmatprep.subr.bf16.mxu1 %v5752_v31  ;;  %v5826_v20 = vld [vmem:[#allocation2 + $0x248] ss:$16 sps:$4 sm:$0xff]   ;;  %v5831_v21 = vld [vmem:[#allocation2 + $0x284] ss:$16 sps:$4 sm:$0xff]   ;;  %v5834_v22 = vld [vmem:[#allocation2 + $0x26c] ss:$16 sps:$4 sm:$0xff]  }
  0xd2   :  { %v5829_v23 = vld [vmem:[#allocation2 + $0x280] ss:$16 sps:$4 sm:$0xff]   ;;  %v5832_v24 = vld [vmem:[#allocation2 + $0x268] ss:$16 sps:$4 sm:$0xff]   ;;  %v5837_v25 = vld [vmem:[#allocation2 + $0x2a4] ss:$16 sps:$4 sm:$0xff]  }
  0xd3   :  { %1434 = vmatpush1.bf16.msra.mxu0 %v5753_v32  ;;  %v5840_v26 = vld [vmem:[#allocation2 + $0x28c] ss:$16 sps:$4 sm:$0xff]   ;;  %v5835_v27 = vld [vmem:[#allocation2 + $0x2a0] ss:$16 sps:$4 sm:$0xff]   ;;  %v5838_v28 = vld [vmem:[#allocation2 + $0x288] ss:$16 sps:$4 sm:$0xff]  }
  0xd4   :  { %1604 = vmatpush1.bf16.msra.mxu1 %v5750_v33  ;;  %1435 = vmatprep.subr.bf16.mxu0 %v5754_v34  ;;  %v5843_v29 = vld [vmem:[#allocation2 + $0x2c4] ss:$16 sps:$4 sm:$0xff]   ;;  %v5846_v30 = vld [vmem:[#allocation2 + $0x2ac] ss:$16 sps:$4 sm:$0xff]   ;;  %v5841_v31 = vld [vmem:[#allocation2 + $0x2c0] ss:$16 sps:$4 sm:$0xff]  }
  0xd5   :  { %1605 = vmatprep.subr.bf16.mxu1 %v5758_v35  ;;  %v5844_v32 = vld [vmem:[#allocation2 + $0x2a8] ss:$16 sps:$4 sm:$0xff]   ;;  %v5849_v34 = vld [vmem:[#allocation2 + $0x2e4] ss:$16 sps:$4 sm:$0xff]   ;;  %v5852_v35 = vld [vmem:[#allocation2 + $0x2cc] ss:$16 sps:$4 sm:$0xff]  }
  0xd6   :  { %v5903_v33 = vld [vmem:[%s7425_s0 + $0xc] ss:$28 sps:$4 sm:$0xff]   ;;  %v5873_v50 = vld [vmem:[#allocation2 + $0x364] ss:$16 sps:$4 sm:$0xff]   ;;  %vm2496_vm1 = vcmask 261120  }
  0xd7   :  { %1436 = vmatpush1.bf16.msra.mxu0 %v5759_v37  ;;  %v5850_v37 = vld [vmem:[#allocation2 + $0x2c8] ss:$16 sps:$4 sm:$0xff]  }
  0xd8   :  { %1606 = vmatpush1.bf16.msra.mxu1 %v5756_v36  ;;  %1437 = vmatprep.subr.bf16.mxu0 %v5760_v38  ;;  %v5847_v36 = vld [vmem:[#allocation2 + $0x2e0] ss:$16 sps:$4 sm:$0xff]   ;;  %v5855_v38 = vld [vmem:[#allocation2 + $0x304] ss:$16 sps:$4 sm:$0xff]  }
  0xd9   :  { %1607 = vmatprep.subr.bf16.mxu1 %v5764_v39  ;;  %v5858_v39 = vld [vmem:[#allocation2 + $0x2ec] ss:$16 sps:$4 sm:$0xff]  }
  0xdb   :  { %1438 = vmatpush1.bf16.msra.mxu0 %v5765_v40  ;;  %v5853_v40 = vld [vmem:[#allocation2 + $0x300] ss:$16 sps:$4 sm:$0xff]  }
  0xdc   :  { %1608 = vmatpush1.bf16.msra.mxu1 %v5762_v41  ;;  %1439 = vmatprep.subr.bf16.mxu0 %v5766_v42  ;;  %v5856_v41 = vld [vmem:[#allocation2 + $0x2e8] ss:$16 sps:$4 sm:$0xff]   ;;  %v5861_v42 = vld [vmem:[#allocation2 + $0x324] ss:$16 sps:$4 sm:$0xff]  }
  0xdd   :  { %1609 = vmatprep.subr.bf16.mxu1 %v5770_v43  ;;  %v5864_v43 = vld [vmem:[#allocation2 + $0x30c] ss:$16 sps:$4 sm:$0xff]  }
  0xdf   :  { %1440 = vmatpush1.bf16.msra.mxu0 %v5771_v45  ;;  %v5862_v45 = vld [vmem:[#allocation2 + $0x308] ss:$16 sps:$4 sm:$0xff]  }
  0xe0   :  { %1610 = vmatpush1.bf16.msra.mxu1 %v5768_v44  ;;  %1441 = vmatprep.subr.bf16.mxu0 %v5772_v46  ;;  %v5859_v44 = vld [vmem:[#allocation2 + $0x320] ss:$16 sps:$4 sm:$0xff]   ;;  %v5867_v46 = vld [vmem:[#allocation2 + $0x344] ss:$16 sps:$4 sm:$0xff]  }
  0xe1   :  { %1611 = vmatprep.subr.bf16.mxu1 %v5776_v47  ;;  %v5870_v47 = vld [vmem:[#allocation2 + $0x32c] ss:$16 sps:$4 sm:$0xff]  }
  0xe3   :  { %1442 = vmatpush1.bf16.msra.mxu0 %v5777_v49  ;;  %v5868_v49 = vld [vmem:[#allocation2 + $0x328] ss:$16 sps:$4 sm:$0xff]  }
  0xe4   :  { %1612 = vmatpush1.bf16.msra.mxu1 %v5774_v48  ;;  %1443 = vmatprep.subr.bf16.mxu0 %v5778_v51  ;;  %v5865_v48 = vld [vmem:[#allocation2 + $0x340] ss:$16 sps:$4 sm:$0xff]   ;;  %v5876_v51 = vld [vmem:[#allocation2 + $0x34c] ss:$16 sps:$4 sm:$0xff]  }
  0xe5   :  { %1613 = vmatprep.subr.bf16.mxu1 %v5782_v52  ;;  %v5871_v52 = vld [vmem:[#allocation2 + $0x360] ss:$16 sps:$4 sm:$0xff]  }
  0xe7   :  { %1444 = vmatpush1.bf16.msra.mxu0 %v5783_v54  ;;  %v5879_v54 = vld [vmem:[#allocation2 + $0x384] ss:$16 sps:$4 sm:$0xff]  }
  0xe8   :  { %1614 = vmatpush1.bf16.msra.mxu1 %v5780_v53  ;;  %1445 = vmatprep.subr.bf16.mxu0 %v5784_v55  ;;  %v5874_v53 = vld [vmem:[#allocation2 + $0x348] ss:$16 sps:$4 sm:$0xff]   ;;  %v5882_v55 = vld [vmem:[#allocation2 + $0x36c] ss:$16 sps:$4 sm:$0xff]  }
  0xe9   :  { %1615 = vmatprep.subr.bf16.mxu1 %v5788_v56  ;;  %v5877_v56 = vld [vmem:[#allocation2 + $0x380] ss:$16 sps:$4 sm:$0xff]  }
  0xeb   :  { %1446 = vmatpush1.bf16.msra.mxu0 %v5789_v58  ;;  %v5885_v58 = vld [vmem:[#allocation2 + $0x3a4] ss:$16 sps:$4 sm:$0xff]  }
  0xec   :  { %1616 = vmatpush1.bf16.msra.mxu1 %v5786_v57  ;;  %1447 = vmatprep.subr.bf16.mxu0 %v5790_v59  ;;  %v5880_v57 = vld [vmem:[#allocation2 + $0x368] ss:$16 sps:$4 sm:$0xff]   ;;  %v5888_v59 = vld [vmem:[#allocation2 + $0x38c] ss:$16 sps:$4 sm:$0xff]  }
  0xed   :  { %1617 = vmatprep.subr.bf16.mxu1 %v5794_v60  ;;  %v5883_v60 = vld [vmem:[#allocation2 + $0x3a0] ss:$16 sps:$4 sm:$0xff]  }
  0xef   :  { %1448 = vmatpush1.bf16.msra.mxu0 %v5795_v62  ;;  %v5891_v62 = vld [vmem:[#allocation2 + $0x3c4] ss:$16 sps:$4 sm:$0xff]  }
  0xf0   :  { %1618 = vmatpush1.bf16.msra.mxu1 %v5792_v61  ;;  %1449 = vmatprep.subr.bf16.mxu0 %v5796_v63  ;;  %v5886_v61 = vld [vmem:[#allocation2 + $0x388] ss:$16 sps:$4 sm:$0xff]   ;;  %v5894_v63 = vld [vmem:[#allocation2 + $0x3ac] ss:$16 sps:$4 sm:$0xff]  }
  0xf1   :  { %1619 = vmatprep.subr.bf16.mxu1 %v5800_v1  ;;  %v5889_v1 = vld [vmem:[#allocation2 + $0x3c0] ss:$16 sps:$4 sm:$0xff]  }
  0xf3   :  { %1450 = vmatpush1.bf16.msra.mxu0 %v5801_v3  ;;  %v5897_v3 = vld [vmem:[#allocation2 + $0x3e4] ss:$16 sps:$4 sm:$0xff]  }
  0xf4   :  { %1620 = vmatpush1.bf16.msra.mxu1 %v5798_v2  ;;  %1462 = vmatprep.subr.bf16.mxu0 %v5807_v4  ;;  %v5892_v2 = vld [vmem:[#allocation2 + $0x3a8] ss:$16 sps:$4 sm:$0xff]   ;;  %v5900_v4 = vld [vmem:[#allocation2 + $0x3cc] ss:$16 sps:$4 sm:$0xff]  }
  0xf5   :  { %1621 = vmatprep.subr.bf16.mxu1 %v5810_v5  ;;  %v5895_v5 = vld [vmem:[#allocation2 + $0x3e0] ss:$16 sps:$4 sm:$0xff]  }
  0xf6   :  { %1452 = vmatmul.mubr.bf16.vlgmr.msra.gmra.mrb[0].mxu0 %v5802_v6 }
  0xf7   :  { %1463 = vmatpush1.bf16.msra.mxu0 %v5805_v7  ;;  %1494 = vmatprep.mubr.bf16.mxu0 %v5903_v33  ;;  %v5906_v7 = vld [vmem:[#allocation2 + $0x404] ss:$16 sps:$4 sm:$0xff]  }
  0xf8   :  { %1622 = vmatpush1.bf16.msra.mxu1 %v5808_v8  ;;  %1464 = vmatprep.subr.bf16.mxu0 %v5813_v9  ;;  %v5909_v8 = vld [vmem:[#allocation2 + $0x3ec] ss:$16 sps:$4 sm:$0xff]   ;;  %v5901_v9 = vld [vmem:[%s7425_s0 + $0x8] ss:$28 sps:$4 sm:$0xff]  }
  0xf9   :  { %1634 = vmatprep.subr.bf16.mxu1 %v5816_v10  ;;  %v5904_v10 = vld [vmem:[#allocation2 + $0x400] ss:$16 sps:$4 sm:$0xff]  }
  0xfb   :  { %1465 = vmatpush1.bf16.msra.mxu0 %v5811_v11  ;;  %1624 = vmatmul.mubr.bf16.vlgmr.msra.gmra.mrb[4].mxu1 %v5802_v6  ;;  %v5898_v6 = vld [vmem:[#allocation2 + $0x3c8] ss:$16 sps:$4 sm:$0xff]  }
  0xfc   :  { %1635 = vmatpush1.bf16.msra.mxu1 %v5814_v12  ;;  %1466 = vmatprep.subr.bf16.mxu0 %v5819_v13  ;;  %v5907_v11 = vld [vmem:[#allocation2 + $0x3e8] ss:$16 sps:$4 sm:$0xff]   ;;  %v5912_v12 = vld [vmem:[#allocation2 + $0x424] ss:$16 sps:$4 sm:$0xff]   ;;  %v5915_v13 = vld [vmem:[#allocation2 + $0x40c] ss:$16 sps:$4 sm:$0xff]  }
  0xfd   :  { %1636 = vmatprep.subr.bf16.mxu1 %v5822_v14  ;;  %1666 = vmatprep.mubr.bf16.mxu1 %v5903_v33  ;;  %v5910_v14 = vld [vmem:[#allocation2 + $0x420] ss:$16 sps:$4 sm:$0xff]   ;;  %v5942_v33 = vld [vmem:[#allocation2 + $0x4c4] ss:$16 sps:$4 sm:$0xff]  }
  0xff   :  { %1467 = vmatpush1.bf16.msra.mxu0 %v5817_v15  ;;  %v5913_v15 = vld [vmem:[#allocation2 + $0x408] ss:$16 sps:$4 sm:$0xff]  }
 0x100   :  { %1637 = vmatpush1.bf16.msra.mxu1 %v5820_v16  ;;  %1468 = vmatprep.subr.bf16.mxu0 %v5825_v17  ;;  %v6002_v16 = vld [vmem:[%s7425_s0 + $0x14] ss:$28 sps:$4 sm:$0xff]  }
 0x101   :  { %1638 = vmatprep.subr.bf16.mxu1 %v5828_v18  ;;  %v5918_v17 = vld [vmem:[#allocation2 + $0x444] ss:$16 sps:$4 sm:$0xff]   ;;  %v5921_v18 = vld [vmem:[#allocation2 + $0x42c] ss:$16 sps:$4 sm:$0xff]  }
 0x103   :  { %1469 = vmatpush1.bf16.msra.mxu0 %v5823_v19  ;;  %v5916_v19 = vld [vmem:[#allocation2 + $0x440] ss:$16 sps:$4 sm:$0xff]  }
 0x104   :  { %1639 = vmatpush1.bf16.msra.mxu1 %v5826_v20  ;;  %1470 = vmatprep.subr.bf16.mxu0 %v5831_v21  ;;  %v5919_v20 = vld [vmem:[#allocation2 + $0x428] ss:$16 sps:$4 sm:$0xff]   ;;  %v5924_v21 = vld [vmem:[#allocation2 + $0x464] ss:$16 sps:$4 sm:$0xff]  }
 0x105   :  { %1640 = vmatprep.subr.bf16.mxu1 %v5834_v22  ;;  %v5927_v22 = vld [vmem:[#allocation2 + $0x44c] ss:$16 sps:$4 sm:$0xff]  }
 0x107   :  { %1471 = vmatpush1.bf16.msra.mxu0 %v5829_v23  ;;  %v5922_v23 = vld [vmem:[#allocation2 + $0x460] ss:$16 sps:$4 sm:$0xff]  }
 0x108   :  { %1641 = vmatpush1.bf16.msra.mxu1 %v5832_v24  ;;  %1472 = vmatprep.subr.bf16.mxu0 %v5837_v25  ;;  %v5925_v24 = vld [vmem:[#allocation2 + $0x448] ss:$16 sps:$4 sm:$0xff]   ;;  %v5930_v25 = vld [vmem:[#allocation2 + $0x484] ss:$16 sps:$4 sm:$0xff]  }
 0x109   :  { %1642 = vmatprep.subr.bf16.mxu1 %v5840_v26  ;;  %v5933_v26 = vld [vmem:[#allocation2 + $0x46c] ss:$16 sps:$4 sm:$0xff]  }
 0x10b   :  { %1473 = vmatpush1.bf16.msra.mxu0 %v5835_v27  ;;  %v5928_v27 = vld [vmem:[#allocation2 + $0x480] ss:$16 sps:$4 sm:$0xff]  }
 0x10c   :  { %1643 = vmatpush1.bf16.msra.mxu1 %v5838_v28  ;;  %1474 = vmatprep.subr.bf16.mxu0 %v5843_v29  ;;  %v5931_v28 = vld [vmem:[#allocation2 + $0x468] ss:$16 sps:$4 sm:$0xff]   ;;  %v5936_v29 = vld [vmem:[#allocation2 + $0x4a4] ss:$16 sps:$4 sm:$0xff]  }
 0x10d   :  { %1644 = vmatprep.subr.bf16.mxu1 %v5846_v30  ;;  %v5939_v30 = vld [vmem:[#allocation2 + $0x48c] ss:$16 sps:$4 sm:$0xff]  }
 0x10f   :  { %1475 = vmatpush1.bf16.msra.mxu0 %v5841_v31  ;;  %v5934_v31 = vld [vmem:[#allocation2 + $0x4a0] ss:$16 sps:$4 sm:$0xff]  }
 0x110   :  { %1645 = vmatpush1.bf16.msra.mxu1 %v5844_v32  ;;  %1476 = vmatprep.subr.bf16.mxu0 %v5849_v34  ;;  %v5937_v32 = vld [vmem:[#allocation2 + $0x488] ss:$16 sps:$4 sm:$0xff]   ;;  %v5945_v34 = vld [vmem:[#allocation2 + $0x4ac] ss:$16 sps:$4 sm:$0xff]  }
 0x111   :  { %1646 = vmatprep.subr.bf16.mxu1 %v5852_v35  ;;  %v5940_v35 = vld [vmem:[#allocation2 + $0x4c0] ss:$16 sps:$4 sm:$0xff]  }
 0x113   :  { %1477 = vmatpush1.bf16.msra.mxu0 %v5847_v36  ;;  %v5943_v36 = vld [vmem:[#allocation2 + $0x4a8] ss:$16 sps:$4 sm:$0xff]  }
 0x114   :  { %1647 = vmatpush1.bf16.msra.mxu1 %v5850_v37  ;;  %1478 = vmatprep.subr.bf16.mxu0 %v5855_v38  ;;  %v5948_v37 = vld [vmem:[#allocation2 + $0x4e4] ss:$16 sps:$4 sm:$0xff]   ;;  %v5951_v38 = vld [vmem:[#allocation2 + $0x4cc] ss:$16 sps:$4 sm:$0xff]  }
 0x115   :  { %1648 = vmatprep.subr.bf16.mxu1 %v5858_v39  ;;  %v5946_v39 = vld [vmem:[#allocation2 + $0x4e0] ss:$16 sps:$4 sm:$0xff]  }
 0x117   :  { %1479 = vmatpush1.bf16.msra.mxu0 %v5853_v40  ;;  %v5949_v40 = vld [vmem:[#allocation2 + $0x4c8] ss:$16 sps:$4 sm:$0xff]  }
 0x118   :  { %1649 = vmatpush1.bf16.msra.mxu1 %v5856_v41  ;;  %1480 = vmatprep.subr.bf16.mxu0 %v5861_v42  ;;  %v5954_v41 = vld [vmem:[#allocation2 + $0x504] ss:$16 sps:$4 sm:$0xff]   ;;  %v5957_v42 = vld [vmem:[#allocation2 + $0x4ec] ss:$16 sps:$4 sm:$0xff]  }
 0x119   :  { %1650 = vmatprep.subr.bf16.mxu1 %v5864_v43  ;;  %v5952_v43 = vld [vmem:[#allocation2 + $0x500] ss:$16 sps:$4 sm:$0xff]  }
 0x11b   :  { %1481 = vmatpush1.bf16.msra.mxu0 %v5859_v44  ;;  %v5955_v44 = vld [vmem:[#allocation2 + $0x4e8] ss:$16 sps:$4 sm:$0xff]  }
 0x11c   :  { %1651 = vmatpush1.bf16.msra.mxu1 %v5862_v45  ;;  %1482 = vmatprep.subr.bf16.mxu0 %v5867_v46  ;;  %v5960_v45 = vld [vmem:[#allocation2 + $0x524] ss:$16 sps:$4 sm:$0xff]   ;;  %v5963_v46 = vld [vmem:[#allocation2 + $0x50c] ss:$16 sps:$4 sm:$0xff]  }
 0x11d   :  { %1652 = vmatprep.subr.bf16.mxu1 %v5870_v47  ;;  %v5958_v47 = vld [vmem:[#allocation2 + $0x520] ss:$16 sps:$4 sm:$0xff]  }
 0x11f   :  { %1483 = vmatpush1.bf16.msra.mxu0 %v5865_v48  ;;  %v5961_v48 = vld [vmem:[#allocation2 + $0x508] ss:$16 sps:$4 sm:$0xff]  }
 0x120   :  { %1653 = vmatpush1.bf16.msra.mxu1 %v5868_v49  ;;  %1484 = vmatprep.subr.bf16.mxu0 %v5873_v50  ;;  %v5966_v49 = vld [vmem:[#allocation2 + $0x544] ss:$16 sps:$4 sm:$0xff]   ;;  %v5969_v50 = vld [vmem:[#allocation2 + $0x52c] ss:$16 sps:$4 sm:$0xff]  }
 0x121   :  { %1654 = vmatprep.subr.bf16.mxu1 %v5876_v51  ;;  %v5964_v51 = vld [vmem:[#allocation2 + $0x540] ss:$16 sps:$4 sm:$0xff]  }
 0x123   :  { %1485 = vmatpush1.bf16.msra.mxu0 %v5871_v52  ;;  %v5967_v52 = vld [vmem:[#allocation2 + $0x528] ss:$16 sps:$4 sm:$0xff]  }
 0x124   :  { %1655 = vmatpush1.bf16.msra.mxu1 %v5874_v53  ;;  %1486 = vmatprep.subr.bf16.mxu0 %v5879_v54  ;;  %v5972_v53 = vld [vmem:[#allocation2 + $0x564] ss:$16 sps:$4 sm:$0xff]   ;;  %v5975_v54 = vld [vmem:[#allocation2 + $0x54c] ss:$16 sps:$4 sm:$0xff]  }
 0x125   :  { %1656 = vmatprep.subr.bf16.mxu1 %v5882_v55  ;;  %v5970_v55 = vld [vmem:[#allocation2 + $0x560] ss:$16 sps:$4 sm:$0xff]  }
 0x127   :  { %1487 = vmatpush1.bf16.msra.mxu0 %v5877_v56  ;;  %v5973_v56 = vld [vmem:[#allocation2 + $0x548] ss:$16 sps:$4 sm:$0xff]  }
 0x128   :  { %1657 = vmatpush1.bf16.msra.mxu1 %v5880_v57  ;;  %1488 = vmatprep.subr.bf16.mxu0 %v5885_v58  ;;  %v5978_v57 = vld [vmem:[#allocation2 + $0x584] ss:$16 sps:$4 sm:$0xff]   ;;  %v5981_v58 = vld [vmem:[#allocation2 + $0x56c] ss:$16 sps:$4 sm:$0xff]  }
 0x129   :  { %1658 = vmatprep.subr.bf16.mxu1 %v5888_v59  ;;  %v5976_v59 = vld [vmem:[#allocation2 + $0x580] ss:$16 sps:$4 sm:$0xff]  }
 0x12b   :  { %1489 = vmatpush1.bf16.msra.mxu0 %v5883_v60  ;;  %v5979_v60 = vld [vmem:[#allocation2 + $0x568] ss:$16 sps:$4 sm:$0xff]  }
 0x12c   :  { %1659 = vmatpush1.bf16.msra.mxu1 %v5886_v61  ;;  %1490 = vmatprep.subr.bf16.mxu0 %v5891_v62  ;;  %v5984_v61 = vld [vmem:[#allocation2 + $0x5a4] ss:$16 sps:$4 sm:$0xff]   ;;  %v5987_v62 = vld [vmem:[#allocation2 + $0x58c] ss:$16 sps:$4 sm:$0xff]  }
 0x12d   :  { %1660 = vmatprep.subr.bf16.mxu1 %v5894_v63  ;;  %v5982_v63 = vld [vmem:[#allocation2 + $0x5a0] ss:$16 sps:$4 sm:$0xff]  }
 0x12f   :  { %1491 = vmatpush1.bf16.msra.mxu0 %v5889_v1  ;;  %v5985_v1 = vld [vmem:[#allocation2 + $0x588] ss:$16 sps:$4 sm:$0xff]  }
 0x130   :  { %1661 = vmatpush1.bf16.msra.mxu1 %v5892_v2  ;;  %1492 = vmatprep.subr.bf16.mxu0 %v5897_v3  ;;  %v5990_v2 = vld [vmem:[#allocation2 + $0x5c4] ss:$16 sps:$4 sm:$0xff]   ;;  %v5993_v3 = vld [vmem:[#allocation2 + $0x5ac] ss:$16 sps:$4 sm:$0xff]  }
 0x131   :  { %1662 = vmatprep.subr.bf16.mxu1 %v5900_v4  ;;  %v5988_v4 = vld [vmem:[#allocation2 + $0x5c0] ss:$16 sps:$4 sm:$0xff]  }
 0x133   :  { %1493 = vmatpush1.bf16.msra.mxu0 %v5895_v5  ;;  %v5991_v5 = vld [vmem:[#allocation2 + $0x5a8] ss:$16 sps:$4 sm:$0xff]  }
 0x134   :  { %1663 = vmatpush1.bf16.msra.mxu1 %v5898_v6  ;;  %1505 = vmatprep.subr.bf16.mxu0 %v5906_v7  ;;  %v5996_v6 = vld [vmem:[#allocation2 + $0x5e4] ss:$16 sps:$4 sm:$0xff]   ;;  %v5999_v7 = vld [vmem:[#allocation2 + $0x5cc] ss:$16 sps:$4 sm:$0xff]  }
 0x135   :  { %1664 = vmatprep.subr.bf16.mxu1 %v5909_v8  ;;  %v5994_v8 = vld [vmem:[#allocation2 + $0x5e0] ss:$16 sps:$4 sm:$0xff]  }
 0x136   :  { %1495 = vmatmul.mubr.bf16.vlgmr.msra.gmra.mrb[0].mxu0 %v5901_v9 }
 0x137   :  { %1506 = vmatpush1.bf16.msra.mxu0 %v5904_v10  ;;  %1537 = vmatprep.mubr.bf16.mxu0 %v6002_v16  ;;  %v6011_v10 = vld [vmem:[%s7429_s4 + $0x4] ss:$8 sps:$4 sm:$0xff]  }
 0x138   :  { %1665 = vmatpush1.bf16.msra.mxu1 %v5907_v11  ;;  %1507 = vmatprep.subr.bf16.mxu0 %v5912_v12  ;;  %v6005_v11 = vld [vmem:[#allocation2 + $0x5ec] ss:$16 sps:$4 sm:$0xff]  }
 0x139   :  { %1677 = vmatprep.subr.bf16.mxu1 %v5915_v13  ;;  %v6000_v12 = vld [vmem:[%s7425_s0 + $0x10] ss:$28 sps:$4 sm:$0xff]   ;;  %v6009_v13 = vld [vmem:[%s7429_s4] ss:$8 sps:$4 sm:$0xff]  }
 0x13b   :  { %1508 = vmatpush1.bf16.msra.mxu0 %v5910_v14  ;;  %1667 = vmatmul.mubr.bf16.vlgmr.msra.gmra.mrb[4].mxu1 %v5901_v9  ;;  %v5997_v9 = vld [vmem:[#allocation2 + $0x5c8] ss:$16 sps:$4 sm:$0xff]  }
 0x13c   :  { %1678 = vmatpush1.bf16.msra.mxu1 %v5913_v15  ;;  %1509 = vmatprep.subr.bf16.mxu0 %v5918_v17  ;;  %v6003_v14 = vld [vmem:[#allocation2 + $0x5e8] ss:$16 sps:$4 sm:$0xff]   ;;  %v6014_v15 = vld [vmem:[%s7429_s4 + $0x14] ss:$8 sps:$4 sm:$0xff]  }
 0x13d   :  { %1679 = vmatprep.subr.bf16.mxu1 %v5921_v18  ;;  %1709 = vmatprep.mubr.bf16.mxu1 %v6002_v16  ;;  %v6008_v16 = vld [vmem:[#allocation2 + $0x60c] ss:$16 sps:$4 sm:$0xff]   ;;  %v6012_v17 = vld [vmem:[%s7429_s4 + $0x10] ss:$8 sps:$4 sm:$0xff]  }
 0x13e   :  { %v6006_v18 = vld [vmem:[#allocation2 + $0x608] ss:$16 sps:$4 sm:$0xff]  }
 0x13f   :  { %1510 = vmatpush1.bf16.msra.mxu0 %v5916_v19  ;;  %v6017_v19 = vld [vmem:[%s7429_s4 + $0x24] ss:$8 sps:$4 sm:$0xff]  }
 0x140   :  { %1680 = vmatpush1.bf16.msra.mxu1 %v5919_v20  ;;  %1511 = vmatprep.subr.bf16.mxu0 %v5924_v21  ;;  %v6015_v20 = vld [vmem:[%s7429_s4 + $0x20] ss:$8 sps:$4 sm:$0xff]   ;;  %v6020_v21 = vld [vmem:[%s7429_s4 + $0x34] ss:$8 sps:$4 sm:$0xff]  }
 0x141   :  { %1681 = vmatprep.subr.bf16.mxu1 %v5927_v22  ;;  %v6018_v22 = vld [vmem:[%s7429_s4 + $0x30] ss:$8 sps:$4 sm:$0xff]  }
 0x143   :  { %1512 = vmatpush1.bf16.msra.mxu0 %v5922_v23  ;;  %v6023_v23 = vld [vmem:[%s7429_s4 + $0x44] ss:$8 sps:$4 sm:$0xff]  }
 0x144   :  { %1682 = vmatpush1.bf16.msra.mxu1 %v5925_v24  ;;  %1513 = vmatprep.subr.bf16.mxu0 %v5930_v25  ;;  %v6021_v24 = vld [vmem:[%s7429_s4 + $0x40] ss:$8 sps:$4 sm:$0xff]   ;;  %v6026_v25 = vld [vmem:[%s7429_s4 + $0x54] ss:$8 sps:$4 sm:$0xff]  }
 0x145   :  { %1683 = vmatprep.subr.bf16.mxu1 %v5933_v26  ;;  %v6024_v26 = vld [vmem:[%s7429_s4 + $0x50] ss:$8 sps:$4 sm:$0xff]  }
 0x147   :  { %1514 = vmatpush1.bf16.msra.mxu0 %v5928_v27  ;;  %v6029_v27 = vld [vmem:[%s7429_s4 + $0x64] ss:$8 sps:$4 sm:$0xff]  }
 0x148   :  { %1684 = vmatpush1.bf16.msra.mxu1 %v5931_v28  ;;  %1515 = vmatprep.subr.bf16.mxu0 %v5936_v29  ;;  %v6575_v28 = vld [vmem:[%s7425_s0 + $0x18] ss:$28 sps:$4 sm:$0xff]   ;;  %v6027_v29 = vld [vmem:[%s7429_s4 + $0x60] ss:$8 sps:$4 sm:$0xff]   ;;  %s6825_s0 = smov 96  }
 0x149   :  { %1685 = vmatprep.subr.bf16.mxu1 %v5939_v30  ;;  %v6032_v30 = vld [vmem:[%s7429_s4 + $0x74] ss:$8 sps:$4 sm:$0xff]  }
 0x14b   :  { %1516 = vmatpush1.bf16.msra.mxu0 %v5934_v31  ;;  %v6030_v31 = vld [vmem:[%s7429_s4 + $0x70] ss:$8 sps:$4 sm:$0xff]  }
 0x14c   :  { %1686 = vmatpush1.bf16.msra.mxu1 %v5937_v32  ;;  %1517 = vmatprep.subr.bf16.mxu0 %v5942_v33  ;;  %v6035_v33 = vld [vmem:[%s7429_s4 + $0x84] ss:$8 sps:$4 sm:$0xff]  }
 0x14d   :  { %1687 = vmatprep.subr.bf16.mxu1 %v5945_v34 }
 0x14f   :  { %1518 = vmatpush1.bf16.msra.mxu0 %v5940_v35 }
 0x150   :  { %1688 = vmatpush1.bf16.msra.mxu1 %v5943_v36  ;;  %1519 = vmatprep.subr.bf16.mxu0 %v5948_v37  ;;  %v6033_v37 = vld [vmem:[%s7429_s4 + $0x80] ss:$8 sps:$4 sm:$0xff]  }
 0x151   :  { %1689 = vmatprep.subr.bf16.mxu1 %v5951_v38  ;;  %v6038_v38 = vld [vmem:[%s7429_s4 + $0x94] ss:$8 sps:$4 sm:$0xff]  }
 0x153   :  { %1520 = vmatpush1.bf16.msra.mxu0 %v5946_v39  ;;  %v6036_v39 = vld [vmem:[%s7429_s4 + $0x90] ss:$8 sps:$4 sm:$0xff]  }
 0x154   :  { %1690 = vmatpush1.bf16.msra.mxu1 %v5949_v40  ;;  %1521 = vmatprep.subr.bf16.mxu0 %v5954_v41  ;;  %v6041_v40 = vld [vmem:[%s7429_s4 + $0xa4] ss:$8 sps:$4 sm:$0xff]   ;;  %v6039_v41 = vld [vmem:[%s7429_s4 + $0xa0] ss:$8 sps:$4 sm:$0xff]  }
 0x155   :  { %1691 = vmatprep.subr.bf16.mxu1 %v5957_v42  ;;  %v6044_v42 = vld [vmem:[%s7429_s4 + $0xb4] ss:$8 sps:$4 sm:$0xff]  }
 0x157   :  { %1522 = vmatpush1.bf16.msra.mxu0 %v5952_v43  ;;  %v6042_v43 = vld [vmem:[%s7429_s4 + $0xb0] ss:$8 sps:$4 sm:$0xff]  }
 0x158   :  { %1692 = vmatpush1.bf16.msra.mxu1 %v5955_v44  ;;  %1523 = vmatprep.subr.bf16.mxu0 %v5960_v45  ;;  %v6047_v44 = vld [vmem:[%s7429_s4 + $0xc4] ss:$8 sps:$4 sm:$0xff]   ;;  %v6045_v45 = vld [vmem:[%s7429_s4 + $0xc0] ss:$8 sps:$4 sm:$0xff]  }
 0x159   :  { %1693 = vmatprep.subr.bf16.mxu1 %v5963_v46  ;;  %v6050_v46 = vld [vmem:[%s7429_s4 + $0xd4] ss:$8 sps:$4 sm:$0xff]  }
 0x15b   :  { %1524 = vmatpush1.bf16.msra.mxu0 %v5958_v47  ;;  %v6048_v47 = vld [vmem:[%s7429_s4 + $0xd0] ss:$8 sps:$4 sm:$0xff]  }
 0x15c   :  { %1694 = vmatpush1.bf16.msra.mxu1 %v5961_v48  ;;  %1525 = vmatprep.subr.bf16.mxu0 %v5966_v49  ;;  %v6053_v48 = vld [vmem:[%s7429_s4 + $0xe4] ss:$8 sps:$4 sm:$0xff]   ;;  %v6051_v49 = vld [vmem:[%s7429_s4 + $0xe0] ss:$8 sps:$4 sm:$0xff]  }
 0x15d   :  { %1695 = vmatprep.subr.bf16.mxu1 %v5969_v50  ;;  %v6056_v50 = vld [vmem:[%s7429_s4 + $0xf4] ss:$8 sps:$4 sm:$0xff]  }
 0x15f   :  { %1526 = vmatpush1.bf16.msra.mxu0 %v5964_v51  ;;  %v6054_v51 = vld [vmem:[%s7429_s4 + $0xf0] ss:$8 sps:$4 sm:$0xff]  }
 0x160   :  { %1696 = vmatpush1.bf16.msra.mxu1 %v5967_v52  ;;  %1527 = vmatprep.subr.bf16.mxu0 %v5972_v53  ;;  %v6059_v52 = vld [vmem:[%s7429_s4 + $0x104] ss:$8 sps:$4 sm:$0xff]  }
 0x161   :  { %1697 = vmatprep.subr.bf16.mxu1 %v5975_v54  ;;  %v6105_v53 = vld [vmem:[%s7431_s6 + $0x40] sm:$0xff]  }
 0x162   :  { %v6106_v54 = vld [vmem:[%s7431_s6] sm:$0xff]  }
 0x163   :  { %1528 = vmatpush1.bf16.msra.mxu0 %v5970_v55  ;;  %v6107_v55 = vld [vmem:[%s7431_s6 + $0x48] sm:$0xff]  }
 0x164   :  { %1698 = vmatpush1.bf16.msra.mxu1 %v5973_v56  ;;  %1529 = vmatprep.subr.bf16.mxu0 %v5978_v57  ;;  %v6108_v56 = vld [vmem:[%s7431_s6 + $0x8] sm:$0xff]   ;;  %v6109_v57 = vld [vmem:[%s7431_s6 + $0x50] sm:$0xff]  }
 0x165   :  { %1699 = vmatprep.subr.bf16.mxu1 %v5981_v58  ;;  %v6110_v58 = vld [vmem:[%s7431_s6 + $0x10] sm:$0xff]  }
 0x167   :  { %1530 = vmatpush1.bf16.msra.mxu0 %v5976_v59  ;;  %v6111_v59 = vld [vmem:[%s7431_s6 + $0x58] sm:$0xff]  }
 0x168   :  { %1700 = vmatpush1.bf16.msra.mxu1 %v5979_v60  ;;  %1531 = vmatprep.subr.bf16.mxu0 %v5984_v61  ;;  %v6112_v60 = vld [vmem:[%s7431_s6 + $0x18] sm:$0xff]   ;;  %v6113_v61 = vld [vmem:[%s7431_s6 + $0x60] sm:$0xff]  }
 0x169   :  { %1701 = vmatprep.subr.bf16.mxu1 %v5987_v62  ;;  %v6114_v62 = vld [vmem:[%s7431_s6 + $0x20] sm:$0xff]  }
 0x16b   :  { %1532 = vmatpush1.bf16.msra.mxu0 %v5982_v63  ;;  %v6115_v63 = vld [vmem:[%s7431_s6 + $0x68] sm:$0xff]  }
 0x16c   :  { %1702 = vmatpush1.bf16.msra.mxu1 %v5985_v1  ;;  %1533 = vmatprep.subr.bf16.mxu0 %v5990_v2  ;;  %v380_v1 = vlaneseq }
 0x16d   :  { %1703 = vmatprep.subr.bf16.mxu1 %v5993_v3 }
 0x16e   :  { %v7200_v2 = vshrl.u32 %v380_v1, 7  ;;  %v6087_v1 = vld [vmem:[%s7429_s4 + $0x1a0] ss:$8 sps:$4 sm:$0xff]  }
 0x16f   :  { %1534 = vmatpush1.bf16.msra.mxu0 %v5988_v4  ;;  %v378_v4 = vld [vmem:[#allocation4] sm:$0xf] }
 0x170   :  { %1704 = vmatpush1.bf16.msra.mxu1 %v5991_v5  ;;  %1535 = vmatprep.subr.bf16.mxu0 %v5996_v6  ;;  %v7203_v3 = vsub.s32 0, %v7200_v2  ;;  %v7206_v5 = vsub.s32 1, %v7200_v2 }
 0x171   :  { %1705 = vmatprep.subr.bf16.mxu1 %v5999_v7 }
 0x172   :  { %v383_v6 = vrot.slane %v378_v4, %v7203_v3  ;;  %v387_v7 = vrot.slane %v378_v4, %v7206_v5 }
 0x173   :  { %1536 = vmatpush1.bf16.msra.mxu0 %v5994_v8 }
 0x174   :  { %1706 = vmatpush1.bf16.msra.mxu1 %v5997_v9  ;;  %2171 = vmatprep.subr.bf16.mxu0 %v6011_v10 }
 0x175   :  { %1707 = vmatprep.subr.bf16.mxu1 %v6005_v11 }
 0x176   :  { %1538 = vmatmul.mubr.bf16.vlgmr.msra.gmra.mrb[0].mxu0 %v6000_v12 }
 0x177   :  { %2172 = vmatpush1.bf16.msra.mxu0 %v6009_v13 }
 0x178   :  { %1708 = vmatpush1.bf16.msra.mxu1 %v6003_v14  ;;  %2173 = vmatprep.subr.bf16.mxu0 %v6014_v15 }
 0x179   :  { %1720 = vmatprep.subr.bf16.mxu1 %v6008_v16 }
 0x17b   :  { %1710 = vmatmul.mubr.bf16.vlgmr.msra.gmra.mrb[4].mxu1 %v6000_v12  ;;  %2174 = vmatpush1.bf16.msra.mxu0 %v6012_v17 }
 0x17c   :  { %1721 = vmatpush1.bf16.msra.mxu1 %v6006_v18  ;;  %1752 = vmatprep.mubr.bf16.mxu1 %v6824_v0 }
 0x17d   :  { %2175 = vmatprep.subr.bf16.mxu0 %v6017_v19  ;;  %5557 = vmatprep.subr.bf16.mxu1 %v6105_v53  ;;  %v6074_v53 = vld [vmem:[%s7429_s4 + $0x154] ss:$8 sps:$4 sm:$0xff]  }
 0x17f   :  { %2176 = vmatpush1.bf16.msra.mxu0 %v6015_v20 }
 0x180   :  { %2177 = vmatprep.subr.bf16.mxu0 %v6020_v21 }
 0x183   :  { %2178 = vmatpush1.bf16.msra.mxu0 %v6018_v22 }
 0x184   :  { %2179 = vmatprep.subr.bf16.mxu0 %v6023_v23 }
 0x187   :  { %5166 = vmatmul.mubr.msk.bf16.vlgmr.msra.gmra.mrb[4].mxu1 %vm1415_vm0, %v6575_v28  ;;  %2180 = vmatpush1.bf16.msra.mxu0 %v6021_v24  ;;  %v6062_v28 = vld [vmem:[%s7429_s4 + $0x114] ss:$8 sps:$4 sm:$0xff]  }
 0x188   :  { %2181 = vmatprep.subr.bf16.mxu0 %v6026_v25  ;;  %5558 = vmatpush3.bf16.msra.mxu1 %v6106_v54  ;;  %v6072_v54 = vld [vmem:[%s7429_s4 + $0x150] ss:$8 sps:$4 sm:$0xff]  }
 0x189   :  { %5559 = vmatprep.subr.bf16.mxu1 %v6107_v55  ;;  %v6077_v55 = vld [vmem:[%s7429_s4 + $0x164] ss:$8 sps:$4 sm:$0xff]  }
 0x18b   :  { %2182 = vmatpush1.bf16.msra.mxu0 %v6024_v26  ;;  %v6057_v26 = vld [vmem:[%s7429_s4 + $0x100] ss:$8 sps:$4 sm:$0xff]  }
 0x18c   :  { %2183 = vmatprep.subr.bf16.mxu0 %v6029_v27  ;;  %5560 = vmatpush3.bf16.msra.mxu1 %v6108_v56  ;;  %v7218_v27 = vsub.s32 2, %v7200_v2  ;;  %v6075_v56 = vld [vmem:[%s7429_s4 + $0x160] ss:$8 sps:$4 sm:$0xff]  }
 0x18d   :  { %5561 = vmatprep.subr.bf16.mxu1 %v6109_v57  ;;  %v6080_v57 = vld [vmem:[%s7429_s4 + $0x174] ss:$8 sps:$4 sm:$0xff]  }
 0x18e   :  { %v7108_v32 = vpop.f32.mrb[0].mxu1 }
 0x18f   :  { %v7113_v34 = vpop.f32.mrb[1].mxu1  ;;  %2184 = vmatpush1.bf16.msra.mxu0 %v6027_v29  ;;  %v7224_v29 = vsub.s32 3, %v7200_v2 }
 0x190   :  { %v7115_v35 = vpop.f32.mrb[2].mxu1  ;;  %2185 = vmatprep.subr.bf16.mxu0 %v6032_v30  ;;  %5562 = vmatpush3.bf16.msra.mxu1 %v6110_v58  ;;  %v391_v30 = vrot.slane %v378_v4, %v7218_v27  ;;  %v6078_v58 = vld [vmem:[%s7429_s4 + $0x170] ss:$8 sps:$4 sm:$0xff]  }
 0x191   :  { %v7117_v36 = vpop.f32.mrb[3].mxu1  ;;  %5563 = vmatprep.subr.bf16.mxu1 %v6111_v59  ;;  %v6083_v59 = vld [vmem:[%s7429_s4 + $0x184] ss:$8 sps:$4 sm:$0xff]  }
 0x193   :  { %2186 = vmatpush1.bf16.msra.mxu0 %v6030_v31  ;;  %v6060_v31 = vld [vmem:[%s7429_s4 + $0x110] ss:$8 sps:$4 sm:$0xff]  }
 0x194   :  { %2187 = vmatprep.subr.bf16.mxu0 %v6035_v33  ;;  %5564 = vmatpush3.bf16.msra.mxu1 %v6112_v60  ;;  %v6065_v33 = vld [vmem:[%s7429_s4 + $0x124] ss:$8 sps:$4 sm:$0xff]   ;;  %v6081_v60 = vld [vmem:[%s7429_s4 + $0x180] ss:$8 sps:$4 sm:$0xff]  }
 0x195   :  { %5565 = vmatprep.subr.bf16.mxu1 %v6113_v61  ;;  %v6086_v61 = vld [vmem:[%s7429_s4 + $0x194] ss:$8 sps:$4 sm:$0xff]  }
 0x197   :  { %2188 = vmatpush1.bf16.msra.mxu0 %v6033_v37  ;;  %v6063_v37 = vld [vmem:[%s7429_s4 + $0x120] ss:$8 sps:$4 sm:$0xff]  }
 0x198   :  { %2189 = vmatprep.subr.bf16.mxu0 %v6038_v38  ;;  %5566 = vmatpush3.bf16.msra.mxu1 %v6114_v62  ;;  %v6084_v62 = vld [vmem:[%s7429_s4 + $0x190] ss:$8 sps:$4 sm:$0xff]  }
 0x199   :  { %5567 = vmatprep.subr.bf16.mxu1 %v6115_v63  ;;  %v6089_v63 = vld [vmem:[%s7429_s4 + $0x1a4] ss:$8 sps:$4 sm:$0xff]  }
 0x19b   :  { %2190 = vmatpush1.bf16.msra.mxu0 %v6036_v39 }
 0x19c   :  { %2191 = vmatprep.subr.bf16.mxu0 %v6041_v40  ;;  %v6068_v40 = vld [vmem:[%s7429_s4 + $0x134] ss:$8 sps:$4 sm:$0xff]  }
 0x19f   :  { %2192 = vmatpush1.bf16.msra.mxu0 %v6039_v41 }
 0x1a0   :  { %2193 = vmatprep.subr.bf16.mxu0 %v6044_v42 }
 0x1a3   :  { %2194 = vmatpush1.bf16.msra.mxu0 %v6042_v43 }
 0x1a4   :  { %2195 = vmatprep.subr.bf16.mxu0 %v6047_v44 }
 0x1a7   :  { %2196 = vmatpush1.bf16.msra.mxu0 %v6045_v45 }
 0x1a8   :  { %2197 = vmatprep.subr.bf16.mxu0 %v6050_v46  ;;  %v6066_v46 = vld [vmem:[%s7429_s4 + $0x130] ss:$8 sps:$4 sm:$0xff]  }
 0x1ab   :  { %2198 = vmatpush1.bf16.msra.mxu0 %v6048_v47 }
 0x1ac   :  { %2199 = vmatprep.subr.bf16.mxu0 %v6053_v48 }
 0x1af   :  { %2200 = vmatpush1.bf16.msra.mxu0 %v6051_v49  ;;  %v6071_v49 = vld [vmem:[%s7429_s4 + $0x144] ss:$8 sps:$4 sm:$0xff]  }
 0x1b0   :  { %2201 = vmatprep.subr.bf16.mxu0 %v6056_v50 }
 0x1b3   :  { %2202 = vmatpush1.bf16.msra.mxu0 %v6054_v51 }
 0x1b4   :  { %2214 = vmatprep.subr.bf16.mxu0 %v6059_v52  ;;  %v6069_v52 = vld [vmem:[%s7429_s4 + $0x140] ss:$8 sps:$4 sm:$0xff]  }
 0x249   :  { %v1539_v8 = vpop.f32.mrb[0].mxu0 }
 0x24a   :  { %v5623_v9 = vadd.f32 %v1539_v8, %v383_v6  ;;  %v1541_v10 = vpop.f32.mrb[1].mxu0  ;;  %v6093_v8 = vld [vmem:[%s7429_s4 + $0x1c0] ss:$8 sps:$4 sm:$0xff]  }
 0x24b   :  { %v5625_v11 = vadd.f32 %v1541_v10, %v387_v7  ;;  %v1543_v12 = vpop.f32.mrb[2].mxu0  ;;  %v6096_v10 = vld [vmem:[%s7429_s4 + $0x1d0] ss:$8 sps:$4 sm:$0xff]  }
 0x24c   :  { %v5624_v13 = vadd.f32 %v5623_v9, %v7108_v32  ;;  %v5627_v14 = vadd.f32 %v1543_v12, %v383_v6  ;;  %v1545_v15 = vpop.f32.mrb[3].mxu0  ;;  %v395_v32 = vrot.slane %v378_v4, %v7224_v29  ;;  %v6092_v4 = vld [vmem:[%s7429_s4 + $0x1b4] ss:$8 sps:$4 sm:$0xff]   ;;  %v6090_v6 = vld [vmem:[%s7429_s4 + $0x1b0] ss:$8 sps:$4 sm:$0xff]  }
 0x24d   :  { %v5626_v16 = vadd.f32 %v5625_v11, %v7113_v34  ;;  %v5629_v17 = vadd.f32 %v1545_v15, %v387_v7  ;;  %v6095_v7 = vld [vmem:[%s7429_s4 + $0x1c4] ss:$8 sps:$4 sm:$0xff]   ;;  %v6098_v9 = vld [vmem:[%s7429_s4 + $0x1d4] ss:$8 sps:$4 sm:$0xff]   ;;  %v6099_v12 = vld [vmem:[%s7429_s4 + $0x1e0] ss:$8 sps:$4 sm:$0xff]  }
 0x24e   :  { %v5628_v18 = vadd.f32 %v5627_v14, %v7115_v35  ;;  %v1763_v20 = vmax.f32 %v5624_v13, 0.0  ;;  %v6101_v11 = vld [vmem:[%s7429_s4 + $0x1e4] ss:$8 sps:$4 sm:$0xff]   ;;  %v6104_v13 = vld [vmem:[%s7429_s4 + $0x1f4] ss:$8 sps:$4 sm:$0xff]  }
 0x24f   :  { %v5630_v19 = vadd.f32 %v5629_v17, %v7117_v36  ;;  %v1764_v22 = vmax.f32 %v5626_v16, 0.0  ;;  %v6102_v14 = vld [vmem:[%s7429_s4 + $0x1f0] ss:$8 sps:$4 sm:$0xff]   ;;  %v6116_v15 = vld [vmem:[%s7431_s6 + $0x28] sm:$0xff]  }
 0x250   :  { %v1767_v21 = vmax.f32 %v5628_v18, 0.0  ;;  %5568 = vmatpush3.bf16.msra.mxu1 %v6116_v15  ;;  %v6117_v16 = vld [vmem:[%s7431_s6 + $0x70] sm:$0xff]   ;;  %v6119_v18 = vld [vmem:[%s7431_s6 + $0x78] sm:$0xff]  }
 0x251   :  { %v1768_v23 = vmax.f32 %v5630_v19, 0.0  ;;  %v6118_v17 = vld [vmem:[%s7431_s6 + $0x30] sm:$0xff]   ;;  %5569 = vmatprep.subr.bf16.mxu1 %v6117_v16  ;;  %v6120_v19 = vld [vmem:[%s7431_s6 + $0x38] sm:$0xff]  }
 0x252   :  { %v1771_v24 = vpack.c.bf16 %v1767_v21, %v1763_v20  ;;  %v1839_v20 = vld [vmem:[#allocation6] sm:$0x3]  ;;  %v6139_v15 = vld [vmem:[#allocation12 + $0x80] ss:$16 sps:$4 sm:$0xff]   ;;  %v6144_v16 = vld [vmem:[#allocation12 + $0xa4] ss:$16 sps:$4 sm:$0xff]  }
 0x253   :  { %v1772_v25 = vpack.c.bf16 %v1768_v23, %v1764_v22  ;;  %v1844_v21 = vrot.slane %v1839_v20, %v7203_v3  ;;  %v1848_v22 = vrot.slane %v1839_v20, %v7206_v5  ;;  %v6150_v20 = vld [vmem:[#allocation12 + $0xe4] ss:$16 sps:$4 sm:$0xff]  }
 0x254   :  { %5570 = vmatpush3.bf16.msra.mxu1 %v6118_v17  ;;  %v6142_v17 = vld [vmem:[#allocation12 + $0xa0] ss:$16 sps:$4 sm:$0xff]  }
 0x255   :  { %2203 = vmatprep.mubr.bf16.mxu0 %v1772_v25  ;;  %5571 = vmatprep.subr.bf16.mxu1 %v6119_v18  ;;  %v6147_v18 = vld [vmem:[#allocation12 + $0xc4] ss:$16 sps:$4 sm:$0xff]  }
 0x256   :  { %2204 = vmatmul.mubr.bf16.vlgmr.msra.gmra.mrb[4].mxu0 %v1771_v24 }
 0x257   :  { %2215 = vmatpush1.bf16.msra.mxu0 %v6057_v26 }
 0x258   :  { %2216 = vmatprep.subr.bf16.mxu0 %v6062_v28  ;;  %5572 = vmatpush3.bf16.msra.mxu1 %v6120_v19  ;;  %v6145_v19 = vld [vmem:[#allocation12 + $0xc0] ss:$16 sps:$4 sm:$0xff]  }
 0x25a   :  { %v1754_v34 = vpop.f32.mrb[4].mxu1 }
 0x25b   :  { %v5631_v35 = vadd.f32 %v1754_v34, %v391_v30  ;;  %v1756_v36 = vpop.f32.mrb[5].mxu1  ;;  %2217 = vmatpush1.bf16.msra.mxu0 %v6060_v31 }
 0x25c   :  { %v5632_v38 = vadd.f32 %v1756_v36, %v395_v32  ;;  %v1758_v39 = vpop.f32.mrb[6].mxu1  ;;  %2218 = vmatprep.subr.bf16.mxu0 %v6065_v33 }
 0x25d   :  { %v5633_v41 = vadd.f32 %v1758_v39, %v391_v30  ;;  %v1760_v42 = vpop.f32.mrb[7].mxu1  ;;  %v1765_v44 = vmax.f32 %v5631_v35, 0.0 }
 0x25e   :  { %v5634_v43 = vadd.f32 %v1760_v42, %v395_v32  ;;  %v1766_v47 = vmax.f32 %v5632_v38, 0.0 }
 0x25f   :  { %v1769_v45 = vmax.f32 %v5633_v41, 0.0  ;;  %2219 = vmatpush1.bf16.msra.mxu0 %v6063_v37 }
 0x260   :  { %v1770_v48 = vmax.f32 %v5634_v43, 0.0  ;;  %2220 = vmatprep.subr.bf16.mxu0 %v6068_v40  ;;  %v5231_v40 = vld [vmem:[#allocation7] ss:$0 sm:$0xff] }
 0x261   :  { %v1773_v50 = vpack.c.bf16 %v1769_v45, %v1765_v44 }
 0x262   :  { %v1774_v51 = vpack.c.bf16 %v1770_v48, %v1766_v47 }
 0x263   :  { %2221 = vmatpush1.bf16.msra.mxu0 %v6066_v46 }
 0x264   :  { %2246 = vmatprep.mubr.bf16.mxu0 %v1774_v51  ;;  %2222 = vmatprep.subr.bf16.mxu0 %v6071_v49  ;;  %v6121_v51 = vld [vmem:[#allocation9] ss:$8 sps:$4 sm:$0xff]  }
 0x267   :  { %2223 = vmatpush1.bf16.msra.mxu0 %v6069_v52 }
 0x268   :  { %2224 = vmatprep.subr.bf16.mxu0 %v6074_v53  ;;  %v6126_v53 = vld [vmem:[#allocation9 + $0x14] ss:$8 sps:$4 sm:$0xff]  }
 0x26b   :  { %2225 = vmatpush1.bf16.msra.mxu0 %v6072_v54  ;;  %v6124_v54 = vld [vmem:[#allocation9 + $0x10] ss:$8 sps:$4 sm:$0xff]  }
 0x26c   :  { %2226 = vmatprep.subr.bf16.mxu0 %v6077_v55  ;;  %v6129_v55 = vld [vmem:[#allocation12 + $0x4] ss:$16 sps:$4 sm:$0xff]  }
 0x26f   :  { %2227 = vmatpush1.bf16.msra.mxu0 %v6075_v56 }
 0x270   :  { %2228 = vmatprep.subr.bf16.mxu0 %v6080_v57 }
 0x273   :  { %2229 = vmatpush1.bf16.msra.mxu0 %v6078_v58  ;;  %v2439_v58 = vld [vmem:[%s7426_s1] sm:$0xff] }
 0x274   :  { %2230 = vmatprep.subr.bf16.mxu0 %v6083_v59 }
 0x277   :  { %2231 = vmatpush1.bf16.msra.mxu0 %v6081_v60  ;;  %v2440_v60 = vld [vmem:[%s7426_s1 + $0x8] sm:$0xff] }
 0x278   :  { %2232 = vmatprep.subr.bf16.mxu0 %v6086_v61 }
 0x27b   :  { %2233 = vmatpush1.bf16.msra.mxu0 %v6084_v62 }
 0x27c   :  { %2234 = vmatprep.subr.bf16.mxu0 %v6089_v63 }
 0x27f   :  { %2235 = vmatpush1.bf16.msra.mxu0 %v6087_v1 }
 0x280   :  { %2236 = vmatprep.subr.bf16.mxu0 %v6092_v4 }
 0x283   :  { %2237 = vmatpush1.bf16.msra.mxu0 %v6090_v6  ;;  %v6127_v6 = vld [vmem:[#allocation12] ss:$16 sps:$4 sm:$0xff]  }
 0x284   :  { %2238 = vmatprep.subr.bf16.mxu0 %v6095_v7 }
 0x287   :  { %2239 = vmatpush1.bf16.msra.mxu0 %v6093_v8  ;;  %v6132_v8 = vld [vmem:[#allocation12 + $0x24] ss:$16 sps:$4 sm:$0xff]  }
 0x288   :  { %2240 = vmatprep.subr.bf16.mxu0 %v6098_v9  ;;  %v6130_v9 = vld [vmem:[#allocation12 + $0x20] ss:$16 sps:$4 sm:$0xff]  }
 0x28b   :  { %2241 = vmatpush1.bf16.msra.mxu0 %v6096_v10  ;;  %v6135_v10 = vld [vmem:[#allocation12 + $0x44] ss:$16 sps:$4 sm:$0xff]  }
 0x28c   :  { %2242 = vmatprep.subr.bf16.mxu0 %v6101_v11  ;;  %v6133_v11 = vld [vmem:[#allocation12 + $0x40] ss:$16 sps:$4 sm:$0xff]  }
 0x28f   :  { %2243 = vmatpush1.bf16.msra.mxu0 %v6099_v12  ;;  %v6138_v12 = vld [vmem:[#allocation12 + $0x64] ss:$16 sps:$4 sm:$0xff]  }
 0x290   :  { %2244 = vmatprep.subr.bf16.mxu0 %v6104_v13  ;;  %v6136_v13 = vld [vmem:[#allocation12 + $0x60] ss:$16 sps:$4 sm:$0xff]  }
 0x293   :  { %2245 = vmatpush1.bf16.msra.mxu0 %v6102_v14  ;;  %v6141_v14 = vld [vmem:[#allocation12 + $0x84] ss:$16 sps:$4 sm:$0xff]  }
 0x296   :  { %2247 = vmatmul.mubr.bf16.vlgmr.msra.gmra.mrb[4].mxu0 %v1773_v50 }
 0x369   :  { %v2248_v23 = vpop.f32.mrb[4].mxu0 }
 0x36a   :  { %v5635_v24 = vadd.f32 %v2248_v23, %v1844_v21  ;;  %v2250_v25 = vpop.f32.mrb[5].mxu0  ;;  %v6151_v23 = vld [vmem:[#allocation12 + $0x100] ss:$16 sps:$4 sm:$0xff]  }
 0x36b   :  { %v5636_v26 = vadd.f32 %v2250_v25, %v1848_v22  ;;  %v2252_v28 = vpop.f32.mrb[6].mxu0  ;;  %v6154_v25 = vld [vmem:[#allocation12 + $0x120] ss:$16 sps:$4 sm:$0xff]  }
 0x36c   :  { %v5637_v30 = vadd.f32 %v2252_v28, %v1844_v21  ;;  %v2254_v31 = vpop.f32.mrb[7].mxu0  ;;  %v2257_v33 = vmax.f32 %v5635_v24, 0.0  ;;  %v6148_v21 = vld [vmem:[#allocation12 + $0xe0] ss:$16 sps:$4 sm:$0xff]   ;;  %v6156_v24 = vld [vmem:[#allocation12 + $0x124] ss:$16 sps:$4 sm:$0xff]  }
 0x36d   :  { %v5638_v32 = vadd.f32 %v2254_v31, %v1848_v22  ;;  %v2258_v35 = vmax.f32 %v5636_v26, 0.0  ;;  %v6153_v22 = vld [vmem:[#allocation12 + $0x104] ss:$16 sps:$4 sm:$0xff]   ;;  %v6157_v28 = vld [vmem:[#allocation12 + $0x140] ss:$16 sps:$4 sm:$0xff]  }
 0x36e   :  { %v2259_v34 = vmax.f32 %v5637_v30, 0.0  ;;  %v6159_v26 = vld [vmem:[#allocation12 + $0x144] ss:$16 sps:$4 sm:$0xff]   ;;  %v6160_v31 = vld [vmem:[#allocation12 + $0x160] ss:$16 sps:$4 sm:$0xff]  }
 0x36f   :  { %v2260_v36 = vmax.f32 %v5638_v32, 0.0  ;;  %v6162_v30 = vld [vmem:[#allocation12 + $0x164] ss:$16 sps:$4 sm:$0xff]  }
 0x370   :  { %v2261_v37 = vpack.c.bf16 %v2259_v34, %v2257_v33  ;;  %v6165_v32 = vld [vmem:[#allocation12 + $0x184] ss:$16 sps:$4 sm:$0xff]   ;;  %v6163_v33 = vld [vmem:[#allocation12 + $0x180] ss:$16 sps:$4 sm:$0xff]  }
 0x371   :  { %v2262_v38 = vpack.c.bf16 %v2260_v36, %v2258_v35  ;;  %v6168_v34 = vld [vmem:[#allocation12 + $0x1a4] ss:$16 sps:$4 sm:$0xff]   ;;  %v6166_v35 = vld [vmem:[#allocation12 + $0x1a0] ss:$16 sps:$4 sm:$0xff]  }
 0x372   :  { %v6171_v36 = vld [vmem:[#allocation12 + $0x1c4] ss:$16 sps:$4 sm:$0xff]  }
 0x373   :  { %2430 = vmatprep.mubr.bf16.mxu1 %v2262_v38  ;;  %v6174_v38 = vld [vmem:[#allocation12 + $0x1e4] ss:$16 sps:$4 sm:$0xff]  }
 0x374   :  { %2431 = vmatmul.mubr.bf16.vlgmr.msra.gmra.mrb[8].mxu1 %v2261_v37  ;;  %v6169_v37 = vld [vmem:[#allocation12 + $0x1c0] ss:$16 sps:$4 sm:$0xff]  }
 0x375   :  { %2532 = vmatprep.mubr.bf16.mxu1 %v6824_v0  ;;  %v6123_v0 = vld [vmem:[#allocation9 + $0x4] ss:$8 sps:$4 sm:$0xff]  }
 0x376   :  { %2500 = vmatprep.subr.bf16.mxu1 %v6123_v0  ;;  %v6255_v0 = vld [vmem:[#allocation15 + $0x11c] ss:$28 sps:$4 sm:$0xff]  }
 0x377   :  { %2501 = vmatpush1.bf16.msra.mxu1 %v6121_v51  ;;  %v6253_v51 = vld [vmem:[#allocation15 + $0x118] ss:$28 sps:$4 sm:$0xff]  }
 0x378   :  { %2502 = vmatprep.subr.bf16.mxu1 %v6126_v53  ;;  %v6259_v53 = vld [vmem:[#allocation15 + $0x150] ss:$28 sps:$4 sm:$0xff]  }
 0x37b   :  { %2503 = vmatpush1.bf16.msra.mxu1 %v6124_v54  ;;  %v6267_v54 = vld [vmem:[#allocation15 + $0x18c] ss:$28 sps:$4 sm:$0xff]  }
 0x37c   :  { %2955 = vmatprep.subr.bf16.mxu1 %v6129_v55  ;;  %v6265_v55 = vld [vmem:[#allocation15 + $0x188] ss:$28 sps:$4 sm:$0xff]  }
 0x447   :  { %v5573_v39 = vpop.f32.mrb[8].mxu1 }
 0x448   :  { %v5574_v41 = vpop.f32.mrb[9].mxu1 }
 0x449   :  { %v5575_v42 = vadd.f32 %v5574_v41, %v5573_v39  ;;  %v5576_v43 = vpop.f32.mrb[10].mxu1  ;;  %v6172_v39 = vld [vmem:[#allocation12 + $0x1e0] ss:$16 sps:$4 sm:$0xff]  }
 0x44a   :  { %v5577_v44 = vpop.f32.mrb[11].mxu1  ;;  %v6223_v41 = vld [vmem:[#allocation15] ss:$28 sps:$4 sm:$0xff]  }
 0x44b   :  { %v2433_v45 = vadd.f32 %v5575_v42, %v5231_v40  ;;  %v5578_v46 = vadd.f32 %v5577_v44, %v5576_v43  ;;  %v6225_v42 = vld [vmem:[#allocation15 + $0x4] ss:$28 sps:$4 sm:$0xff]   ;;  %v6231_v43 = vld [vmem:[#allocation15 + $0x3c] ss:$28 sps:$4 sm:$0xff]  }
 0x44c   :  { %4498 = vmatprep.subr.bf16.mxu0 %v6225_v42  ;;  %v6229_v44 = vld [vmem:[#allocation15 + $0x38] ss:$28 sps:$4 sm:$0xff]  }
 0x44d   :  { %v2441_v47 = vmul.f32 0.5, %v2433_v45  ;;  %4946 = vst [vmem:[%s7440_s15] sm:$0xff] %v2433_v45  ;;  %v2436_v48 = vadd.f32 %v5578_v46, %v5231_v40  ;;  %v6177_v40 = vld [vmem:[#allocation12 + $0xc] ss:$16 sps:$4 sm:$0xff]   ;;  %4499 = vmatpush1.bf16.msra.mxu0 %v6223_v41  ;;  %v6235_v46 = vld [vmem:[#allocation15 + $0x70] ss:$28 sps:$4 sm:$0xff]  }
 0x44e   :  { %4500 = vmatprep.subr.bf16.mxu0 %v6231_v43  ;;  %v6196_v41 = vld [vmem:[#allocation12 + $0xe8] ss:$16 sps:$4 sm:$0xff]   ;;  %v6201_v42 = vld [vmem:[#allocation12 + $0x10c] ss:$16 sps:$4 sm:$0xff]  }
 0x44f   :  { %v2443_v49 = vmul.f32 1.442695, %v2441_v47  ;;  %v2442_v50 = vmul.f32 0.5, %v2436_v48  ;;  %4947 = vst [vmem:[%s7440_s15 + $0x8] sm:$0xff] %v2436_v48  ;;  %v6243_v47 = vld [vmem:[#allocation15 + $0xac] ss:$28 sps:$4 sm:$0xff]  }
 0x450   :  { %v6199_v43 = vld [vmem:[#allocation12 + $0x108] ss:$16 sps:$4 sm:$0xff]  }
 0x451   :  { %6543 = vpow2.f32 %v2443_v49  ;;  %v2445_v52 = vmul.f32 1.442695, %v2442_v50  ;;  %4501 = vmatpush1.bf16.msra.mxu0 %v6229_v44  ;;  %v6249_v49 = vld [vmem:[#allocation15 + $0xe4] ss:$28 sps:$4 sm:$0xff]   ;;  %v6204_v44 = vld [vmem:[#allocation12 + $0x12c] ss:$16 sps:$4 sm:$0xff]  }
 0x452   :  { %v6247_v50 = vld [vmem:[#allocation15 + $0xe0] ss:$28 sps:$4 sm:$0xff]  }
 0x453   :  { %6545 = vpow2.f32 %v2445_v52  ;;  %v6261_v52 = vld [vmem:[#allocation15 + $0x154] ss:$28 sps:$4 sm:$0xff]  }
 0x45b   :  { %v6544_v56 = vpop.eup %6543 }
 0x45c   :  { %2449 = vrot.lane.b32.xlu0 %v6544_v56, %s6825_s0  ;;  %v6273_v56 = vld [vmem:[#allocation15 + $0x1c4] ss:$28 sps:$4 sm:$0xff]  }
 0x45d   :  { %v6546_v57 = vpop.eup %6545 }
 0x460   :  { %2451 = vrot.lane.b32.xlu0 %v6546_v57, %s6825_s0  ;;  %v6271_v57 = vld [vmem:[#allocation15 + $0x1c0] ss:$28 sps:$4 sm:$0xff]  }
 0x4ce   :  { %v2450_v59 = vpop.permute.xlu0 %2449 }
 0x4cf   :  { %v2455_v61 = vmul.f32 %v2450_v59, %v2439_v58  ;;  %v6279_v58 = vld [vmem:[#allocation15 + $0x1fc] ss:$28 sps:$4 sm:$0xff]  }
 0x4d0   :  { %v6277_v59 = vld [vmem:[#allocation15 + $0x1f8] ss:$28 sps:$4 sm:$0xff]  }
 0x4d1   :  { %v2457_v1 = vadd.f32 %v2455_v61, %v2433_v45  ;;  %v6237_v45 = vld [vmem:[#allocation15 + $0x74] ss:$28 sps:$4 sm:$0xff]  }
 0x4d2   :  { %v2452_v62 = vpop.permute.xlu0 %2451  ;;  %4502 = vmatprep.subr.bf16.mxu0 %v6237_v45  ;;  %v6283_v61 = vld [vmem:[#allocation15 + $0x230] ss:$28 sps:$4 sm:$0xff]   ;;  %v6202_v45 = vld [vmem:[#allocation12 + $0x128] ss:$16 sps:$4 sm:$0xff]  }
 0x4d3   :  { %v2456_v63 = vmul.f32 %v2452_v62, %v2440_v60  ;;  %4503 = vmatpush1.bf16.msra.mxu0 %v6235_v46  ;;  %v6285_v60 = vld [vmem:[#allocation15 + $0x234] ss:$28 sps:$4 sm:$0xff]   ;;  %v6291_v62 = vld [vmem:[#allocation15 + $0x26c] ss:$28 sps:$4 sm:$0xff]  }
 0x4d4   :  { %4504 = vmatprep.subr.bf16.mxu0 %v6243_v47  ;;  %v6207_v46 = vld [vmem:[#allocation12 + $0x14c] ss:$16 sps:$4 sm:$0xff]   ;;  %v6205_v47 = vld [vmem:[#allocation12 + $0x148] ss:$16 sps:$4 sm:$0xff]  }
 0x4d5   :  { %v2458_v4 = vadd.f32 %v2456_v63, %v2436_v48  ;;  %v6241_v48 = vld [vmem:[#allocation15 + $0xa8] ss:$28 sps:$4 sm:$0xff]  }
 0x4d6   :  { %v6289_v63 = vld [vmem:[#allocation15 + $0x268] ss:$28 sps:$4 sm:$0xff]  }
 0x4d7   :  { %v2459_v7 = vpack.c.bf16 %v2458_v4, %v2457_v1  ;;  %4505 = vmatpush1.bf16.msra.mxu0 %v6241_v48  ;;  %v6297_v1 = vld [vmem:[#allocation15 + $0x2a4] ss:$28 sps:$4 sm:$0xff]   ;;  %v2464_v4 = vld [vmem:[#allocation10] sm:$0x3] }
 0x4d8   :  { %4506 = vmatprep.subr.bf16.mxu0 %v6249_v49  ;;  %v6210_v48 = vld [vmem:[#allocation12 + $0x16c] ss:$16 sps:$4 sm:$0xff]   ;;  %v6208_v49 = vld [vmem:[#allocation12 + $0x168] ss:$16 sps:$4 sm:$0xff]  }
 0x4d9   :  { %5252 = vmatmul.mubr.msk.bf16.vlgmr.msra.gmra.mrb[12].mxu1 %vm2496_vm1, %v2459_v7  ;;  %v6303_v7 = vld [vmem:[#allocation15 + $0x2dc] ss:$28 sps:$4 sm:$0xff]  }
 0x4da   :  { %2956 = vmatpush1.bf16.msra.mxu1 %v6127_v6  ;;  %v6295_v6 = vld [vmem:[#allocation15 + $0x2a0] ss:$28 sps:$4 sm:$0xff]  }
 0x4db   :  { %2957 = vmatprep.subr.bf16.mxu1 %v6132_v8  ;;  %4507 = vmatpush1.bf16.msra.mxu0 %v6247_v50  ;;  %v2469_v8 = vrot.slane %v2464_v4, %v7203_v3  ;;  %v6213_v50 = vld [vmem:[#allocation12 + $0x18c] ss:$16 sps:$4 sm:$0xff]  }
 0x4dc   :  { %4508 = vmatprep.subr.bf16.mxu0 %v6255_v0  ;;  %v6211_v0 = vld [vmem:[#allocation12 + $0x188] ss:$16 sps:$4 sm:$0xff]  }
 0x4de   :  { %2958 = vmatpush1.bf16.msra.mxu1 %v6130_v9  ;;  %v2473_v9 = vrot.slane %v2464_v4, %v7206_v5  ;;  %v6252_v4 = vld [vmem:[#allocation15 + $0xec] ss:$28 sps:$4 sm:$0xff]  }
 0x4df   :  { %2959 = vmatprep.subr.bf16.mxu1 %v6135_v10  ;;  %4509 = vmatpush1.bf16.msra.mxu0 %v6253_v51  ;;  %v6301_v10 = vld [vmem:[#allocation15 + $0x2d8] ss:$28 sps:$4 sm:$0xff]  }
 0x4e0   :  { %4510 = vmatprep.subr.bf16.mxu0 %v6261_v52  ;;  %v6216_v51 = vld [vmem:[#allocation12 + $0x1ac] ss:$16 sps:$4 sm:$0xff]   ;;  %v6214_v52 = vld [vmem:[#allocation12 + $0x1a8] ss:$16 sps:$4 sm:$0xff]  }
 0x4e2   :  { %2960 = vmatpush1.bf16.msra.mxu1 %v6133_v11 }
 0x4e3   :  { %2961 = vmatprep.subr.bf16.mxu1 %v6138_v12  ;;  %4511 = vmatpush1.bf16.msra.mxu0 %v6259_v53  ;;  %v6219_v53 = vld [vmem:[#allocation12 + $0x1cc] ss:$16 sps:$4 sm:$0xff]  }
 0x4e4   :  { %4512 = vmatprep.subr.bf16.mxu0 %v6267_v54  ;;  %v6217_v54 = vld [vmem:[#allocation12 + $0x1c8] ss:$16 sps:$4 sm:$0xff]  }
 0x4e6   :  { %2962 = vmatpush1.bf16.msra.mxu1 %v6136_v13 }
 0x4e7   :  { %2963 = vmatprep.subr.bf16.mxu1 %v6141_v14  ;;  %4513 = vmatpush1.bf16.msra.mxu0 %v6265_v55  ;;  %v6222_v55 = vld [vmem:[#allocation12 + $0x1ec] ss:$16 sps:$4 sm:$0xff]  }
 0x4e8   :  { %4514 = vmatprep.subr.bf16.mxu0 %v6273_v56  ;;  %v6220_v56 = vld [vmem:[#allocation12 + $0x1e8] ss:$16 sps:$4 sm:$0xff]  }
 0x4ea   :  { %2964 = vmatpush1.bf16.msra.mxu1 %v6139_v15 }
 0x4eb   :  { %2965 = vmatprep.subr.bf16.mxu1 %v6144_v16  ;;  %4515 = vmatpush1.bf16.msra.mxu0 %v6271_v57  ;;  %v6228_v57 = vld [vmem:[#allocation15 + $0xc] ss:$28 sps:$4 sm:$0xff]  }
 0x4ec   :  { %4516 = vmatprep.subr.bf16.mxu0 %v6279_v58  ;;  %v6226_v58 = vld [vmem:[#allocation15 + $0x8] ss:$28 sps:$4 sm:$0xff]  }
 0x4ee   :  { %2966 = vmatpush1.bf16.msra.mxu1 %v6142_v17 }
 0x4ef   :  { %2967 = vmatprep.subr.bf16.mxu1 %v6147_v18  ;;  %4517 = vmatpush1.bf16.msra.mxu0 %v6277_v59  ;;  %v6234_v59 = vld [vmem:[#allocation15 + $0x44] ss:$28 sps:$4 sm:$0xff]  }
 0x4f0   :  { %4518 = vmatprep.subr.bf16.mxu0 %v6285_v60  ;;  %v6232_v60 = vld [vmem:[#allocation15 + $0x40] ss:$28 sps:$4 sm:$0xff]  }
 0x4f2   :  { %2968 = vmatpush1.bf16.msra.mxu1 %v6145_v19 }
 0x4f3   :  { %2969 = vmatprep.subr.bf16.mxu1 %v6150_v20  ;;  %4519 = vmatpush1.bf16.msra.mxu0 %v6283_v61  ;;  %v6240_v61 = vld [vmem:[#allocation15 + $0x7c] ss:$28 sps:$4 sm:$0xff]  }
 0x4f4   :  { %4520 = vmatprep.subr.bf16.mxu0 %v6291_v62  ;;  %v6238_v62 = vld [vmem:[#allocation15 + $0x78] ss:$28 sps:$4 sm:$0xff]  }
 0x4f6   :  { %2970 = vmatpush1.bf16.msra.mxu1 %v6148_v21 }
 0x4f7   :  { %2971 = vmatprep.subr.bf16.mxu1 %v6153_v22  ;;  %4521 = vmatpush1.bf16.msra.mxu0 %v6289_v63  ;;  %v6246_v63 = vld [vmem:[#allocation15 + $0xb4] ss:$28 sps:$4 sm:$0xff]  }
 0x4f8   :  { %4522 = vmatprep.subr.bf16.mxu0 %v6297_v1  ;;  %v6244_v1 = vld [vmem:[#allocation15 + $0xb0] ss:$28 sps:$4 sm:$0xff]  }
 0x4fa   :  { %2972 = vmatpush1.bf16.msra.mxu1 %v6151_v23 }
 0x4fb   :  { %2973 = vmatprep.subr.bf16.mxu1 %v6156_v24  ;;  %4523 = vmatpush1.bf16.msra.mxu0 %v6295_v6  ;;  %v6250_v6 = vld [vmem:[#allocation15 + $0xe8] ss:$28 sps:$4 sm:$0xff]  }
 0x4fc   :  { %4524 = vmatprep.subr.bf16.mxu0 %v6303_v7  ;;  %v6258_v7 = vld [vmem:[#allocation15 + $0x124] ss:$28 sps:$4 sm:$0xff]  }
 0x4fe   :  { %2974 = vmatpush1.bf16.msra.mxu1 %v6154_v25  ;;  %v6175_v25 = vld [vmem:[#allocation12 + $0x8] ss:$16 sps:$4 sm:$0xff]  }
 0x4ff   :  { %2975 = vmatprep.subr.bf16.mxu1 %v6159_v26  ;;  %4525 = vmatpush1.bf16.msra.mxu0 %v6301_v10  ;;  %v6180_v26 = vld [vmem:[#allocation12 + $0x2c] ss:$16 sps:$4 sm:$0xff]   ;;  %v6309_v10 = vld [vmem:[#allocation15 + $0x314] ss:$28 sps:$4 sm:$0xff]  }
 0x500   :  { %4526 = vmatprep.subr.bf16.mxu0 %v6309_v10  ;;  %v6346_v10 = vld [vmem:[#allocation15 + $0x468] ss:$28 sps:$4 sm:$0xff]  }
 0x502   :  { %2976 = vmatpush1.bf16.msra.mxu1 %v6157_v28  ;;  %v6178_v28 = vld [vmem:[#allocation12 + $0x28] ss:$16 sps:$4 sm:$0xff]  }
 0x503   :  { %2977 = vmatprep.subr.bf16.mxu1 %v6162_v30  ;;  %v6183_v30 = vld [vmem:[#allocation12 + $0x4c] ss:$16 sps:$4 sm:$0xff]  }
 0x506   :  { %2978 = vmatpush1.bf16.msra.mxu1 %v6160_v31  ;;  %v6181_v31 = vld [vmem:[#allocation12 + $0x48] ss:$16 sps:$4 sm:$0xff]  }
 0x507   :  { %2979 = vmatprep.subr.bf16.mxu1 %v6165_v32  ;;  %v6186_v32 = vld [vmem:[#allocation12 + $0x6c] ss:$16 sps:$4 sm:$0xff]  }
 0x50a   :  { %2980 = vmatpush1.bf16.msra.mxu1 %v6163_v33  ;;  %v6184_v33 = vld [vmem:[#allocation12 + $0x68] ss:$16 sps:$4 sm:$0xff]  }
 0x50b   :  { %2981 = vmatprep.subr.bf16.mxu1 %v6168_v34  ;;  %v6189_v34 = vld [vmem:[#allocation12 + $0x8c] ss:$16 sps:$4 sm:$0xff]  }
 0x50e   :  { %2982 = vmatpush1.bf16.msra.mxu1 %v6166_v35  ;;  %v6187_v35 = vld [vmem:[#allocation12 + $0x88] ss:$16 sps:$4 sm:$0xff]  }
 0x50f   :  { %2983 = vmatprep.subr.bf16.mxu1 %v6171_v36  ;;  %v6192_v36 = vld [vmem:[#allocation12 + $0xac] ss:$16 sps:$4 sm:$0xff]  }
 0x512   :  { %2984 = vmatpush1.bf16.msra.mxu1 %v6169_v37  ;;  %v6190_v37 = vld [vmem:[#allocation12 + $0xa8] ss:$16 sps:$4 sm:$0xff]  }
 0x513   :  { %2985 = vmatprep.subr.bf16.mxu1 %v6174_v38  ;;  %v6195_v38 = vld [vmem:[#allocation12 + $0xcc] ss:$16 sps:$4 sm:$0xff]  }
 0x516   :  { %2986 = vmatpush1.bf16.msra.mxu1 %v6172_v39  ;;  %v6193_v39 = vld [vmem:[#allocation12 + $0xc8] ss:$16 sps:$4 sm:$0xff]  }
 0x517   :  { %2998 = vmatprep.subr.bf16.mxu1 %v6177_v40  ;;  %v6198_v40 = vld [vmem:[#allocation12 + $0xec] ss:$16 sps:$4 sm:$0xff]  }
 0x5ac   :  { %v2534_v11 = vpop.f32.mrb[12].mxu1 }
 0x5ad   :  { %v2535_v12 = vadd.f32 %v2534_v11, %v2469_v8  ;;  %v2536_v13 = vpop.f32.mrb[13].mxu1  ;;  %v6262_v11 = vld [vmem:[#allocation15 + $0x158] ss:$28 sps:$4 sm:$0xff]  }
 0x5ae   :  { %v2537_v14 = vadd.f32 %v2536_v13, %v2473_v9  ;;  %v2538_v15 = vpop.f32.mrb[14].mxu1  ;;  %v6270_v13 = vld [vmem:[#allocation15 + $0x194] ss:$28 sps:$4 sm:$0xff]  }
 0x5af   :  { %v2539_v16 = vadd.f32 %v2538_v15, %v2469_v8  ;;  %v2540_v17 = vpop.f32.mrb[15].mxu1  ;;  %v2543_v19 = vmax.f32 %v2535_v12, 0.0  ;;  %v6256_v8 = vld [vmem:[#allocation15 + $0x120] ss:$28 sps:$4 sm:$0xff]   ;;  %v6307_v12 = vld [vmem:[#allocation15 + $0x310] ss:$28 sps:$4 sm:$0xff]  }
 0x5b0   :  { %v2541_v18 = vadd.f32 %v2540_v17, %v2473_v9  ;;  %v2544_v21 = vmax.f32 %v2537_v14, 0.0  ;;  %v6264_v9 = vld [vmem:[#allocation15 + $0x15c] ss:$28 sps:$4 sm:$0xff]   ;;  %4527 = vmatpush1.bf16.msra.mxu0 %v6307_v12  ;;  %v6315_v14 = vld [vmem:[#allocation15 + $0x34c] ss:$28 sps:$4 sm:$0xff]  }
 0x5b1   :  { %v2545_v20 = vmax.f32 %v2539_v16, 0.0  ;;  %v6268_v15 = vld [vmem:[#allocation15 + $0x190] ss:$28 sps:$4 sm:$0xff]   ;;  %v6313_v16 = vld [vmem:[#allocation15 + $0x348] ss:$28 sps:$4 sm:$0xff]   ;;  %4528 = vmatprep.subr.bf16.mxu0 %v6315_v14 }
 0x5b2   :  { %v2546_v22 = vmax.f32 %v2541_v18, 0.0  ;;  %v6276_v17 = vld [vmem:[#allocation15 + $0x1cc] ss:$28 sps:$4 sm:$0xff]   ;;  %v6321_v18 = vld [vmem:[#allocation15 + $0x384] ss:$28 sps:$4 sm:$0xff]  }
 0x5b3   :  { %v7347_v23 = vpack.c.bf16 %v2545_v20, %v2543_v19  ;;  %v6274_v19 = vld [vmem:[#allocation15 + $0x1c8] ss:$28 sps:$4 sm:$0xff]   ;;  %v6352_v14 = vld [vmem:[#allocation15 + $0x4a0] ss:$28 sps:$4 sm:$0xff]  }
 0x5b4   :  { %v2548_v24 = vpack.c.bf16 %v2546_v22, %v2544_v21  ;;  %4529 = vmatpush1.bf16.msra.mxu0 %v6313_v16  ;;  %v6282_v20 = vld [vmem:[#allocation15 + $0x204] ss:$28 sps:$4 sm:$0xff]   ;;  %v6288_v22 = vld [vmem:[#allocation15 + $0x23c] ss:$28 sps:$4 sm:$0xff]  }
 0x5b5   :  { %4541 = vmatprep.subr.bf16.mxu0 %v6321_v18  ;;  %v6280_v21 = vld [vmem:[#allocation15 + $0x200] ss:$28 sps:$4 sm:$0xff]   ;;  %v6358_v18 = vld [vmem:[#allocation15 + $0x4d8] ss:$28 sps:$4 sm:$0xff]  }
 0x5b6   :  { %2987 = vmatprep.mubr.bf16.mxu1 %v2548_v24  ;;  %v6354_v12 = vld [vmem:[#allocation15 + $0x4a4] ss:$28 sps:$4 sm:$0xff]   ;;  %v6360_v16 = vld [vmem:[#allocation15 + $0x4dc] ss:$28 sps:$4 sm:$0xff]  }
 0x5b7   :  { %2988 = vmatmul.mubr.bf16.vlgmr.msra.gmra.mrb[16].mxu1 %v7347_v23 }
 0x5b8   :  { %2999 = vmatpush1.bf16.msra.mxu1 %v6175_v25  ;;  %3030 = vmatprep.mubr.bf16.mxu1 %v2548_v24  ;;  %v6294_v24 = vld [vmem:[#allocation15 + $0x274] ss:$28 sps:$4 sm:$0xff]  }
 0x5b9   :  { %3000 = vmatprep.subr.bf16.mxu1 %v6180_v26  ;;  %v6292_v25 = vld [vmem:[#allocation15 + $0x270] ss:$28 sps:$4 sm:$0xff]  }
 0x5ba   :  { %v6300_v26 = vld [vmem:[#allocation15 + $0x2ac] ss:$28 sps:$4 sm:$0xff]  }
 0x5bc   :  { %3001 = vmatpush1.bf16.msra.mxu1 %v6178_v28  ;;  %v6298_v28 = vld [vmem:[#allocation15 + $0x2a8] ss:$28 sps:$4 sm:$0xff]  }
 0x5bd   :  { %3002 = vmatprep.subr.bf16.mxu1 %v6183_v30  ;;  %v6306_v30 = vld [vmem:[#allocation15 + $0x2e4] ss:$28 sps:$4 sm:$0xff]  }
 0x5c0   :  { %3003 = vmatpush1.bf16.msra.mxu1 %v6181_v31  ;;  %v6304_v31 = vld [vmem:[#allocation15 + $0x2e0] ss:$28 sps:$4 sm:$0xff]  }
 0x5c1   :  { %3004 = vmatprep.subr.bf16.mxu1 %v6186_v32  ;;  %v6312_v32 = vld [vmem:[#allocation15 + $0x31c] ss:$28 sps:$4 sm:$0xff]  }
 0x5c4   :  { %3005 = vmatpush1.bf16.msra.mxu1 %v6184_v33  ;;  %v6310_v33 = vld [vmem:[#allocation15 + $0x318] ss:$28 sps:$4 sm:$0xff]  }
 0x5c5   :  { %3006 = vmatprep.subr.bf16.mxu1 %v6189_v34  ;;  %v6318_v34 = vld [vmem:[#allocation15 + $0x354] ss:$28 sps:$4 sm:$0xff]  }
 0x5c8   :  { %3007 = vmatpush1.bf16.msra.mxu1 %v6187_v35  ;;  %v6316_v35 = vld [vmem:[#allocation15 + $0x350] ss:$28 sps:$4 sm:$0xff]  }
 0x5c9   :  { %3008 = vmatprep.subr.bf16.mxu1 %v6192_v36  ;;  %v6324_v36 = vld [vmem:[#allocation15 + $0x38c] ss:$28 sps:$4 sm:$0xff]  }
 0x5cc   :  { %3009 = vmatpush1.bf16.msra.mxu1 %v6190_v37  ;;  %v7351_v37 = vld [vmem:[#allocation13] sm:$0xf] }
 0x5cd   :  { %3010 = vmatprep.subr.bf16.mxu1 %v6195_v38  ;;  %v2618_v38 = vrot.slane %v7351_v37, %v7203_v3 }
 0x5d0   :  { %3011 = vmatpush1.bf16.msra.mxu1 %v6193_v39  ;;  %v2622_v39 = vrot.slane %v7351_v37, %v7206_v5 }
 0x5d1   :  { %3012 = vmatprep.subr.bf16.mxu1 %v6198_v40 }
 0x5d4   :  { %3013 = vmatpush1.bf16.msra.mxu1 %v6196_v41 }
 0x5d5   :  { %3014 = vmatprep.subr.bf16.mxu1 %v6201_v42 }
 0x5d8   :  { %3015 = vmatpush1.bf16.msra.mxu1 %v6199_v43 }
 0x5d9   :  { %3016 = vmatprep.subr.bf16.mxu1 %v6204_v44 }
 0x5dc   :  { %3017 = vmatpush1.bf16.msra.mxu1 %v6202_v45 }
 0x5dd   :  { %3018 = vmatprep.subr.bf16.mxu1 %v6207_v46 }
 0x5e0   :  { %3019 = vmatpush1.bf16.msra.mxu1 %v6205_v47 }
 0x5e1   :  { %3020 = vmatprep.subr.bf16.mxu1 %v6210_v48 }
 0x5e4   :  { %3021 = vmatpush1.bf16.msra.mxu1 %v6208_v49 }
 0x5e5   :  { %3022 = vmatprep.subr.bf16.mxu1 %v6213_v50 }
 0x5e8   :  { %3023 = vmatpush1.bf16.msra.mxu1 %v6211_v0 }
 0x5e9   :  { %3024 = vmatprep.subr.bf16.mxu1 %v6216_v51 }
 0x5ec   :  { %3025 = vmatpush1.bf16.msra.mxu1 %v6214_v52 }
 0x5ed   :  { %3026 = vmatprep.subr.bf16.mxu1 %v6219_v53  ;;  %v6319_v53 = vld [vmem:[#allocation15 + $0x380] ss:$28 sps:$4 sm:$0xff]  }
 0x5f0   :  { %3027 = vmatpush1.bf16.msra.mxu1 %v6217_v54  ;;  %v6322_v54 = vld [vmem:[#allocation15 + $0x388] ss:$28 sps:$4 sm:$0xff]  }
 0x5f1   :  { %3028 = vmatprep.subr.bf16.mxu1 %v6222_v55  ;;  %v6327_v55 = vld [vmem:[#allocation15 + $0x3bc] ss:$28 sps:$4 sm:$0xff]  }
 0x5f4   :  { %3029 = vmatpush1.bf16.msra.mxu1 %v6220_v56  ;;  %v6330_v56 = vld [vmem:[#allocation15 + $0x3c4] ss:$28 sps:$4 sm:$0xff]  }
 0x5f5   :  { %4584 = vmatprep.subr.bf16.mxu1 %v6228_v57  ;;  %v6325_v57 = vld [vmem:[#allocation15 + $0x3b8] ss:$28 sps:$4 sm:$0xff]  }
 0x5f7   :  { %3031 = vmatmul.mubr.bf16.vlgmr.msra.gmra.mrb[20].mxu1 %v7347_v23  ;;  %v6286_v23 = vld [vmem:[#allocation15 + $0x238] ss:$28 sps:$4 sm:$0xff]  }
 0x5f8   :  { %4585 = vmatpush1.bf16.msra.mxu1 %v6226_v58  ;;  %v6328_v58 = vld [vmem:[#allocation15 + $0x3c0] ss:$28 sps:$4 sm:$0xff]  }
 0x5f9   :  { %4586 = vmatprep.subr.bf16.mxu1 %v6234_v59  ;;  %v6333_v59 = vld [vmem:[#allocation15 + $0x3f4] ss:$28 sps:$4 sm:$0xff]  }
 0x5fc   :  { %4587 = vmatpush1.bf16.msra.mxu1 %v6232_v60  ;;  %v6336_v60 = vld [vmem:[#allocation15 + $0x3fc] ss:$28 sps:$4 sm:$0xff]  }
 0x5fd   :  { %4588 = vmatprep.subr.bf16.mxu1 %v6240_v61  ;;  %v6331_v61 = vld [vmem:[#allocation15 + $0x3f0] ss:$28 sps:$4 sm:$0xff]  }
 0x600   :  { %4589 = vmatpush1.bf16.msra.mxu1 %v6238_v62  ;;  %v6334_v62 = vld [vmem:[#allocation15 + $0x3f8] ss:$28 sps:$4 sm:$0xff]  }
 0x601   :  { %4590 = vmatprep.subr.bf16.mxu1 %v6246_v63  ;;  %v6339_v63 = vld [vmem:[#allocation15 + $0x42c] ss:$28 sps:$4 sm:$0xff]  }
 0x604   :  { %4591 = vmatpush1.bf16.msra.mxu1 %v6244_v1  ;;  %v6342_v1 = vld [vmem:[#allocation15 + $0x434] ss:$28 sps:$4 sm:$0xff]  }
 0x605   :  { %4592 = vmatprep.subr.bf16.mxu1 %v6252_v4  ;;  %v6337_v4 = vld [vmem:[#allocation15 + $0x428] ss:$28 sps:$4 sm:$0xff]  }
 0x608   :  { %4593 = vmatpush1.bf16.msra.mxu1 %v6250_v6  ;;  %v6340_v6 = vld [vmem:[#allocation15 + $0x430] ss:$28 sps:$4 sm:$0xff]  }
 0x609   :  { %4594 = vmatprep.subr.bf16.mxu1 %v6258_v7  ;;  %v6345_v7 = vld [vmem:[#allocation15 + $0x464] ss:$28 sps:$4 sm:$0xff]  }
 0x60c   :  { %4595 = vmatpush1.bf16.msra.mxu1 %v6256_v8  ;;  %v6348_v8 = vld [vmem:[#allocation15 + $0x46c] ss:$28 sps:$4 sm:$0xff]  }
 0x60d   :  { %4596 = vmatprep.subr.bf16.mxu1 %v6264_v9  ;;  %v6343_v9 = vld [vmem:[#allocation15 + $0x460] ss:$28 sps:$4 sm:$0xff]  }
 0x610   :  { %4597 = vmatpush1.bf16.msra.mxu1 %v6262_v11  ;;  %v6351_v11 = vld [vmem:[#allocation15 + $0x49c] ss:$28 sps:$4 sm:$0xff]  }
 0x611   :  { %4598 = vmatprep.subr.bf16.mxu1 %v6270_v13  ;;  %v6349_v13 = vld [vmem:[#allocation15 + $0x498] ss:$28 sps:$4 sm:$0xff]  }
 0x614   :  { %4599 = vmatpush1.bf16.msra.mxu1 %v6268_v15  ;;  %v6357_v15 = vld [vmem:[#allocation15 + $0x4d4] ss:$28 sps:$4 sm:$0xff]  }
 0x615   :  { %4600 = vmatprep.subr.bf16.mxu1 %v6276_v17  ;;  %v6355_v17 = vld [vmem:[#allocation15 + $0x4d0] ss:$28 sps:$4 sm:$0xff]  }
 0x618   :  { %4601 = vmatpush1.bf16.msra.mxu1 %v6274_v19  ;;  %v6363_v19 = vld [vmem:[#allocation15 + $0x50c] ss:$28 sps:$4 sm:$0xff]  }
 0x619   :  { %4602 = vmatprep.subr.bf16.mxu1 %v6282_v20  ;;  %v6366_v20 = vld [vmem:[#allocation15 + $0x514] ss:$28 sps:$4 sm:$0xff]  }
 0x61c   :  { %4603 = vmatpush1.bf16.msra.mxu1 %v6280_v21  ;;  %v6361_v21 = vld [vmem:[#allocation15 + $0x508] ss:$28 sps:$4 sm:$0xff]  }
 0x61d   :  { %4604 = vmatprep.subr.bf16.mxu1 %v6288_v22  ;;  %v6364_v22 = vld [vmem:[#allocation15 + $0x510] ss:$28 sps:$4 sm:$0xff]  }
 0x620   :  { %4605 = vmatpush1.bf16.msra.mxu1 %v6286_v23  ;;  %v6369_v23 = vld [vmem:[#allocation15 + $0x544] ss:$28 sps:$4 sm:$0xff]  }
 0x621   :  { %4606 = vmatprep.subr.bf16.mxu1 %v6294_v24  ;;  %v6372_v24 = vld [vmem:[#allocation15 + $0x54c] ss:$28 sps:$4 sm:$0xff]  }
 0x624   :  { %4607 = vmatpush1.bf16.msra.mxu1 %v6292_v25  ;;  %v6367_v25 = vld [vmem:[#allocation15 + $0x540] ss:$28 sps:$4 sm:$0xff]  }
 0x625   :  { %4608 = vmatprep.subr.bf16.mxu1 %v6300_v26  ;;  %v6370_v26 = vld [vmem:[#allocation15 + $0x548] ss:$28 sps:$4 sm:$0xff]  }
 0x628   :  { %4609 = vmatpush1.bf16.msra.mxu1 %v6298_v28  ;;  %v6375_v28 = vld [vmem:[#allocation15 + $0x57c] ss:$28 sps:$4 sm:$0xff]  }
 0x629   :  { %4610 = vmatprep.subr.bf16.mxu1 %v6306_v30  ;;  %v6378_v30 = vld [vmem:[#allocation15 + $0x584] ss:$28 sps:$4 sm:$0xff]  }
 0x62c   :  { %4611 = vmatpush1.bf16.msra.mxu1 %v6304_v31  ;;  %v6373_v31 = vld [vmem:[#allocation15 + $0x578] ss:$28 sps:$4 sm:$0xff]  }
 0x62d   :  { %4612 = vmatprep.subr.bf16.mxu1 %v6312_v32  ;;  %v6376_v32 = vld [vmem:[#allocation15 + $0x580] ss:$28 sps:$4 sm:$0xff]  }
 0x630   :  { %4613 = vmatpush1.bf16.msra.mxu1 %v6310_v33  ;;  %v6381_v33 = vld [vmem:[#allocation15 + $0x5b4] ss:$28 sps:$4 sm:$0xff]  }
 0x631   :  { %4614 = vmatprep.subr.bf16.mxu1 %v6318_v34  ;;  %v6384_v34 = vld [vmem:[#allocation15 + $0x5bc] ss:$28 sps:$4 sm:$0xff]  }
 0x634   :  { %4615 = vmatpush1.bf16.msra.mxu1 %v6316_v35  ;;  %v6379_v35 = vld [vmem:[#allocation15 + $0x5b0] ss:$28 sps:$4 sm:$0xff]  }
 0x635   :  { %4627 = vmatprep.subr.bf16.mxu1 %v6324_v36  ;;  %v6382_v36 = vld [vmem:[#allocation15 + $0x5b8] ss:$28 sps:$4 sm:$0xff]  }
 0x68a   :  { %v2989_v40 = vpop.f32.mrb[16].mxu1 }
 0x68b   :  { %v2990_v41 = vadd.f32 %v2989_v40, %v2618_v38  ;;  %v2991_v42 = vpop.f32.mrb[17].mxu1  ;;  %v6385_v40 = vld [vmem:[#allocation15 + $0x5e8] ss:$28 sps:$4 sm:$0xff]  }
 0x68c   :  { %v2992_v43 = vadd.f32 %v2991_v42, %v2622_v39  ;;  %v2993_v44 = vpop.f32.mrb[18].mxu1  ;;  %v6393_v42 = vld [vmem:[#allocation15 + $0x624] ss:$28 sps:$4 sm:$0xff]  }
 0x68d   :  { %v2994_v45 = vadd.f32 %v2993_v44, %v2618_v38  ;;  %v2995_v46 = vpop.f32.mrb[19].mxu1  ;;  %v3041_v48 = vmax.f32 %v2990_v41, 0.0  ;;  %v6387_v38 = vld [vmem:[#allocation15 + $0x5ec] ss:$28 sps:$4 sm:$0xff]   ;;  %v6391_v44 = vld [vmem:[#allocation15 + $0x620] ss:$28 sps:$4 sm:$0xff]  }
 0x68e   :  { %v2996_v47 = vadd.f32 %v2995_v46, %v2622_v39  ;;  %v3042_v50 = vmax.f32 %v2992_v43, 0.0  ;;  %v6390_v39 = vld [vmem:[#allocation15 + $0x5f4] ss:$28 sps:$4 sm:$0xff]   ;;  %v6396_v43 = vld [vmem:[#allocation15 + $0x62c] ss:$28 sps:$4 sm:$0xff]  }
 0x68f   :  { %v3045_v49 = vmax.f32 %v2994_v45, 0.0  ;;  %v6388_v41 = vld [vmem:[#allocation15 + $0x5f0] ss:$28 sps:$4 sm:$0xff]   ;;  %v6394_v45 = vld [vmem:[#allocation15 + $0x628] ss:$28 sps:$4 sm:$0xff]  }
 0x690   :  { %v3046_v0 = vmax.f32 %v2996_v47, 0.0  ;;  %v6399_v46 = vld [vmem:[#allocation15 + $0x65c] ss:$28 sps:$4 sm:$0xff]   ;;  %v6402_v47 = vld [vmem:[#allocation15 + $0x664] ss:$28 sps:$4 sm:$0xff]  }
 0x691   :  { %v7357_v51 = vpack.c.bf16 %v3045_v49, %v3041_v48  ;;  %v6397_v48 = vld [vmem:[#allocation15 + $0x658] ss:$28 sps:$4 sm:$0xff]   ;;  %v6400_v49 = vld [vmem:[#allocation15 + $0x660] ss:$28 sps:$4 sm:$0xff]  }
 0x692   :  { %v7359_v52 = vpack.c.bf16 %v3046_v0, %v3042_v50  ;;  %v2626_v50 = vrot.slane %v7351_v37, %v7218_v27  ;;  %v6405_v0 = vld [vmem:[#allocation15 + $0x694] ss:$28 sps:$4 sm:$0xff]  }
 0x694   :  { %4530 = vmatprep.mubr.bf16.mxu0 %v7359_v52  ;;  %4616 = vmatprep.mubr.bf16.mxu1 %v7359_v52 }
 0x695   :  { %4531 = vmatmul.mubr.bf16.vlgmr.msra.gmra.mrb[8].mxu0 %v7357_v51  ;;  %4617 = vmatmul.mubr.bf16.vlgmr.msra.gmra.mrb[24].mxu1 %v7357_v51 }
 0x696   :  { %4542 = vmatpush1.bf16.msra.mxu0 %v6319_v53  ;;  %4628 = vmatpush1.bf16.msra.mxu1 %v6322_v54  ;;  %v6408_v53 = vld [vmem:[#allocation15 + $0x69c] ss:$28 sps:$4 sm:$0xff]   ;;  %v2630_v54 = vrot.slane %v7351_v37, %v7224_v29  ;;  %v6412_v37 = vld [vmem:[#allocation15 + $0x6d0] ss:$28 sps:$4 sm:$0xff]  }
 0x697   :  { %4543 = vmatprep.subr.bf16.mxu0 %v6327_v55  ;;  %4629 = vmatprep.subr.bf16.mxu1 %v6330_v56  ;;  %v6403_v56 = vld [vmem:[#allocation15 + $0x690] ss:$28 sps:$4 sm:$0xff]  }
 0x69a   :  { %4544 = vmatpush1.bf16.msra.mxu0 %v6325_v57  ;;  %4630 = vmatpush1.bf16.msra.mxu1 %v6328_v58  ;;  %v6406_v57 = vld [vmem:[#allocation15 + $0x698] ss:$28 sps:$4 sm:$0xff]  }
 0x69b   :  { %4545 = vmatprep.subr.bf16.mxu0 %v6333_v59  ;;  %4631 = vmatprep.subr.bf16.mxu1 %v6336_v60  ;;  %v6411_v60 = vld [vmem:[#allocation15 + $0x6cc] ss:$28 sps:$4 sm:$0xff]  }
 0x69e   :  { %4546 = vmatpush1.bf16.msra.mxu0 %v6331_v61  ;;  %4632 = vmatpush1.bf16.msra.mxu1 %v6334_v62  ;;  %v6414_v61 = vld [vmem:[#allocation15 + $0x6d4] ss:$28 sps:$4 sm:$0xff]  }
 0x69f   :  { %4547 = vmatprep.subr.bf16.mxu0 %v6339_v63  ;;  %4633 = vmatprep.subr.bf16.mxu1 %v6342_v1 }
 0x6a2   :  { %4548 = vmatpush1.bf16.msra.mxu0 %v6337_v4  ;;  %4634 = vmatpush1.bf16.msra.mxu1 %v6340_v6 }
 0x6a3   :  { %4549 = vmatprep.subr.bf16.mxu0 %v6345_v7  ;;  %4635 = vmatprep.subr.bf16.mxu1 %v6348_v8  ;;  %v6409_v7 = vld [vmem:[#allocation15 + $0x6c8] ss:$28 sps:$4 sm:$0xff]  }
 0x6a6   :  { %4550 = vmatpush1.bf16.msra.mxu0 %v6343_v9  ;;  %4636 = vmatpush1.bf16.msra.mxu1 %v6346_v10  ;;  %v6417_v10 = vld [vmem:[#allocation15 + $0x14] ss:$28 sps:$4 sm:$0xff]  }
 0x6a7   :  { %4551 = vmatprep.subr.bf16.mxu0 %v6351_v11  ;;  %4637 = vmatprep.subr.bf16.mxu1 %v6354_v12  ;;  %v6418_v11 = vld [vmem:[#allocation15 + $0x1d8] ss:$28 sps:$4 sm:$0xff]  }
 0x6aa   :  { %4552 = vmatpush1.bf16.msra.mxu0 %v6349_v13  ;;  %4638 = vmatpush1.bf16.msra.mxu1 %v6352_v14 }
 0x6ab   :  { %4553 = vmatprep.subr.bf16.mxu0 %v6357_v15  ;;  %4639 = vmatprep.subr.bf16.mxu1 %v6360_v16  ;;  %v6415_v16 = vld [vmem:[#allocation15 + $0x10] ss:$28 sps:$4 sm:$0xff]  }
 0x6ae   :  { %4554 = vmatpush1.bf16.msra.mxu0 %v6355_v17  ;;  %4640 = vmatpush1.bf16.msra.mxu1 %v6358_v18  ;;  %v6419_v17 = vld [vmem:[#allocation15 + $0x18] ss:$28 sps:$4 sm:$0xff]   ;;  %v6422_v18 = vld [vmem:[#allocation15 + $0x4c] ss:$28 sps:$4 sm:$0xff]  }
 0x6af   :  { %4555 = vmatprep.subr.bf16.mxu0 %v6363_v19  ;;  %4641 = vmatprep.subr.bf16.mxu1 %v6366_v20  ;;  %v6423_v19 = vld [vmem:[#allocation15 + $0x210] ss:$28 sps:$4 sm:$0xff]   ;;  %v6420_v20 = vld [vmem:[#allocation15 + $0x48] ss:$28 sps:$4 sm:$0xff]  }
 0x6b2   :  { %4556 = vmatpush1.bf16.msra.mxu0 %v6361_v21  ;;  %4642 = vmatpush1.bf16.msra.mxu1 %v6364_v22  ;;  %v6424_v21 = vld [vmem:[#allocation15 + $0x50] ss:$28 sps:$4 sm:$0xff]   ;;  %v6427_v22 = vld [vmem:[#allocation15 + $0x84] ss:$28 sps:$4 sm:$0xff]  }
 0x6b3   :  { %4557 = vmatprep.subr.bf16.mxu0 %v6369_v23  ;;  %4643 = vmatprep.subr.bf16.mxu1 %v6372_v24  ;;  %v6428_v23 = vld [vmem:[#allocation15 + $0x248] ss:$28 sps:$4 sm:$0xff]   ;;  %v6425_v24 = vld [vmem:[#allocation15 + $0x80] ss:$28 sps:$4 sm:$0xff]  }
 0x6b6   :  { %4558 = vmatpush1.bf16.msra.mxu0 %v6367_v25  ;;  %4644 = vmatpush1.bf16.msra.mxu1 %v6370_v26  ;;  %v6429_v25 = vld [vmem:[#allocation15 + $0x88] ss:$28 sps:$4 sm:$0xff]   ;;  %v6432_v26 = vld [vmem:[#allocation15 + $0xbc] ss:$28 sps:$4 sm:$0xff]  }
 0x6b7   :  { %4559 = vmatprep.subr.bf16.mxu0 %v6375_v28  ;;  %4645 = vmatprep.subr.bf16.mxu1 %v6378_v30  ;;  %v6433_v28 = vld [vmem:[#allocation15 + $0x280] ss:$28 sps:$4 sm:$0xff]   ;;  %v6430_v30 = vld [vmem:[#allocation15 + $0xb8] ss:$28 sps:$4 sm:$0xff]  }
 0x6ba   :  { %4560 = vmatpush1.bf16.msra.mxu0 %v6373_v31  ;;  %4646 = vmatpush1.bf16.msra.mxu1 %v6376_v32  ;;  %v6434_v31 = vld [vmem:[#allocation15 + $0xc0] ss:$28 sps:$4 sm:$0xff]   ;;  %v6437_v32 = vld [vmem:[#allocation15 + $0xf4] ss:$28 sps:$4 sm:$0xff]  }
 0x6bb   :  { %4561 = vmatprep.subr.bf16.mxu0 %v6381_v33  ;;  %4647 = vmatprep.subr.bf16.mxu1 %v6384_v34  ;;  %v6435_v33 = vld [vmem:[#allocation15 + $0xf0] ss:$28 sps:$4 sm:$0xff]   ;;  %v6439_v34 = vld [vmem:[#allocation15 + $0xf8] ss:$28 sps:$4 sm:$0xff]  }
 0x6be   :  { %4562 = vmatpush1.bf16.msra.mxu0 %v6379_v35  ;;  %4648 = vmatpush1.bf16.msra.mxu1 %v6382_v36  ;;  %v6442_v35 = vld [vmem:[#allocation15 + $0x12c] ss:$28 sps:$4 sm:$0xff]  }
 0x6bf   :  { %4563 = vmatprep.subr.bf16.mxu0 %v6387_v38  ;;  %4649 = vmatprep.subr.bf16.mxu1 %v6390_v39  ;;  %v6443_v36 = vld [vmem:[#allocation15 + $0x2f0] ss:$28 sps:$4 sm:$0xff]   ;;  %v6440_v38 = vld [vmem:[#allocation15 + $0x128] ss:$28 sps:$4 sm:$0xff]  }
 0x6c0   :  { %v6444_v39 = vld [vmem:[#allocation15 + $0x130] ss:$28 sps:$4 sm:$0xff]  }
 0x6c2   :  { %4564 = vmatpush1.bf16.msra.mxu0 %v6385_v40  ;;  %4650 = vmatpush1.bf16.msra.mxu1 %v6388_v41  ;;  %v6447_v40 = vld [vmem:[#allocation15 + $0x164] ss:$28 sps:$4 sm:$0xff]  }
 0x6c3   :  { %4565 = vmatprep.subr.bf16.mxu0 %v6393_v42  ;;  %4651 = vmatprep.subr.bf16.mxu1 %v6396_v43  ;;  %v6448_v41 = vld [vmem:[#allocation15 + $0x328] ss:$28 sps:$4 sm:$0xff]   ;;  %v6445_v42 = vld [vmem:[#allocation15 + $0x160] ss:$28 sps:$4 sm:$0xff]  }
 0x6c4   :  { %v6449_v43 = vld [vmem:[#allocation15 + $0x168] ss:$28 sps:$4 sm:$0xff]  }
 0x6c6   :  { %4566 = vmatpush1.bf16.msra.mxu0 %v6391_v44  ;;  %4652 = vmatpush1.bf16.msra.mxu1 %v6394_v45  ;;  %v6452_v44 = vld [vmem:[#allocation15 + $0x19c] ss:$28 sps:$4 sm:$0xff]  }
 0x6c7   :  { %4567 = vmatprep.subr.bf16.mxu0 %v6399_v46  ;;  %4653 = vmatprep.subr.bf16.mxu1 %v6402_v47  ;;  %v6453_v45 = vld [vmem:[#allocation15 + $0x360] ss:$28 sps:$4 sm:$0xff]   ;;  %v6450_v46 = vld [vmem:[#allocation15 + $0x198] ss:$28 sps:$4 sm:$0xff]  }
 0x6c8   :  { %v6454_v47 = vld [vmem:[#allocation15 + $0x1a0] ss:$28 sps:$4 sm:$0xff]  }
 0x6ca   :  { %v3032_v55 = vpop.f32.mrb[20].mxu1  ;;  %4568 = vmatpush1.bf16.msra.mxu0 %v6397_v48  ;;  %4654 = vmatpush1.bf16.msra.mxu1 %v6400_v49  ;;  %v6457_v48 = vld [vmem:[#allocation15 + $0x1d4] ss:$28 sps:$4 sm:$0xff]  }
 0x6cb   :  { %v3033_v58 = vadd.f32 %v3032_v55, %v2626_v50  ;;  %v3034_v59 = vpop.f32.mrb[21].mxu1  ;;  %4569 = vmatprep.subr.bf16.mxu0 %v6405_v0  ;;  %4655 = vmatprep.subr.bf16.mxu1 %v6408_v53  ;;  %v6458_v49 = vld [vmem:[#allocation15 + $0x558] ss:$28 sps:$4 sm:$0xff]   ;;  %v6462_v53 = vld [vmem:[#allocation15 + $0x20c] ss:$28 sps:$4 sm:$0xff]  }
 0x6cc   :  { %v3035_v62 = vadd.f32 %v3034_v59, %v2630_v54  ;;  %v3036_v63 = vpop.f32.mrb[22].mxu1  ;;  %v6459_v0 = vld [vmem:[#allocation15 + $0x398] ss:$28 sps:$4 sm:$0xff]   ;;  %v6460_v55 = vld [vmem:[#allocation15 + $0x208] ss:$28 sps:$4 sm:$0xff]  }
 0x6cd   :  { %v3037_v1 = vadd.f32 %v3036_v63, %v2626_v50  ;;  %v3038_v4 = vpop.f32.mrb[23].mxu1  ;;  %v3043_v8 = vmax.f32 %v3033_v58, 0.0  ;;  %v6455_v50 = vld [vmem:[#allocation15 + $0x1d0] ss:$28 sps:$4 sm:$0xff]   ;;  %v6468_v58 = vld [vmem:[#allocation15 + $0x5c8] ss:$28 sps:$4 sm:$0xff]  }
 0x6ce   :  { %v3039_v6 = vadd.f32 %v3038_v4, %v2630_v54  ;;  %4570 = vmatpush1.bf16.msra.mxu0 %v6403_v56  ;;  %4656 = vmatpush1.bf16.msra.mxu1 %v6406_v57  ;;  %v3044_v12 = vmax.f32 %v3035_v62, 0.0  ;;  %v6463_v54 = vld [vmem:[#allocation15 + $0x590] ss:$28 sps:$4 sm:$0xff]   ;;  %v6467_v57 = vld [vmem:[#allocation15 + $0x244] ss:$28 sps:$4 sm:$0xff]  }
 0x6cf   :  { %v3047_v9 = vmax.f32 %v3037_v1, 0.0  ;;  %4571 = vmatprep.subr.bf16.mxu0 %v6411_v60  ;;  %4657 = vmatprep.subr.bf16.mxu1 %v6414_v61  ;;  %v6464_v56 = vld [vmem:[#allocation15 + $0x3d0] ss:$28 sps:$4 sm:$0xff]   ;;  %v6465_v59 = vld [vmem:[#allocation15 + $0x240] ss:$28 sps:$4 sm:$0xff]  }
 0x6d0   :  { %v3048_v13 = vmax.f32 %v3039_v6, 0.0  ;;  %v6469_v60 = vld [vmem:[#allocation15 + $0x408] ss:$28 sps:$4 sm:$0xff]   ;;  %v6472_v61 = vld [vmem:[#allocation15 + $0x27c] ss:$28 sps:$4 sm:$0xff]  }
 0x6d1   :  { %v7369_v14 = vpack.c.bf16 %v3047_v9, %v3043_v8  ;;  %v6473_v62 = vld [vmem:[#allocation15 + $0x600] ss:$28 sps:$4 sm:$0xff]   ;;  %v6470_v63 = vld [vmem:[#allocation15 + $0x278] ss:$28 sps:$4 sm:$0xff]   ;;  %v6482_v8 = vld [vmem:[#allocation15 + $0x2ec] ss:$28 sps:$4 sm:$0xff]  }
 0x6d2   :  { %v7371_v15 = vpack.c.bf16 %v3048_v13, %v3044_v12  ;;  %4572 = vmatpush1.bf16.msra.mxu0 %v6409_v7  ;;  %4658 = vmatpush1.bf16.msra.mxu1 %v6412_v37  ;;  %v6474_v1 = vld [vmem:[#allocation15 + $0x440] ss:$28 sps:$4 sm:$0xff]   ;;  %v6477_v4 = vld [vmem:[#allocation15 + $0x2b4] ss:$28 sps:$4 sm:$0xff]   ;;  %v6488_v13 = vld [vmem:[#allocation15 + $0x6a8] ss:$28 sps:$4 sm:$0xff]  }
 0x6d3   :  { %4670 = vmatprep.subr.bf16.mxu0 %v6417_v10  ;;  %5579 = vmatprep.subr.bf16.mxu1 %v6418_v11  ;;  %v6478_v6 = vld [vmem:[#allocation15 + $0x638] ss:$28 sps:$4 sm:$0xff]   ;;  %v6475_v7 = vld [vmem:[#allocation15 + $0x2b0] ss:$28 sps:$4 sm:$0xff]   ;;  %v6480_v10 = vld [vmem:[#allocation15 + $0x2e8] ss:$28 sps:$4 sm:$0xff]  }
 0x6d4   :  { %4573 = vmatprep.mubr.bf16.mxu0 %v7371_v15  ;;  %4659 = vmatprep.mubr.bf16.mxu1 %v7371_v15  ;;  %v6479_v37 = vld [vmem:[#allocation15 + $0x478] ss:$28 sps:$4 sm:$0xff]   ;;  %v6483_v9 = vld [vmem:[#allocation15 + $0x670] ss:$28 sps:$4 sm:$0xff]   ;;  %v6487_v12 = vld [vmem:[#allocation15 + $0x324] ss:$28 sps:$4 sm:$0xff]  }
 0x6d5   :  { %4574 = vmatmul.mubr.bf16.vlgmr.msra.gmra.mrb[8].mxu0 %v7369_v14  ;;  %4660 = vmatmul.mubr.bf16.vlgmr.msra.gmra.mrb[24].mxu1 %v7369_v14  ;;  %v6484_v11 = vld [vmem:[#allocation15 + $0x4b0] ss:$28 sps:$4 sm:$0xff]  }
 0x6d6   :  { %4671 = vmatpush1.bf16.msra.mxu0 %v6415_v16  ;;  %4702 = vmatprep.mubr.bf16.mxu0 %v7359_v52  ;;  %v6485_v16 = vld [vmem:[#allocation15 + $0x320] ss:$28 sps:$4 sm:$0xff]  }
 0x6d7   :  { %5580 = vmatpush3.bf16.msra.mxu1 %v6419_v17  ;;  %4788 = vmatprep.mubr.bf16.mxu1 %v7359_v52  ;;  %v6438_v52 = vld [vmem:[#allocation15 + $0x2b8] ss:$28 sps:$4 sm:$0xff]   ;;  %v6489_v17 = vld [vmem:[#allocation15 + $0x4e8] ss:$28 sps:$4 sm:$0xff]  }
 0x6d8   :  { %4672 = vmatprep.subr.bf16.mxu0 %v6422_v18  ;;  %5581 = vmatprep.subr.bf16.mxu1 %v6423_v19  ;;  %v6492_v18 = vld [vmem:[#allocation15 + $0x35c] ss:$28 sps:$4 sm:$0xff]  }
 0x6d9   :  { %v6493_v19 = vld [vmem:[#allocation15 + $0x6e0] ss:$28 sps:$4 sm:$0xff]  }
 0x6da   :  { %4673 = vmatpush1.bf16.msra.mxu0 %v6420_v20  ;;  %v6490_v20 = vld [vmem:[#allocation15 + $0x358] ss:$28 sps:$4 sm:$0xff]  }
 0x6db   :  { %5582 = vmatpush3.bf16.msra.mxu1 %v6424_v21  ;;  %4674 = vmatprep.subr.bf16.mxu0 %v6427_v22  ;;  %v6494_v21 = vld [vmem:[#allocation15 + $0x520] ss:$28 sps:$4 sm:$0xff]   ;;  %v6497_v22 = vld [vmem:[#allocation15 + $0x394] ss:$28 sps:$4 sm:$0xff]  }
 0x6dc   :  { %5583 = vmatprep.subr.bf16.mxu1 %v6428_v23  ;;  %v6495_v23 = vld [vmem:[#allocation15 + $0x390] ss:$28 sps:$4 sm:$0xff]  }
 0x6de   :  { %4675 = vmatpush1.bf16.msra.mxu0 %v6425_v24  ;;  %v6500_v24 = vld [vmem:[#allocation15 + $0x3cc] ss:$28 sps:$4 sm:$0xff]  }
 0x6df   :  { %5584 = vmatpush3.bf16.msra.mxu1 %v6429_v25  ;;  %4676 = vmatprep.subr.bf16.mxu0 %v6432_v26  ;;  %v6498_v25 = vld [vmem:[#allocation15 + $0x3c8] ss:$28 sps:$4 sm:$0xff]  }
 0x6e0   :  { %5585 = vmatprep.subr.bf16.mxu1 %v6433_v28  ;;  %v6503_v26 = vld [vmem:[#allocation15 + $0x404] ss:$28 sps:$4 sm:$0xff]  }
 0x6e1   :  { %v6501_v28 = vld [vmem:[#allocation15 + $0x400] ss:$28 sps:$4 sm:$0xff]  }
 0x6e2   :  { %4677 = vmatpush1.bf16.msra.mxu0 %v6430_v30  ;;  %v6506_v30 = vld [vmem:[#allocation15 + $0x43c] ss:$28 sps:$4 sm:$0xff]  }
 0x6e3   :  { %5586 = vmatpush3.bf16.msra.mxu1 %v6434_v31  ;;  %4678 = vmatprep.subr.bf16.mxu0 %v6437_v32  ;;  %v6504_v31 = vld [vmem:[#allocation15 + $0x438] ss:$28 sps:$4 sm:$0xff]  }
 0x6e4   :  { %5587 = vmatprep.subr.bf16.mxu1 %v6438_v52  ;;  %v6509_v32 = vld [vmem:[#allocation15 + $0x474] ss:$28 sps:$4 sm:$0xff]  }
 0x6e5   :  { %v6507_v52 = vld [vmem:[#allocation15 + $0x470] ss:$28 sps:$4 sm:$0xff]  }
 0x6e6   :  { %4679 = vmatpush1.bf16.msra.mxu0 %v6435_v33  ;;  %v6510_v33 = vld [vmem:[#allocation15 + $0x4a8] ss:$28 sps:$4 sm:$0xff]  }
 0x6e7   :  { %5588 = vmatpush3.bf16.msra.mxu1 %v6439_v34  ;;  %4680 = vmatprep.subr.bf16.mxu0 %v6442_v35  ;;  %v6515_v34 = vld [vmem:[#allocation15 + $0x4e4] ss:$28 sps:$4 sm:$0xff]   ;;  %v6518_v35 = vld [vmem:[#allocation15 + $0x51c] ss:$28 sps:$4 sm:$0xff]  }
 0x6e8   :  { %5589 = vmatprep.subr.bf16.mxu1 %v6443_v36  ;;  %v6516_v36 = vld [vmem:[#allocation15 + $0x518] ss:$28 sps:$4 sm:$0xff]  }
 0x6ea   :  { %4681 = vmatpush1.bf16.msra.mxu0 %v6440_v38  ;;  %v6521_v38 = vld [vmem:[#allocation15 + $0x554] ss:$28 sps:$4 sm:$0xff]  }
 0x6eb   :  { %5590 = vmatpush3.bf16.msra.mxu1 %v6444_v39  ;;  %4682 = vmatprep.subr.bf16.mxu0 %v6447_v40  ;;  %v6519_v39 = vld [vmem:[#allocation15 + $0x550] ss:$28 sps:$4 sm:$0xff]  }
 0x6ec   :  { %5591 = vmatprep.subr.bf16.mxu1 %v6448_v41  ;;  %v6524_v40 = vld [vmem:[#allocation15 + $0x58c] ss:$28 sps:$4 sm:$0xff]  }
 0x6ed   :  { %v6522_v41 = vld [vmem:[#allocation15 + $0x588] ss:$28 sps:$4 sm:$0xff]  }
 0x6ee   :  { %4683 = vmatpush1.bf16.msra.mxu0 %v6445_v42  ;;  %v6527_v42 = vld [vmem:[#allocation15 + $0x5c4] ss:$28 sps:$4 sm:$0xff]  }
 0x6ef   :  { %5592 = vmatpush3.bf16.msra.mxu1 %v6449_v43  ;;  %4684 = vmatprep.subr.bf16.mxu0 %v6452_v44  ;;  %v6525_v43 = vld [vmem:[#allocation15 + $0x5c0] ss:$28 sps:$4 sm:$0xff]  }
 0x6f0   :  { %5593 = vmatprep.subr.bf16.mxu1 %v6453_v45  ;;  %v6530_v44 = vld [vmem:[#allocation15 + $0x5fc] ss:$28 sps:$4 sm:$0xff]  }
 0x6f1   :  { %v6528_v45 = vld [vmem:[#allocation15 + $0x5f8] ss:$28 sps:$4 sm:$0xff]  }
 0x6f2   :  { %4685 = vmatpush1.bf16.msra.mxu0 %v6450_v46  ;;  %v6533_v46 = vld [vmem:[#allocation15 + $0x634] ss:$28 sps:$4 sm:$0xff]  }
 0x6f3   :  { %5594 = vmatpush3.bf16.msra.mxu1 %v6454_v47  ;;  %4686 = vmatprep.subr.bf16.mxu0 %v6457_v48  ;;  %v6531_v47 = vld [vmem:[#allocation15 + $0x630] ss:$28 sps:$4 sm:$0xff]  }
 0x6f4   :  { %5601 = vmatprep.subr.bf16.mxu1 %v6458_v49  ;;  %v6536_v48 = vld [vmem:[#allocation15 + $0x66c] ss:$28 sps:$4 sm:$0xff]  }
 0x6f5   :  { %v6534_v49 = vld [vmem:[#allocation15 + $0x668] ss:$28 sps:$4 sm:$0xff]  }
 0x6f6   :  { %4789 = vmatmul.mubr.bf16.vlgmr.msra.gmra.mrb[28].mxu1 %v7357_v51  ;;  %4687 = vmatpush1.bf16.msra.mxu0 %v6455_v50  ;;  %v6539_v50 = vld [vmem:[#allocation15 + $0x6a4] ss:$28 sps:$4 sm:$0xff]  }
 0x6f7   :  { %5602 = vmatpush3.bf16.msra.mxu1 %v6459_v0  ;;  %4829 = vmatprep.mubr.bf16.mxu1 %v7371_v15  ;;  %v6537_v0 = vld [vmem:[#allocation15 + $0x6a0] ss:$28 sps:$4 sm:$0xff]  }
 0x6f8   :  { %4688 = vmatprep.subr.bf16.mxu0 %v6462_v53  ;;  %5603 = vmatprep.subr.bf16.mxu1 %v6463_v54  ;;  %v6542_v53 = vld [vmem:[#allocation15 + $0x6dc] ss:$28 sps:$4 sm:$0xff]  }
 0x6f9   :  { %v6540_v54 = vld [vmem:[#allocation15 + $0x6d8] ss:$28 sps:$4 sm:$0xff]  }
 0x6fa   :  { %4689 = vmatpush1.bf16.msra.mxu0 %v6460_v55  ;;  %v7385_v55 = vld [vmem:[#allocation16] sm:$0xff] }
 0x6fb   :  { %5604 = vmatpush3.bf16.msra.mxu1 %v6464_v56  ;;  %4690 = vmatprep.subr.bf16.mxu0 %v6467_v57  ;;  %v3314_v56 = vrot.slane %v7385_v55, %v7203_v3  ;;  %v3322_v57 = vrot.slane %v7385_v55, %v7218_v27 }
 0x6fc   :  { %5605 = vmatprep.subr.bf16.mxu1 %v6468_v58  ;;  %v3318_v58 = vrot.slane %v7385_v55, %v7206_v5 }
 0x6fe   :  { %4691 = vmatpush1.bf16.msra.mxu0 %v6465_v59  ;;  %v3326_v59 = vrot.slane %v7385_v55, %v7224_v29 }
 0x6ff   :  { %5606 = vmatpush3.bf16.msra.mxu1 %v6469_v60  ;;  %4692 = vmatprep.subr.bf16.mxu0 %v6472_v61 }
 0x700   :  { %5607 = vmatprep.subr.bf16.mxu1 %v6473_v62 }
 0x702   :  { %4693 = vmatpush1.bf16.msra.mxu0 %v6470_v63 }
 0x703   :  { %5608 = vmatpush3.bf16.msra.mxu1 %v6474_v1  ;;  %4694 = vmatprep.subr.bf16.mxu0 %v6477_v4 }
 0x704   :  { %5609 = vmatprep.subr.bf16.mxu1 %v6478_v6 }
 0x706   :  { %4695 = vmatpush1.bf16.msra.mxu0 %v6475_v7 }
 0x707   :  { %5610 = vmatpush3.bf16.msra.mxu1 %v6479_v37  ;;  %4696 = vmatprep.subr.bf16.mxu0 %v6482_v8 }
 0x708   :  { %5611 = vmatprep.subr.bf16.mxu1 %v6483_v9 }
 0x70a   :  { %4697 = vmatpush1.bf16.msra.mxu0 %v6480_v10 }
 0x70b   :  { %5612 = vmatpush3.bf16.msra.mxu1 %v6484_v11  ;;  %4698 = vmatprep.subr.bf16.mxu0 %v6487_v12 }
 0x70c   :  { %5613 = vmatprep.subr.bf16.mxu1 %v6488_v13 }
 0x70e   :  { %4699 = vmatpush1.bf16.msra.mxu0 %v6485_v16 }
 0x70f   :  { %5614 = vmatpush3.bf16.msra.mxu1 %v6489_v17  ;;  %4700 = vmatprep.subr.bf16.mxu0 %v6492_v18 }
 0x710   :  { %5615 = vmatprep.subr.bf16.mxu1 %v6493_v19 }
 0x712   :  { %4701 = vmatpush1.bf16.msra.mxu0 %v6490_v20 }
 0x713   :  { %5616 = vmatpush3.bf16.msra.mxu1 %v6494_v21  ;;  %4713 = vmatprep.subr.bf16.mxu0 %v6497_v22 }
 0x715   :  { %4703 = vmatmul.mubr.bf16.vlgmr.msra.gmra.mrb[12].mxu0 %v7357_v51  ;;  %v6512_v51 = vld [vmem:[#allocation15 + $0x4ac] ss:$28 sps:$4 sm:$0xff]  }
 0x716   :  { %4830 = vmatmul.mubr.bf16.vlgmr.msra.gmra.mrb[32].mxu1 %v7369_v14  ;;  %4714 = vmatpush1.bf16.msra.mxu0 %v6495_v23 }
 0x717   :  { %4745 = vmatprep.mubr.bf16.mxu0 %v7371_v15  ;;  %4715 = vmatprep.subr.bf16.mxu0 %v6500_v24  ;;  %v6513_v15 = vld [vmem:[#allocation15 + $0x4e0] ss:$28 sps:$4 sm:$0xff]  }
 0x71a   :  { %4716 = vmatpush1.bf16.msra.mxu0 %v6498_v25 }
 0x71b   :  { %4717 = vmatprep.subr.bf16.mxu0 %v6503_v26 }
 0x71e   :  { %4718 = vmatpush1.bf16.msra.mxu0 %v6501_v28 }
 0x71f   :  { %4719 = vmatprep.subr.bf16.mxu0 %v6506_v30 }
 0x722   :  { %4720 = vmatpush1.bf16.msra.mxu0 %v6504_v31 }
 0x723   :  { %4721 = vmatprep.subr.bf16.mxu0 %v6509_v32 }
 0x726   :  { %4722 = vmatpush1.bf16.msra.mxu0 %v6507_v52 }
 0x727   :  { %4723 = vmatprep.subr.bf16.mxu0 %v6512_v51 }
 0x72a   :  { %4724 = vmatpush1.bf16.msra.mxu0 %v6510_v33 }
 0x72b   :  { %4725 = vmatprep.subr.bf16.mxu0 %v6515_v34 }
 0x72e   :  { %4726 = vmatpush1.bf16.msra.mxu0 %v6513_v15 }
 0x72f   :  { %4727 = vmatprep.subr.bf16.mxu0 %v6518_v35 }
 0x732   :  { %4728 = vmatpush1.bf16.msra.mxu0 %v6516_v36 }
 0x733   :  { %4729 = vmatprep.subr.bf16.mxu0 %v6521_v38 }
 0x736   :  { %4730 = vmatpush1.bf16.msra.mxu0 %v6519_v39 }
 0x737   :  { %4731 = vmatprep.subr.bf16.mxu0 %v6524_v40 }
 0x73a   :  { %4732 = vmatpush1.bf16.msra.mxu0 %v6522_v41 }
 0x73b   :  { %4733 = vmatprep.subr.bf16.mxu0 %v6527_v42 }
 0x73e   :  { %4734 = vmatpush1.bf16.msra.mxu0 %v6525_v43 }
 0x73f   :  { %4735 = vmatprep.subr.bf16.mxu0 %v6530_v44 }
 0x742   :  { %4736 = vmatpush1.bf16.msra.mxu0 %v6528_v45 }
 0x743   :  { %4737 = vmatprep.subr.bf16.mxu0 %v6533_v46 }
 0x746   :  { %4738 = vmatpush1.bf16.msra.mxu0 %v6531_v47 }
 0x747   :  { %4739 = vmatprep.subr.bf16.mxu0 %v6536_v48 }
 0x74a   :  { %4740 = vmatpush1.bf16.msra.mxu0 %v6534_v49 }
 0x74b   :  { %4741 = vmatprep.subr.bf16.mxu0 %v6539_v50 }
 0x74e   :  { %4742 = vmatpush1.bf16.msra.mxu0 %v6537_v0 }
 0x74f   :  { %4743 = vmatprep.subr.bf16.mxu0 %v6542_v53 }
 0x752   :  { %4744 = vmatpush1.bf16.msra.mxu0 %v6540_v54 }
 0x755   :  { %4746 = vmatmul.mubr.bf16.vlgmr.msra.gmra.mrb[12].mxu0 %v7369_v14 }
 0x7a8   :  { %v4575_v60 = vpop.f32.mrb[8].mxu0  ;;  %v4661_v61 = vpop.f32.mrb[24].mxu1 }
 0x7a9   :  { %v5639_v62 = vadd.f32 %v4575_v60, %v3314_v56  ;;  %v5643_v63 = vadd.f32 %v4661_v61, %v3322_v57  ;;  %v4577_v1 = vpop.f32.mrb[9].mxu0  ;;  %v4663_v14 = vpop.f32.mrb[25].mxu1 }
 0x7aa   :  { %v5640_v4 = vadd.f32 %v4577_v1, %v3318_v58  ;;  %v5644_v6 = vadd.f32 %v4663_v14, %v3326_v59  ;;  %v4579_v7 = vpop.f32.mrb[10].mxu0  ;;  %v4665_v37 = vpop.f32.mrb[26].mxu1 }
 0x7ab   :  { %v4838_v3 = vmul.f32 0.5, %v5639_v62  ;;  %v4840_v8 = vmul.f32 0.5, %v5643_v63  ;;  %v5641_v9 = vadd.f32 %v4579_v7, %v3314_v56  ;;  %v5645_v27 = vadd.f32 %v4665_v37, %v3322_v57  ;;  %v4581_v10 = vpop.f32.mrb[11].mxu0  ;;  %v4667_v11 = vpop.f32.mrb[27].mxu1 }
 0x7ac   :  { %v4839_v5 = vmul.f32 0.5, %v5640_v4  ;;  %v4841_v12 = vmul.f32 0.5, %v5644_v6  ;;  %v5642_v13 = vadd.f32 %v4581_v10, %v3318_v58  ;;  %v5646_v29 = vadd.f32 %v4667_v11, %v3326_v59 }
 0x7ad   :  { %6547 = vtanh.f32 %v4838_v3  ;;  %v4845_v16 = vmul.f32 0.5, %v5641_v9  ;;  %v4847_v17 = vmul.f32 0.5, %v5645_v27  ;;  %v3337_v56 = vsub.s32 6, %v7200_v2 }
 0x7ae   :  { %6549 = vtanh.f32 %v4840_v8  ;;  %v4846_v18 = vmul.f32 0.5, %v5642_v13  ;;  %v4848_v19 = vmul.f32 0.5, %v5646_v29  ;;  %v3329_v13 = vsub.s32 4, %v7200_v2 }
 0x7af   :  { %6551 = vtanh.f32 %v4839_v5  ;;  %v3338_v57 = vrot.slane %v7385_v55, %v3337_v56  ;;  %v3333_v29 = vsub.s32 5, %v7200_v2 }
 0x7b0   :  { %6553 = vtanh.f32 %v4841_v12 }
 0x7b1   :  { %6555 = vtanh.f32 %v4845_v16  ;;  %v3330_v16 = vrot.slane %v7385_v55, %v3329_v13 }
 0x7b2   :  { %6557 = vtanh.f32 %v4847_v17  ;;  %v3334_v17 = vrot.slane %v7385_v55, %v3333_v29 }
 0x7b3   :  { %6559 = vtanh.f32 %v4846_v18 }
 0x7b4   :  { %6561 = vtanh.f32 %v4848_v19 }
 0x7b7   :  { %v6548_v20 = vpop.eup %6547 }
 0x7b8   :  { %v6550_v21 = vpop.eup %6549  ;;  %v4866_v22 = vadd.f32 1.0, %v6548_v20 }
 0x7b9   :  { %v6552_v23 = vpop.eup %6551  ;;  %v4868_v24 = vadd.f32 1.0, %v6550_v21 }
 0x7ba   :  { %v6554_v25 = vpop.eup %6553  ;;  %v4880_v26 = vmul.f32 0.5, %v4866_v22  ;;  %v4867_v28 = vadd.f32 1.0, %v6552_v23 }
 0x7bb   :  { %v6556_v30 = vpop.eup %6555  ;;  %v4882_v31 = vmul.f32 0.5, %v4868_v24  ;;  %v4869_v32 = vadd.f32 1.0, %v6554_v25 }
 0x7bc   :  { %v6558_v52 = vpop.eup %6557  ;;  %v4881_v51 = vmul.f32 0.5, %v4867_v28  ;;  %v4873_v33 = vadd.f32 1.0, %v6556_v30 }
 0x7bd   :  { %v6560_v34 = vpop.eup %6559  ;;  %v4883_v15 = vmul.f32 0.5, %v4869_v32  ;;  %v4875_v35 = vadd.f32 1.0, %v6558_v52 }
 0x7be   :  { %v6562_v36 = vpop.eup %6561  ;;  %v5549_v38 = vpack.c.bf16 %v4881_v51, %v4880_v26  ;;  %v4887_v39 = vmul.f32 0.5, %v4873_v33  ;;  %v4874_v40 = vadd.f32 1.0, %v6560_v34 }
 0x7bf   :  { %v5550_v41 = vpack.c.bf16 %v4883_v15, %v4882_v31  ;;  %v4889_v42 = vmul.f32 0.5, %v4875_v35  ;;  %v4876_v43 = vadd.f32 1.0, %v6562_v36 }
 0x7c0   :  { %4938 = vst [vmem:[%s7439_s14] sm:$0xff] %v5549_v38  ;;  %v4888_v44 = vmul.f32 0.5, %v4874_v40 }
 0x7c1   :  { %4939 = vst [vmem:[%s7439_s14 + $0x8] sm:$0xff] %v5550_v41  ;;  %v4890_v45 = vmul.f32 0.5, %v4876_v43 }
 0x7c2   :  { %v5553_v46 = vpack.c.bf16 %v4888_v44, %v4887_v39 }
 0x7c3   :  { %v5554_v47 = vpack.c.bf16 %v4890_v45, %v4889_v42 }
 0x7c4   :  { %4942 = vst [vmem:[%s7439_s14 + $0x1c] sm:$0xff] %v5553_v46 }
 0x7c5   :  { %4943 = vst [vmem:[%s7439_s14 + $0x24] sm:$0xff] %v5554_v47 }
 0x7c9   :  { %v5595_v48 = vpop.f32.mrb[28].mxu1 }
 0x7ca   :  { %v5596_v49 = vpop.f32.mrb[29].mxu1 }
 0x7cb   :  { %v5597_v50 = vadd.f32 %v5596_v49, %v5595_v48  ;;  %v5598_v0 = vpop.f32.mrb[30].mxu1 }
 0x7cc   :  { %v5599_v53 = vpop.f32.mrb[31].mxu1 }
 0x7cd   :  { %v5600_v54 = vadd.f32 %v5599_v53, %v5598_v0  ;;  %v4791_v60 = vadd.f32 %v5597_v50, %v3338_v57 }
 0x7cf   :  { %v4794_v1 = vadd.f32 %v5600_v54, %v3338_v57 }
 0x7e9   :  { %v5617_v58 = vpop.f32.mrb[32].mxu1 }
 0x7ea   :  { %v5618_v59 = vpop.f32.mrb[33].mxu1 }
 0x7eb   :  { %v5619_v61 = vadd.f32 %v5618_v59, %v5617_v58  ;;  %v5620_v62 = vpop.f32.mrb[34].mxu1 }
 0x7ec   :  { %v5621_v63 = vpop.f32.mrb[35].mxu1 }
 0x7ed   :  { %v4832_v14 = vadd.f32 %v5619_v61, %v4791_v60  ;;  %v5622_v4 = vadd.f32 %v5621_v63, %v5620_v62 }
 0x7ef   :  { %v4844_v6 = vmul.f32 0.5, %v4832_v14  ;;  %v4835_v7 = vadd.f32 %v5622_v4, %v4794_v1 }
 0x7f1   :  { %6563 = vtanh.f32 %v4844_v6  ;;  %v4851_v37 = vmul.f32 0.5, %v4835_v7 }
 0x7f3   :  { %6565 = vtanh.f32 %v4851_v37 }
 0x7fb   :  { %v6564_v3 = vpop.eup %6563 }
 0x7fc   :  { %v4872_v8 = vadd.f32 1.0, %v6564_v3 }
 0x7fd   :  { %v6566_v9 = vpop.eup %6565 }
 0x7fe   :  { %v4886_v27 = vmul.f32 0.5, %v4872_v8  ;;  %v4879_v10 = vadd.f32 1.0, %v6566_v9 }
 0x800   :  { %v5552_v11 = vpack.c.bf16 %v4886_v27, %v4886_v27  ;;  %v4893_v5 = vmul.f32 0.5, %v4879_v10 }
 0x802   :  { %4941 = vst [vmem:[%s7439_s14 + $0x18] sm:$0xf] %v5552_v11  ;;  %v5556_v12 = vpack.c.bf16 %v4893_v5, %v4893_v5 }
 0x804   :  { %4945 = vst [vmem:[%s7439_s14 + $0x34] sm:$0xf] %v5556_v12 }
 0x828   :  { %v4747_v18 = vpop.f32.mrb[12].mxu0 }
 0x829   :  { %v5647_v19 = vadd.f32 %v4747_v18, %v3330_v16  ;;  %v4749_v20 = vpop.f32.mrb[13].mxu0 }
 0x82a   :  { %v5648_v21 = vadd.f32 %v4749_v20, %v3334_v17  ;;  %v4751_v22 = vpop.f32.mrb[14].mxu0 }
 0x82b   :  { %v4842_v23 = vmul.f32 0.5, %v5647_v19  ;;  %v5649_v24 = vadd.f32 %v4751_v22, %v3330_v16  ;;  %v4753_v25 = vpop.f32.mrb[15].mxu0 }
 0x82c   :  { %v4843_v26 = vmul.f32 0.5, %v5648_v21  ;;  %v5650_v28 = vadd.f32 %v4753_v25, %v3334_v17 }
 0x82d   :  { %6567 = vtanh.f32 %v4842_v23  ;;  %v4849_v30 = vmul.f32 0.5, %v5649_v24 }
 0x82e   :  { %6569 = vtanh.f32 %v4843_v26  ;;  %v4850_v31 = vmul.f32 0.5, %v5650_v28 }
 0x82f   :  { %6571 = vtanh.f32 %v4849_v30 }
 0x830   :  { %6573 = vtanh.f32 %v4850_v31 }
 0x837   :  { %v6568_v2 = vpop.eup %6567 }
 0x838   :  { %v6570_v32 = vpop.eup %6569  ;;  %v4870_v52 = vadd.f32 1.0, %v6568_v2 }
 0x839   :  { %v6572_v55 = vpop.eup %6571  ;;  %v4871_v51 = vadd.f32 1.0, %v6570_v32 }
 0x83a   :  { %v6574_v33 = vpop.eup %6573  ;;  %v4884_v34 = vmul.f32 0.5, %v4870_v52  ;;  %v4877_v15 = vadd.f32 1.0, %v6572_v55 }
 0x83b   :  { %v4885_v35 = vmul.f32 0.5, %v4871_v51  ;;  %v4878_v36 = vadd.f32 1.0, %v6574_v33 }
 0x83c   :  { %v4891_v38 = vmul.f32 0.5, %v4877_v15 }
 0x83d   :  { %v5551_v39 = vpack.c.bf16 %v4885_v35, %v4884_v34  ;;  %v4892_v40 = vmul.f32 0.5, %v4878_v36 }
 0x83f   :  { %4940 = vst [vmem:[%s7439_s14 + $0x10] sm:$0xff] %v5551_v39  ;;  %v5555_v41 = vpack.c.bf16 %v4892_v40, %v4891_v38 }
 0x841   :  { %4944 = vst [vmem:[%s7439_s14 + $0x2c] sm:$0xff] %v5555_v41 }
 0x842   :  { %4956 = vsyncpa [#allocation3], 1 }
 0x843   :  { %4957 = vsyncpa [#allocation5], 1 }
 0x844   :  { %4958 = vsyncpa [#allocation8], 1 }
 0x845   :  { %4959 = vsyncpa [#allocation11], 1 }
 0x846   :  { %4960 = vsyncpa [#allocation14], 1 }
 0x847   :  { %4961 = vsyncpa [#allocation17], 1 }

</bundles_post_ra>
